<compile_context>
chip_gen: v7x
topology: tpu7x:2x2x1
jax: 0.10.0
libtpu: 0.0.40
codegen_flags: <defaults>
</compile_context>

<pallas_src>
import functools

import jax
import jax.numpy as jnp
from jax import lax
from jax.experimental import pallas as pl
from jax.experimental.pallas import tpu as pltpu


# ---------------------------------------------------------------------------
# Fused forward kernel — one grid step per block of NB batch elements.
#   p1_ref : (POH1, 4*POW1P*NB, K1)  conv1 im2col patches, pre-arranged so the
#            M dim per pooled row is (pool-window-slot g in 0..3, pooled col w,
#            image n); padded cols w>=POW1 are zero and never read downstream.
#   w1_ref : (K1, C1)        conv1 weight * bn1 scale           (bf16)
#   c1_ref : (1, C1)         conv1 bias folded with bn1 shift   (f32)
#   w2_ref : (k2*k2, C1, C2) conv2 weight * bn2 scale, per (kh,kw)  (bf16)
#   c2_ref : (1, C2)
#   wl_ref : (POH2, POW2*C2, E)  linear1 weight, (h2,(w2,c)) layout (bf16)
#   bl_ref : (1, E)
#   wf_ref : (E, Hsum)       concatenated FiLM head weights (one task) (bf16)
#   bf_ref : (1, Hsum)
#   out_ref: (NB, E + Hsum)  [feat | film] concatenated output (f32)
#   pool1_ref : VMEM (POH1, POW1P*NB, C1) bf16 scratch, rows ordered (w, n)
# ---------------------------------------------------------------------------
def _private_fwd_kernel(p1_ref, w1_ref, c1_ref, w2_ref, c2_ref,
                        wl_ref, bl_ref, wf_ref, bf_ref,
                        out_ref, pool1_ref,
                        *, NB, POH1, POW1P, KH2, KW2, OW2, POH2, POW2,
                        C1, C2, E, act):
    c1 = c1_ref[...]                                        # (1, C1) f32
    c2 = c2_ref[...]                                        # (1, C2) f32

    # ---- conv1 (+folded BN) -> 2x2 maxpool -> ReLU, one pooled row / iter --
    @pl.loop(0, POH1)
    def _conv1_row(ph):
        slab = p1_ref[ph]                                   # (4*POW1P*NB, K1)
        y = jnp.dot(slab, w1_ref[...],
                    preferred_element_type=jnp.float32)     # (4*POW1P*NB, C1)
        y4 = y.reshape(4, POW1P * NB, C1)                   # clean split (16*NB mult of 8)
        m = jnp.maximum(jnp.maximum(y4[0], y4[1]),
                        jnp.maximum(y4[2], y4[3]))          # 2x2 window max
        # shift (bias+BN) and ReLU commute with max
        pool1_ref[ph] = jnp.maximum(m + c1, 0.0).astype(pool1_ref.dtype)

    # ---- conv2 (+folded BN) -> 2x2 maxpool -> ReLU -> linear1 (fused) ------
    def conv2_row(ph2, feat):
        # 3x3 conv decomposed into 9 shifted accumulating matmuls; both conv
        # rows of this pooled row share the M dimension (2*OW2*NB rows).
        acc = jnp.zeros((2 * OW2 * NB, C2), jnp.float32)
        for kh in range(KH2):
            rows2 = pool1_ref[pl.ds(2 * ph2 + kh, 2)]       # (2, POW1P*NB, C1)
            for kw in range(KW2):
                sub = rows2[:, kw * NB:(kw + OW2) * NB, :]  # (2, OW2*NB, C1)
                lhs = sub.reshape(2 * OW2 * NB, C1)
                acc = acc + jnp.dot(lhs, w2_ref[kh * KW2 + kw],
                                    preferred_element_type=jnp.float32)
        vmax = jnp.maximum(acc[:OW2 * NB], acc[OW2 * NB:])  # vertical 2x max
        # horizontal 2x max + bias + ReLU, assembled as a (NB, POW2*C2) row
        pieces = []
        for w2 in range(POW2):
            a0 = vmax[(2 * w2) * NB:(2 * w2 + 1) * NB, :]
            a1 = vmax[(2 * w2 + 1) * NB:(2 * w2 + 2) * NB, :]
            pieces.append(jnp.maximum(jnp.maximum(a0, a1) + c2, 0.0))
        row = jnp.concatenate(pieces, axis=-1)              # (NB, POW2*C2) f32
        # linear1 distributed over pooled rows: no flatten buffer needed.
        return feat + jnp.dot(row.astype(wl_ref.dtype), wl_ref[ph2],
                              preferred_element_type=jnp.float32)

    feat = lax.fori_loop(0, POH2, conv2_row,
                         jnp.zeros((NB, E), jnp.float32), unroll=True)

    # ---- linear1 bias + ReLU ------------------------------------------------
    feat = jnp.maximum(feat + bl_ref[...], 0.0)             # (NB, E) f32

    # ---- FiLM heads (all layers concatenated into one matmul) ---------------
    fv = jnp.dot(feat.astype(wf_ref.dtype), wf_ref[...],
                 preferred_element_type=jnp.float32) + bf_ref[...]
    if act == "relu":
        fv = jnp.maximum(fv, 0.0)
    else:
        fv = jax.nn.sigmoid(fv)

    out_ref[...] = jnp.concatenate([feat, fv], axis=-1)     # (NB, E+Hsum)


def _build_conv1_patches(x_nhwc, k1, POH1, POW1, POW1P, NB, nblk):
    """x: (Bp,H,W,C) -> (nblk, POH1, 4*POW1P*NB, K1).

    M-order per pooled row: (g = row_in_pair*2 + col_parity, pooled col w,
    image n); feature order (kh*k1 + kw)*C + ci matches w1.reshape(-1, C1).
    """
    Bp, H, W, C = x_nhwc.shape
    OH1, OW1 = H - k1 + 1, W - k1 + 1
    K1 = k1 * k1 * C
    cols = [x_nhwc[:, kh:kh + OH1, kw:kw + OW1, :]
            for kh in range(k1) for kw in range(k1)]
    p = jnp.stack(cols, axis=3).reshape(Bp, OH1, OW1, K1)
    p = p[:, :2 * POH1, :2 * POW1, :]                        # drop unused row/col
    p = p.reshape(Bp, POH1, 2, POW1, 2, K1)                  # (b,ph,r,w,parity,K1)
    p = jnp.pad(p, ((0, 0), (0, 0), (0, 0),
                    (0, POW1P - POW1), (0, 0), (0, 0)))      # pad pooled cols
    p = jnp.transpose(p, (0, 1, 2, 4, 3, 5))                 # (b,ph,r,parity,w,K1)
    p = p.reshape(nblk, NB, POH1, 4, POW1P, K1)              # g = r*2+parity
    p = jnp.transpose(p, (0, 2, 3, 4, 1, 5))                 # (blk,ph,g,w,n,K1)
    return p.reshape(nblk, POH1, 4 * POW1P * NB, K1)


@functools.partial(jax.jit, static_argnames=("k1", "k2", "act"))
def _private_forward(x_nchw, w1e, c1e, w2r, c2e, wlr, bl, wf, bf, *, k1, k2, act):
    B, ncha, H, W = x_nchw.shape
    K1, C1 = w1e.shape
    C2 = c2e.shape[1]
    E = bl.shape[1]
    Hsum = bf.shape[1]

    OH1, OW1 = H - k1 + 1, W - k1 + 1
    POH1, POW1 = OH1 // 2, OW1 // 2
    POW1P = ((POW1 + 7) // 8) * 8            # pad pooled width to mult. of 8
    OW2 = POW1 - k2 + 1
    POH2 = (POH1 - k2 + 1) // 2
    POW2 = OW2 // 2

    # batch several images per grid step (review item 1)
    NB = B if B < 8 else 8
    Bp = ((B + NB - 1) // NB) * NB
    nblk = Bp // NB
    if Bp != B:
        x_nchw = jnp.pad(x_nchw, ((0, Bp - B), (0, 0), (0, 0), (0, 0)))

    x = jnp.transpose(x_nchw, (0, 2, 3, 1)).astype(jnp.float32)   # NCHW -> NHWC
    patches = _build_conv1_patches(x, k1, POH1, POW1, POW1P, NB, nblk)
    patches = patches.astype(jnp.bfloat16)

    kernel = functools.partial(
        _private_fwd_kernel, NB=NB, POH1=POH1, POW1P=POW1P, KH2=k2, KW2=k2,
        OW2=OW2, POH2=POH2, POW2=POW2, C1=C1, C2=C2, E=E, act=act)

    out = pl.pallas_call(
        kernel,
        out_shape=jax.ShapeDtypeStruct((nblk, NB, E + Hsum), jnp.float32),
        grid_spec=pltpu.PrefetchScalarGridSpec(
            num_scalar_prefetch=0,
            grid=(nblk,),
            in_specs=[
                pl.BlockSpec((None, POH1, 4 * POW1P * NB, K1),
                             lambda g: (g, 0, 0, 0)),
                pl.BlockSpec((K1, C1), lambda g: (0, 0)),
                pl.BlockSpec((1, C1), lambda g: (0, 0)),
                pl.BlockSpec((k2 * k2, C1, C2), lambda g: (0, 0, 0)),
                pl.BlockSpec((1, C2), lambda g: (0, 0)),
                pl.BlockSpec((POH2, POW2 * C2, E), lambda g: (0, 0, 0)),
                pl.BlockSpec((1, E), lambda g: (0, 0)),
                pl.BlockSpec((E, Hsum), lambda g: (0, 0)),
                pl.BlockSpec((1, Hsum), lambda g: (0, 0)),
            ],
            out_specs=pl.BlockSpec((None, NB, E + Hsum), lambda g: (g, 0, 0)),
            scratch_shapes=[
                pltpu.VMEM((POH1, POW1P * NB, C1), jnp.bfloat16),   # pool1
            ],
        ),
        compiler_params=pltpu.CompilerParams(
            dimension_semantics=("parallel",)),
    )(patches, w1e, c1e, w2r, c2e, wlr, bl, wf, bf)

    out = out.reshape(Bp, E + Hsum)[:B]
    return out[:, :E], out[:, E:]


# ---------------------------------------------------------------------------
# Module wrapper (parameter containers + folded/packed parameters)
# ---------------------------------------------------------------------------
class PrivatePallas:
    def __init__(self, key, *, ncha=3, size=32, latent_dim=32, ntasks=2,
                 layers=2, film_hiddens=(16, 16), use_relu=True,
                 one_representation=False):
        self.layers = layers
        self.hiddens = [int(h) for h in film_hiddens]
        self.dim_embedding = latent_dim
        self.ntasks = ntasks
        self.one_representation = one_representation
        self.act = "relu" if use_relu else "sigmoid"

        conv_hiddens = (32, 32)                   # cifar100 branch of reference
        flatten = 1152
        self.k1, self.k2 = size // 8, size // 10  # kernel sizes 4 and 3
        n_rep = 1 if one_representation else ntasks

        h1 = (size - self.k1 + 1) // 2            # 14
        h2 = (h1 - self.k2 + 1) // 2              # 6
        assert conv_hiddens[1] * h2 * h2 == flatten

        keys = iter(jax.random.split(key, 128))

        def nrm(shape, s=0.1):
            return (s * jax.random.normal(next(keys), shape)).astype(jnp.float32)

        def uni(shape, lo, hi):
            return jax.random.uniform(next(keys), shape, jnp.float32, lo, hi)

        eps = 1e-5
        C1, C2 = conv_hiddens
        self.conv_params = []
        for _ in range(n_rep):
            w1 = nrm((self.k1, self.k1, ncha, C1))            # HWIO
            b1 = nrm((C1,))
            g1, be1, mu1, v1 = (uni((C1,), 0.5, 1.5), nrm((C1,)),
                                nrm((C1,)), uni((C1,), 0.5, 1.5))
            w2 = nrm((self.k2, self.k2, C1, C2))
            b2 = nrm((C2,))
            g2, be2, mu2, v2 = (uni((C2,), 0.5, 1.5), nrm((C2,)),
                                nrm((C2,)), uni((C2,), 0.5, 1.5))

            # Fold eval-mode BN scale into conv weights; bias + BN shift into
            # a single per-channel constant (applied after the pool).
            s1 = g1 / jnp.sqrt(v1 + eps)
            s2 = g2 / jnp.sqrt(v2 + eps)
            w1e = (w1.reshape(-1, C1) * s1[None, :]).astype(jnp.bfloat16)
            c1e = ((b1 - mu1) * s1 + be1).reshape(1, C1).astype(jnp.float32)
            w2r = (w2 * s2[None, None, None, :]).reshape(
                self.k2 * self.k2, C1, C2).astype(jnp.bfloat16)
            c2e = ((b2 - mu2) * s2 + be2).reshape(1, C2).astype(jnp.float32)

            # linear1: PyTorch (out, C, H, W) flatten order, repacked to
            # (h2, w2*C2, E) so the kernel can contract per pooled row.
            w_t = nrm((latent_dim, C2, h2, h2))
            wlr = jnp.transpose(w_t, (2, 3, 1, 0)).reshape(
                h2, h2 * C2, latent_dim).astype(jnp.bfloat16)
            bl = nrm((latent_dim,)).reshape(1, latent_dim).astype(jnp.float32)
            self.conv_params.append(dict(w1e=w1e, c1e=c1e, w2r=w2r, c2e=c2e,
                                         wlr=wlr, bl=bl))
        assert self.conv_params[0]["wlr"].shape[0] * \
            self.conv_params[0]["wlr"].shape[1] == flatten

        # FiLM heads: Linear(latent_dim, hiddens[j]) + act, per task,
        # concatenated across layers so they run as a single matmul.
        self.film_params = []
        for _t in range(ntasks):
            ws, bs = [], []
            for j in range(layers):
                ws.append(nrm((latent_dim, self.hiddens[j])))
                bs.append(nrm((self.hiddens[j],)))
            self.film_params.append(
                (jnp.concatenate(ws, axis=1).astype(jnp.bfloat16),
                 jnp.concatenate(bs).reshape(1, -1).astype(jnp.float32)))

    def forward(self, x_nchw, task_id):
        B = x_nchw.shape[0]
        rep = 0 if self.one_representation else task_id
        p = self.conv_params[rep]
        wf, bf = self.film_params[task_id]
        feat, film = _private_forward(
            x_nchw, p["w1e"], p["c1e"], p["w2r"], p["c2e"], p["wlr"], p["bl"],
            wf, bf, k1=self.k1, k2=self.k2, act=self.act)
        m, off = [], 0
        for j in range(self.layers):
            hid = self.hiddens[j]
            fv = film[:, off:off + hid].reshape(B, hid, 1, 1)
            m.append([fv])
            off += hid
        return m, feat


if __name__ == "__main__":
    key = jax.random.PRNGKey(0)
    k_model, k_x = jax.random.split(key)
    model = PrivatePallas(k_model, ncha=3, size=32, latent_dim=32, ntasks=2,
                          layers=2, film_hiddens=(16, 16), use_relu=True,
                          one_representation=False)
    # NCHW input, as in the PyTorch reference (cifar100 inputsize = (3, 32, 32)).
    x = jax.random.normal(k_x, (2, 3, 32, 32), jnp.float32)

    m, feat = model.forward(x, task_id=1)
    feat = jax.block_until_ready(feat)
    for entry in m:
        jax.block_until_ready(entry[0])

    assert feat.shape == (2, 32)
    assert m[0][0].shape == (2, 16, 1, 1) and m[1][0].shape == (2, 16, 1, 1)
    print("KERNEL_OK")
</pallas_src>

<mosaic_0001>
module attributes {stable_mosaic.version = 11 : i64} {
  func.func @_private_fwd_kernel(%arg0: i32, %arg1: memref<1x14x128x48xbf16, #tpu.memory_space<vmem>>, %arg2: memref<48x32xbf16, #tpu.memory_space<vmem>>, %arg3: memref<1x32xf32, #tpu.memory_space<vmem>>, %arg4: memref<9x32x32xbf16, #tpu.memory_space<vmem>>, %arg5: memref<1x32xf32, #tpu.memory_space<vmem>>, %arg6: memref<6x192x32xbf16, #tpu.memory_space<vmem>>, %arg7: memref<1x32xf32, #tpu.memory_space<vmem>>, %arg8: memref<32x32xbf16, #tpu.memory_space<vmem>>, %arg9: memref<1x32xf32, #tpu.memory_space<vmem>>, %arg10: memref<1x2x64xf32, #tpu.memory_space<vmem>>, %arg11: memref<14x32x32xbf16, #tpu.memory_space<vmem>>) attributes {dimension_semantics = [#tpu.dimension_semantics<parallel>], iteration_bounds = array<i64: 1>, scalar_prefetch = 0 : i64, scratch_operands = 1 : i64, tpu.core_type = #tpu.core_type<tc>, window_params = [{transform_indices = @transform_0, window_bounds = array<i64: 1, 14, 128, 48>}, {pipeline_mode = #tpu.pipeline_mode<synchronous>, transform_indices = @transform_1, window_bounds = array<i64: 48, 32>}, {pipeline_mode = #tpu.pipeline_mode<synchronous>, transform_indices = @transform_2, window_bounds = array<i64: 1, 32>}, {pipeline_mode = #tpu.pipeline_mode<synchronous>, transform_indices = @transform_3, window_bounds = array<i64: 9, 32, 32>}, {pipeline_mode = #tpu.pipeline_mode<synchronous>, transform_indices = @transform_4, window_bounds = array<i64: 1, 32>}, {pipeline_mode = #tpu.pipeline_mode<synchronous>, transform_indices = @transform_5, window_bounds = array<i64: 6, 192, 32>}, {pipeline_mode = #tpu.pipeline_mode<synchronous>, transform_indices = @transform_6, window_bounds = array<i64: 1, 32>}, {pipeline_mode = #tpu.pipeline_mode<synchronous>, transform_indices = @transform_7, window_bounds = array<i64: 32, 32>}, {pipeline_mode = #tpu.pipeline_mode<synchronous>, transform_indices = @transform_8, window_bounds = array<i64: 1, 32>}, {transform_indices = @transform_9, window_bounds = array<i64: 1, 2, 64>}]} {
    %c0 = arith.constant 0 : index
    %c0_0 = arith.constant 0 : index
    %0 = vector.load %arg3[%c0, %c0_0] : memref<1x32xf32, #tpu.memory_space<vmem>>, vector<1x32xf32>
    %c0_1 = arith.constant 0 : index
    %c0_2 = arith.constant 0 : index
    %1 = vector.load %arg5[%c0_1, %c0_2] : memref<1x32xf32, #tpu.memory_space<vmem>>, vector<1x32xf32>
    %c0_i32 = arith.constant 0 : i32
    %c14_i32 = arith.constant 14 : i32
    %2 = arith.addi %c0_i32, %c14_i32 : i32
    %c1_i32 = arith.constant 1 : i32
    scf.for %arg12 = %c0_i32 to %2 step %c1_i32  : i32 {
      %c1_i32_358 = arith.constant 1 : i32
      %735 = arith.muli %arg12, %c1_i32_358 : i32
      %c0_i32_359 = arith.constant 0 : i32
      %736 = arith.addi %c0_i32_359, %735 : i32
      %c0_360 = arith.constant 0 : index
      %737 = arith.index_cast %736 : i32 to index
      %c0_361 = arith.constant 0 : index
      %c0_362 = arith.constant 0 : index
      %738 = vector.load %arg1[%c0_360, %737, %c0_361, %c0_362] : memref<1x14x128x48xbf16, #tpu.memory_space<vmem>>, vector<1x1x128x48xbf16>
      %739 = vector.shape_cast %738 : vector<1x1x128x48xbf16> to vector<128x48xbf16>
      %c0_363 = arith.constant 0 : index
      %c0_364 = arith.constant 0 : index
      %740 = vector.load %arg2[%c0_363, %c0_364] : memref<48x32xbf16, #tpu.memory_space<vmem>>, vector<48x32xbf16>
      %cst_365 = arith.constant dense<0.000000e+00> : vector<128x32xf32>
      %741 = tpu.matmul %739, %740, %cst_365 {dimension_numbers = #tpu.dot_dimension_numbers<[1], [0], [0], [1], [0, 0, 1, 1], [], []>} : vector<128x48xbf16>, vector<48x32xbf16>, vector<128x32xf32> -> vector<128x32xf32>
      %742 = vector.shape_cast %741 : vector<128x32xf32> to vector<4x32x32xf32>
      %743 = vector.extract_strided_slice %742 {offsets = [0, 0, 0], sizes = [1, 32, 32], strides = [1, 1, 1]} : vector<4x32x32xf32> to vector<1x32x32xf32>
      %744 = vector.shape_cast %743 : vector<1x32x32xf32> to vector<32x32xf32>
      %745 = vector.extract_strided_slice %742 {offsets = [1, 0, 0], sizes = [1, 32, 32], strides = [1, 1, 1]} : vector<4x32x32xf32> to vector<1x32x32xf32>
      %746 = vector.shape_cast %745 : vector<1x32x32xf32> to vector<32x32xf32>
      %747 = arith.maximumf %744, %746 : vector<32x32xf32>
      %748 = vector.extract_strided_slice %742 {offsets = [2, 0, 0], sizes = [1, 32, 32], strides = [1, 1, 1]} : vector<4x32x32xf32> to vector<1x32x32xf32>
      %749 = vector.shape_cast %748 : vector<1x32x32xf32> to vector<32x32xf32>
      %750 = vector.extract_strided_slice %742 {offsets = [3, 0, 0], sizes = [1, 32, 32], strides = [1, 1, 1]} : vector<4x32x32xf32> to vector<1x32x32xf32>
      %751 = vector.shape_cast %750 : vector<1x32x32xf32> to vector<32x32xf32>
      %752 = arith.maximumf %749, %751 : vector<32x32xf32>
      %753 = arith.maximumf %747, %752 : vector<32x32xf32>
      %754 = vector.broadcast %0 : vector<1x32xf32> to vector<32x32xf32>
      %755 = arith.addf %753, %754 : vector<32x32xf32>
      %cst_366 = arith.constant 0.000000e+00 : f32
      %756 = vector.broadcast %cst_366 : f32 to vector<32x32xf32>
      %757 = arith.maximumf %755, %756 : vector<32x32xf32>
      %758 = arith.truncf %757 : vector<32x32xf32> to vector<32x32xbf16>
      %759 = arith.index_cast %736 : i32 to index
      %c0_367 = arith.constant 0 : index
      %c0_368 = arith.constant 0 : index
      %760 = vector.load %arg11[%759, %c0_367, %c0_368] : memref<14x32x32xbf16, #tpu.memory_space<vmem>>, vector<1x32x32xbf16>
      %761 = vector.shape_cast %760 : vector<1x32x32xbf16> to vector<32x32xbf16>
      %762 = vector.shape_cast %758 : vector<32x32xbf16> to vector<1x32x32xbf16>
      tpu.vector_store %arg11[%759, %c0_367, %c0_368], %762 {strides = array<i32>} : memref<14x32x32xbf16, #tpu.memory_space<vmem>>, vector<1x32x32xbf16>,
    }
    %c14_i32_3 = arith.constant 14 : i32
    %cst = arith.constant 0.000000e+00 : f32
    %3 = vector.broadcast %cst : f32 to vector<2x32xf32>
    %c0_i32_4 = arith.constant 0 : i32
    %cst_5 = arith.constant 0.000000e+00 : f32
    %4 = vector.broadcast %cst_5 : f32 to vector<48x32xf32>
    %c2_i32 = arith.constant 2 : i32
    %5 = arith.muli %c2_i32, %c0_i32_4 : i32
    %c0_i32_6 = arith.constant 0 : i32
    %6 = arith.addi %5, %c0_i32_6 : i32
    %7 = arith.index_cast %6 : i32 to index
    %c0_7 = arith.constant 0 : index
    %c0_8 = arith.constant 0 : index
    %8 = vector.load %arg11[%7, %c0_7, %c0_8] : memref<14x32x32xbf16, #tpu.memory_space<vmem>>, vector<2x32x32xbf16>
    %9 = vector.extract_strided_slice %8 {offsets = [0, 0, 0], sizes = [2, 24, 32], strides = [1, 1, 1]} : vector<2x32x32xbf16> to vector<2x24x32xbf16>
    %10 = vector.shape_cast %9 : vector<2x24x32xbf16> to vector<48x32xbf16>
    %c0_9 = arith.constant 0 : index
    %c0_10 = arith.constant 0 : index
    %c0_11 = arith.constant 0 : index
    %11 = vector.load %arg4[%c0_9, %c0_10, %c0_11] : memref<9x32x32xbf16, #tpu.memory_space<vmem>>, vector<1x32x32xbf16>
    %12 = vector.shape_cast %11 : vector<1x32x32xbf16> to vector<32x32xbf16>
    %cst_12 = arith.constant dense<0.000000e+00> : vector<48x32xf32>
    %13 = tpu.matmul %10, %12, %cst_12 {dimension_numbers = #tpu.dot_dimension_numbers<[1], [0], [0], [1], [0, 0, 1, 1], [], []>} : vector<48x32xbf16>, vector<32x32xbf16>, vector<48x32xf32> -> vector<48x32xf32>
    %14 = arith.addf %4, %13 : vector<48x32xf32>
    %15 = vector.extract_strided_slice %8 {offsets = [0, 2, 0], sizes = [2, 24, 32], strides = [1, 1, 1]} : vector<2x32x32xbf16> to vector<2x24x32xbf16>
    %16 = vector.shape_cast %15 : vector<2x24x32xbf16> to vector<48x32xbf16>
    %c1 = arith.constant 1 : index
    %c0_13 = arith.constant 0 : index
    %c0_14 = arith.constant 0 : index
    %17 = vector.load %arg4[%c1, %c0_13, %c0_14] : memref<9x32x32xbf16, #tpu.memory_space<vmem>>, vector<1x32x32xbf16>
    %18 = vector.shape_cast %17 : vector<1x32x32xbf16> to vector<32x32xbf16>
    %cst_15 = arith.constant dense<0.000000e+00> : vector<48x32xf32>
    %19 = tpu.matmul %16, %18, %cst_15 {dimension_numbers = #tpu.dot_dimension_numbers<[1], [0], [0], [1], [0, 0, 1, 1], [], []>} : vector<48x32xbf16>, vector<32x32xbf16>, vector<48x32xf32> -> vector<48x32xf32>
    %20 = arith.addf %14, %19 : vector<48x32xf32>
    %21 = vector.extract_strided_slice %8 {offsets = [0, 4, 0], sizes = [2, 24, 32], strides = [1, 1, 1]} : vector<2x32x32xbf16> to vector<2x24x32xbf16>
    %22 = vector.shape_cast %21 : vector<2x24x32xbf16> to vector<48x32xbf16>
    %c2 = arith.constant 2 : index
    %c0_16 = arith.constant 0 : index
    %c0_17 = arith.constant 0 : index
    %23 = vector.load %arg4[%c2, %c0_16, %c0_17] : memref<9x32x32xbf16, #tpu.memory_space<vmem>>, vector<1x32x32xbf16>
    %24 = vector.shape_cast %23 : vector<1x32x32xbf16> to vector<32x32xbf16>
    %cst_18 = arith.constant dense<0.000000e+00> : vector<48x32xf32>
    %25 = tpu.matmul %22, %24, %cst_18 {dimension_numbers = #tpu.dot_dimension_numbers<[1], [0], [0], [1], [0, 0, 1, 1], [], []>} : vector<48x32xbf16>, vector<32x32xbf16>, vector<48x32xf32> -> vector<48x32xf32>
    %26 = arith.addf %20, %25 : vector<48x32xf32>
    %c2_i32_19 = arith.constant 2 : i32
    %27 = arith.muli %c2_i32_19, %c0_i32_4 : i32
    %c1_i32_20 = arith.constant 1 : i32
    %28 = arith.addi %27, %c1_i32_20 : i32
    %29 = arith.index_cast %28 : i32 to index
    %c0_21 = arith.constant 0 : index
    %c0_22 = arith.constant 0 : index
    %30 = vector.load %arg11[%29, %c0_21, %c0_22] : memref<14x32x32xbf16, #tpu.memory_space<vmem>>, vector<2x32x32xbf16>
    %31 = vector.extract_strided_slice %30 {offsets = [0, 0, 0], sizes = [2, 24, 32], strides = [1, 1, 1]} : vector<2x32x32xbf16> to vector<2x24x32xbf16>
    %32 = vector.shape_cast %31 : vector<2x24x32xbf16> to vector<48x32xbf16>
    %c3 = arith.constant 3 : index
    %c0_23 = arith.constant 0 : index
    %c0_24 = arith.constant 0 : index
    %33 = vector.load %arg4[%c3, %c0_23, %c0_24] : memref<9x32x32xbf16, #tpu.memory_space<vmem>>, vector<1x32x32xbf16>
    %34 = vector.shape_cast %33 : vector<1x32x32xbf16> to vector<32x32xbf16>
    %cst_25 = arith.constant dense<0.000000e+00> : vector<48x32xf32>
    %35 = tpu.matmul %32, %34, %cst_25 {dimension_numbers = #tpu.dot_dimension_numbers<[1], [0], [0], [1], [0, 0, 1, 1], [], []>} : vector<48x32xbf16>, vector<32x32xbf16>, vector<48x32xf32> -> vector<48x32xf32>
    %36 = arith.addf %26, %35 : vector<48x32xf32>
    %37 = vector.extract_strided_slice %30 {offsets = [0, 2, 0], sizes = [2, 24, 32], strides = [1, 1, 1]} : vector<2x32x32xbf16> to vector<2x24x32xbf16>
    %38 = vector.shape_cast %37 : vector<2x24x32xbf16> to vector<48x32xbf16>
    %c4 = arith.constant 4 : index
    %c0_26 = arith.constant 0 : index
    %c0_27 = arith.constant 0 : index
    %39 = vector.load %arg4[%c4, %c0_26, %c0_27] : memref<9x32x32xbf16, #tpu.memory_space<vmem>>, vector<1x32x32xbf16>
    %40 = vector.shape_cast %39 : vector<1x32x32xbf16> to vector<32x32xbf16>
    %cst_28 = arith.constant dense<0.000000e+00> : vector<48x32xf32>
    %41 = tpu.matmul %38, %40, %cst_28 {dimension_numbers = #tpu.dot_dimension_numbers<[1], [0], [0], [1], [0, 0, 1, 1], [], []>} : vector<48x32xbf16>, vector<32x32xbf16>, vector<48x32xf32> -> vector<48x32xf32>
    %42 = arith.addf %36, %41 : vector<48x32xf32>
    %43 = vector.extract_strided_slice %30 {offsets = [0, 4, 0], sizes = [2, 24, 32], strides = [1, 1, 1]} : vector<2x32x32xbf16> to vector<2x24x32xbf16>
    %44 = vector.shape_cast %43 : vector<2x24x32xbf16> to vector<48x32xbf16>
    %c5 = arith.constant 5 : index
    %c0_29 = arith.constant 0 : index
    %c0_30 = arith.constant 0 : index
    %45 = vector.load %arg4[%c5, %c0_29, %c0_30] : memref<9x32x32xbf16, #tpu.memory_space<vmem>>, vector<1x32x32xbf16>
    %46 = vector.shape_cast %45 : vector<1x32x32xbf16> to vector<32x32xbf16>
    %cst_31 = arith.constant dense<0.000000e+00> : vector<48x32xf32>
    %47 = tpu.matmul %44, %46, %cst_31 {dimension_numbers = #tpu.dot_dimension_numbers<[1], [0], [0], [1], [0, 0, 1, 1], [], []>} : vector<48x32xbf16>, vector<32x32xbf16>, vector<48x32xf32> -> vector<48x32xf32>
    %48 = arith.addf %42, %47 : vector<48x32xf32>
    %c2_i32_32 = arith.constant 2 : i32
    %49 = arith.muli %c2_i32_32, %c0_i32_4 : i32
    %c2_i32_33 = arith.constant 2 : i32
    %50 = arith.addi %49, %c2_i32_33 : i32
    %51 = arith.index_cast %50 : i32 to index
    %c0_34 = arith.constant 0 : index
    %c0_35 = arith.constant 0 : index
    %52 = vector.load %arg11[%51, %c0_34, %c0_35] : memref<14x32x32xbf16, #tpu.memory_space<vmem>>, vector<2x32x32xbf16>
    %53 = vector.extract_strided_slice %52 {offsets = [0, 0, 0], sizes = [2, 24, 32], strides = [1, 1, 1]} : vector<2x32x32xbf16> to vector<2x24x32xbf16>
    %54 = vector.shape_cast %53 : vector<2x24x32xbf16> to vector<48x32xbf16>
    %c6 = arith.constant 6 : index
    %c0_36 = arith.constant 0 : index
    %c0_37 = arith.constant 0 : index
    %55 = vector.load %arg4[%c6, %c0_36, %c0_37] : memref<9x32x32xbf16, #tpu.memory_space<vmem>>, vector<1x32x32xbf16>
    %56 = vector.shape_cast %55 : vector<1x32x32xbf16> to vector<32x32xbf16>
    %cst_38 = arith.constant dense<0.000000e+00> : vector<48x32xf32>
    %57 = tpu.matmul %54, %56, %cst_38 {dimension_numbers = #tpu.dot_dimension_numbers<[1], [0], [0], [1], [0, 0, 1, 1], [], []>} : vector<48x32xbf16>, vector<32x32xbf16>, vector<48x32xf32> -> vector<48x32xf32>
    %58 = arith.addf %48, %57 : vector<48x32xf32>
    %59 = vector.extract_strided_slice %52 {offsets = [0, 2, 0], sizes = [2, 24, 32], strides = [1, 1, 1]} : vector<2x32x32xbf16> to vector<2x24x32xbf16>
    %60 = vector.shape_cast %59 : vector<2x24x32xbf16> to vector<48x32xbf16>
    %c7 = arith.constant 7 : index
    %c0_39 = arith.constant 0 : index
    %c0_40 = arith.constant 0 : index
    %61 = vector.load %arg4[%c7, %c0_39, %c0_40] : memref<9x32x32xbf16, #tpu.memory_space<vmem>>, vector<1x32x32xbf16>
    %62 = vector.shape_cast %61 : vector<1x32x32xbf16> to vector<32x32xbf16>
    %cst_41 = arith.constant dense<0.000000e+00> : vector<48x32xf32>
    %63 = tpu.matmul %60, %62, %cst_41 {dimension_numbers = #tpu.dot_dimension_numbers<[1], [0], [0], [1], [0, 0, 1, 1], [], []>} : vector<48x32xbf16>, vector<32x32xbf16>, vector<48x32xf32> -> vector<48x32xf32>
    %64 = arith.addf %58, %63 : vector<48x32xf32>
    %65 = vector.extract_strided_slice %52 {offsets = [0, 4, 0], sizes = [2, 24, 32], strides = [1, 1, 1]} : vector<2x32x32xbf16> to vector<2x24x32xbf16>
    %66 = vector.shape_cast %65 : vector<2x24x32xbf16> to vector<48x32xbf16>
    %c8 = arith.constant 8 : index
    %c0_42 = arith.constant 0 : index
    %c0_43 = arith.constant 0 : index
    %67 = vector.load %arg4[%c8, %c0_42, %c0_43] : memref<9x32x32xbf16, #tpu.memory_space<vmem>>, vector<1x32x32xbf16>
    %68 = vector.shape_cast %67 : vector<1x32x32xbf16> to vector<32x32xbf16>
    %cst_44 = arith.constant dense<0.000000e+00> : vector<48x32xf32>
    %69 = tpu.matmul %66, %68, %cst_44 {dimension_numbers = #tpu.dot_dimension_numbers<[1], [0], [0], [1], [0, 0, 1, 1], [], []>} : vector<48x32xbf16>, vector<32x32xbf16>, vector<48x32xf32> -> vector<48x32xf32>
    %70 = arith.addf %64, %69 : vector<48x32xf32>
    %71 = vector.extract_strided_slice %70 {offsets = [0, 0], sizes = [24, 32], strides = [1, 1]} : vector<48x32xf32> to vector<24x32xf32>
    %72 = vector.extract_strided_slice %70 {offsets = [24, 0], sizes = [24, 32], strides = [1, 1]} : vector<48x32xf32> to vector<24x32xf32>
    %73 = arith.maximumf %71, %72 : vector<24x32xf32>
    %74 = vector.extract_strided_slice %73 {offsets = [0, 0], sizes = [2, 32], strides = [1, 1]} : vector<24x32xf32> to vector<2x32xf32>
    %75 = vector.extract_strided_slice %73 {offsets = [2, 0], sizes = [2, 32], strides = [1, 1]} : vector<24x32xf32> to vector<2x32xf32>
    %76 = arith.maximumf %74, %75 : vector<2x32xf32>
    %77 = vector.broadcast %1 : vector<1x32xf32> to vector<2x32xf32>
    %78 = arith.addf %76, %77 : vector<2x32xf32>
    %cst_45 = arith.constant 0.000000e+00 : f32
    %79 = vector.broadcast %cst_45 : f32 to vector<2x32xf32>
    %80 = arith.maximumf %78, %79 : vector<2x32xf32>
    %81 = vector.extract_strided_slice %73 {offsets = [4, 0], sizes = [2, 32], strides = [1, 1]} : vector<24x32xf32> to vector<2x32xf32>
    %82 = vector.extract_strided_slice %73 {offsets = [6, 0], sizes = [2, 32], strides = [1, 1]} : vector<24x32xf32> to vector<2x32xf32>
    %83 = arith.maximumf %81, %82 : vector<2x32xf32>
    %84 = vector.broadcast %1 : vector<1x32xf32> to vector<2x32xf32>
    %85 = arith.addf %83, %84 : vector<2x32xf32>
    %cst_46 = arith.constant 0.000000e+00 : f32
    %86 = vector.broadcast %cst_46 : f32 to vector<2x32xf32>
    %87 = arith.maximumf %85, %86 : vector<2x32xf32>
    %88 = vector.extract_strided_slice %73 {offsets = [8, 0], sizes = [2, 32], strides = [1, 1]} : vector<24x32xf32> to vector<2x32xf32>
    %89 = vector.extract_strided_slice %73 {offsets = [10, 0], sizes = [2, 32], strides = [1, 1]} : vector<24x32xf32> to vector<2x32xf32>
    %90 = arith.maximumf %88, %89 : vector<2x32xf32>
    %91 = vector.broadcast %1 : vector<1x32xf32> to vector<2x32xf32>
    %92 = arith.addf %90, %91 : vector<2x32xf32>
    %cst_47 = arith.constant 0.000000e+00 : f32
    %93 = vector.broadcast %cst_47 : f32 to vector<2x32xf32>
    %94 = arith.maximumf %92, %93 : vector<2x32xf32>
    %95 = vector.extract_strided_slice %73 {offsets = [12, 0], sizes = [2, 32], strides = [1, 1]} : vector<24x32xf32> to vector<2x32xf32>
    %96 = vector.extract_strided_slice %73 {offsets = [14, 0], sizes = [2, 32], strides = [1, 1]} : vector<24x32xf32> to vector<2x32xf32>
    %97 = arith.maximumf %95, %96 : vector<2x32xf32>
    %98 = vector.broadcast %1 : vector<1x32xf32> to vector<2x32xf32>
    %99 = arith.addf %97, %98 : vector<2x32xf32>
    %cst_48 = arith.constant 0.000000e+00 : f32
    %100 = vector.broadcast %cst_48 : f32 to vector<2x32xf32>
    %101 = arith.maximumf %99, %100 : vector<2x32xf32>
    %102 = vector.extract_strided_slice %73 {offsets = [16, 0], sizes = [2, 32], strides = [1, 1]} : vector<24x32xf32> to vector<2x32xf32>
    %103 = vector.extract_strided_slice %73 {offsets = [18, 0], sizes = [2, 32], strides = [1, 1]} : vector<24x32xf32> to vector<2x32xf32>
    %104 = arith.maximumf %102, %103 : vector<2x32xf32>
    %105 = vector.broadcast %1 : vector<1x32xf32> to vector<2x32xf32>
    %106 = arith.addf %104, %105 : vector<2x32xf32>
    %cst_49 = arith.constant 0.000000e+00 : f32
    %107 = vector.broadcast %cst_49 : f32 to vector<2x32xf32>
    %108 = arith.maximumf %106, %107 : vector<2x32xf32>
    %109 = vector.extract_strided_slice %73 {offsets = [20, 0], sizes = [2, 32], strides = [1, 1]} : vector<24x32xf32> to vector<2x32xf32>
    %110 = vector.extract_strided_slice %73 {offsets = [22, 0], sizes = [2, 32], strides = [1, 1]} : vector<24x32xf32> to vector<2x32xf32>
    %111 = arith.maximumf %109, %110 : vector<2x32xf32>
    %112 = vector.broadcast %1 : vector<1x32xf32> to vector<2x32xf32>
    %113 = arith.addf %111, %112 : vector<2x32xf32>
    %cst_50 = arith.constant 0.000000e+00 : f32
    %114 = vector.broadcast %cst_50 : f32 to vector<2x32xf32>
    %115 = arith.maximumf %113, %114 : vector<2x32xf32>
    %116 = tpu.concatenate %80, %87, %94, %101, %108, %115 in 1 : vector<2x32xf32>, vector<2x32xf32>, vector<2x32xf32>, vector<2x32xf32>, vector<2x32xf32>, vector<2x32xf32> -> vector<2x192xf32>
    %117 = arith.truncf %116 : vector<2x192xf32> to vector<2x192xbf16>
    %118 = arith.index_cast %c0_i32_4 : i32 to index
    %c0_51 = arith.constant 0 : index
    %c0_52 = arith.constant 0 : index
    %119 = vector.load %arg6[%118, %c0_51, %c0_52] : memref<6x192x32xbf16, #tpu.memory_space<vmem>>, vector<1x192x32xbf16>
    %120 = vector.shape_cast %119 : vector<1x192x32xbf16> to vector<192x32xbf16>
    %cst_53 = arith.constant dense<0.000000e+00> : vector<2x32xf32>
    %121 = tpu.matmul %117, %120, %cst_53 {dimension_numbers = #tpu.dot_dimension_numbers<[1], [0], [0], [1], [0, 0, 1, 1], [], []>} : vector<2x192xbf16>, vector<192x32xbf16>, vector<2x32xf32> -> vector<2x32xf32>
    %122 = arith.addf %3, %121 : vector<2x32xf32>
    %c1_i32_54 = arith.constant 1 : i32
    %cst_55 = arith.constant 0.000000e+00 : f32
    %123 = vector.broadcast %cst_55 : f32 to vector<48x32xf32>
    %c2_i32_56 = arith.constant 2 : i32
    %124 = arith.muli %c2_i32_56, %c1_i32_54 : i32
    %c0_i32_57 = arith.constant 0 : i32
    %125 = arith.addi %124, %c0_i32_57 : i32
    %126 = arith.index_cast %125 : i32 to index
    %c0_58 = arith.constant 0 : index
    %c0_59 = arith.constant 0 : index
    %127 = vector.load %arg11[%126, %c0_58, %c0_59] : memref<14x32x32xbf16, #tpu.memory_space<vmem>>, vector<2x32x32xbf16>
    %128 = vector.extract_strided_slice %127 {offsets = [0, 0, 0], sizes = [2, 24, 32], strides = [1, 1, 1]} : vector<2x32x32xbf16> to vector<2x24x32xbf16>
    %129 = vector.shape_cast %128 : vector<2x24x32xbf16> to vector<48x32xbf16>
    %c0_60 = arith.constant 0 : index
    %c0_61 = arith.constant 0 : index
    %c0_62 = arith.constant 0 : index
    %130 = vector.load %arg4[%c0_60, %c0_61, %c0_62] : memref<9x32x32xbf16, #tpu.memory_space<vmem>>, vector<1x32x32xbf16>
    %131 = vector.shape_cast %130 : vector<1x32x32xbf16> to vector<32x32xbf16>
    %cst_63 = arith.constant dense<0.000000e+00> : vector<48x32xf32>
    %132 = tpu.matmul %129, %131, %cst_63 {dimension_numbers = #tpu.dot_dimension_numbers<[1], [0], [0], [1], [0, 0, 1, 1], [], []>} : vector<48x32xbf16>, vector<32x32xbf16>, vector<48x32xf32> -> vector<48x32xf32>
    %133 = arith.addf %123, %132 : vector<48x32xf32>
    %134 = vector.extract_strided_slice %127 {offsets = [0, 2, 0], sizes = [2, 24, 32], strides = [1, 1, 1]} : vector<2x32x32xbf16> to vector<2x24x32xbf16>
    %135 = vector.shape_cast %134 : vector<2x24x32xbf16> to vector<48x32xbf16>
    %c1_64 = arith.constant 1 : index
    %c0_65 = arith.constant 0 : index
    %c0_66 = arith.constant 0 : index
    %136 = vector.load %arg4[%c1_64, %c0_65, %c0_66] : memref<9x32x32xbf16, #tpu.memory_space<vmem>>, vector<1x32x32xbf16>
    %137 = vector.shape_cast %136 : vector<1x32x32xbf16> to vector<32x32xbf16>
    %cst_67 = arith.constant dense<0.000000e+00> : vector<48x32xf32>
    %138 = tpu.matmul %135, %137, %cst_67 {dimension_numbers = #tpu.dot_dimension_numbers<[1], [0], [0], [1], [0, 0, 1, 1], [], []>} : vector<48x32xbf16>, vector<32x32xbf16>, vector<48x32xf32> -> vector<48x32xf32>
    %139 = arith.addf %133, %138 : vector<48x32xf32>
    %140 = vector.extract_strided_slice %127 {offsets = [0, 4, 0], sizes = [2, 24, 32], strides = [1, 1, 1]} : vector<2x32x32xbf16> to vector<2x24x32xbf16>
    %141 = vector.shape_cast %140 : vector<2x24x32xbf16> to vector<48x32xbf16>
    %c2_68 = arith.constant 2 : index
    %c0_69 = arith.constant 0 : index
    %c0_70 = arith.constant 0 : index
    %142 = vector.load %arg4[%c2_68, %c0_69, %c0_70] : memref<9x32x32xbf16, #tpu.memory_space<vmem>>, vector<1x32x32xbf16>
    %143 = vector.shape_cast %142 : vector<1x32x32xbf16> to vector<32x32xbf16>
    %cst_71 = arith.constant dense<0.000000e+00> : vector<48x32xf32>
    %144 = tpu.matmul %141, %143, %cst_71 {dimension_numbers = #tpu.dot_dimension_numbers<[1], [0], [0], [1], [0, 0, 1, 1], [], []>} : vector<48x32xbf16>, vector<32x32xbf16>, vector<48x32xf32> -> vector<48x32xf32>
    %145 = arith.addf %139, %144 : vector<48x32xf32>
    %c2_i32_72 = arith.constant 2 : i32
    %146 = arith.muli %c2_i32_72, %c1_i32_54 : i32
    %c1_i32_73 = arith.constant 1 : i32
    %147 = arith.addi %146, %c1_i32_73 : i32
    %148 = arith.index_cast %147 : i32 to index
    %c0_74 = arith.constant 0 : index
    %c0_75 = arith.constant 0 : index
    %149 = vector.load %arg11[%148, %c0_74, %c0_75] : memref<14x32x32xbf16, #tpu.memory_space<vmem>>, vector<2x32x32xbf16>
    %150 = vector.extract_strided_slice %149 {offsets = [0, 0, 0], sizes = [2, 24, 32], strides = [1, 1, 1]} : vector<2x32x32xbf16> to vector<2x24x32xbf16>
    %151 = vector.shape_cast %150 : vector<2x24x32xbf16> to vector<48x32xbf16>
    %c3_76 = arith.constant 3 : index
    %c0_77 = arith.constant 0 : index
    %c0_78 = arith.constant 0 : index
    %152 = vector.load %arg4[%c3_76, %c0_77, %c0_78] : memref<9x32x32xbf16, #tpu.memory_space<vmem>>, vector<1x32x32xbf16>
    %153 = vector.shape_cast %152 : vector<1x32x32xbf16> to vector<32x32xbf16>
    %cst_79 = arith.constant dense<0.000000e+00> : vector<48x32xf32>
    %154 = tpu.matmul %151, %153, %cst_79 {dimension_numbers = #tpu.dot_dimension_numbers<[1], [0], [0], [1], [0, 0, 1, 1], [], []>} : vector<48x32xbf16>, vector<32x32xbf16>, vector<48x32xf32> -> vector<48x32xf32>
    %155 = arith.addf %145, %154 : vector<48x32xf32>
    %156 = vector.extract_strided_slice %149 {offsets = [0, 2, 0], sizes = [2, 24, 32], strides = [1, 1, 1]} : vector<2x32x32xbf16> to vector<2x24x32xbf16>
    %157 = vector.shape_cast %156 : vector<2x24x32xbf16> to vector<48x32xbf16>
    %c4_80 = arith.constant 4 : index
    %c0_81 = arith.constant 0 : index
    %c0_82 = arith.constant 0 : index
    %158 = vector.load %arg4[%c4_80, %c0_81, %c0_82] : memref<9x32x32xbf16, #tpu.memory_space<vmem>>, vector<1x32x32xbf16>
    %159 = vector.shape_cast %158 : vector<1x32x32xbf16> to vector<32x32xbf16>
    %cst_83 = arith.constant dense<0.000000e+00> : vector<48x32xf32>
    %160 = tpu.matmul %157, %159, %cst_83 {dimension_numbers = #tpu.dot_dimension_numbers<[1], [0], [0], [1], [0, 0, 1, 1], [], []>} : vector<48x32xbf16>, vector<32x32xbf16>, vector<48x32xf32> -> vector<48x32xf32>
    %161 = arith.addf %155, %160 : vector<48x32xf32>
    %162 = vector.extract_strided_slice %149 {offsets = [0, 4, 0], sizes = [2, 24, 32], strides = [1, 1, 1]} : vector<2x32x32xbf16> to vector<2x24x32xbf16>
    %163 = vector.shape_cast %162 : vector<2x24x32xbf16> to vector<48x32xbf16>
    %c5_84 = arith.constant 5 : index
    %c0_85 = arith.constant 0 : index
    %c0_86 = arith.constant 0 : index
    %164 = vector.load %arg4[%c5_84, %c0_85, %c0_86] : memref<9x32x32xbf16, #tpu.memory_space<vmem>>, vector<1x32x32xbf16>
    %165 = vector.shape_cast %164 : vector<1x32x32xbf16> to vector<32x32xbf16>
    %cst_87 = arith.constant dense<0.000000e+00> : vector<48x32xf32>
    %166 = tpu.matmul %163, %165, %cst_87 {dimension_numbers = #tpu.dot_dimension_numbers<[1], [0], [0], [1], [0, 0, 1, 1], [], []>} : vector<48x32xbf16>, vector<32x32xbf16>, vector<48x32xf32> -> vector<48x32xf32>
    %167 = arith.addf %161, %166 : vector<48x32xf32>
    %c2_i32_88 = arith.constant 2 : i32
    %168 = arith.muli %c2_i32_88, %c1_i32_54 : i32
    %c2_i32_89 = arith.constant 2 : i32
    %169 = arith.addi %168, %c2_i32_89 : i32
    %170 = arith.index_cast %169 : i32 to index
    %c0_90 = arith.constant 0 : index
    %c0_91 = arith.constant 0 : index
    %171 = vector.load %arg11[%170, %c0_90, %c0_91] : memref<14x32x32xbf16, #tpu.memory_space<vmem>>, vector<2x32x32xbf16>
    %172 = vector.extract_strided_slice %171 {offsets = [0, 0, 0], sizes = [2, 24, 32], strides = [1, 1, 1]} : vector<2x32x32xbf16> to vector<2x24x32xbf16>
    %173 = vector.shape_cast %172 : vector<2x24x32xbf16> to vector<48x32xbf16>
    %c6_92 = arith.constant 6 : index
    %c0_93 = arith.constant 0 : index
    %c0_94 = arith.constant 0 : index
    %174 = vector.load %arg4[%c6_92, %c0_93, %c0_94] : memref<9x32x32xbf16, #tpu.memory_space<vmem>>, vector<1x32x32xbf16>
    %175 = vector.shape_cast %174 : vector<1x32x32xbf16> to vector<32x32xbf16>
    %cst_95 = arith.constant dense<0.000000e+00> : vector<48x32xf32>
    %176 = tpu.matmul %173, %175, %cst_95 {dimension_numbers = #tpu.dot_dimension_numbers<[1], [0], [0], [1], [0, 0, 1, 1], [], []>} : vector<48x32xbf16>, vector<32x32xbf16>, vector<48x32xf32> -> vector<48x32xf32>
    %177 = arith.addf %167, %176 : vector<48x32xf32>
    %178 = vector.extract_strided_slice %171 {offsets = [0, 2, 0], sizes = [2, 24, 32], strides = [1, 1, 1]} : vector<2x32x32xbf16> to vector<2x24x32xbf16>
    %179 = vector.shape_cast %178 : vector<2x24x32xbf16> to vector<48x32xbf16>
    %c7_96 = arith.constant 7 : index
    %c0_97 = arith.constant 0 : index
    %c0_98 = arith.constant 0 : index
    %180 = vector.load %arg4[%c7_96, %c0_97, %c0_98] : memref<9x32x32xbf16, #tpu.memory_space<vmem>>, vector<1x32x32xbf16>
    %181 = vector.shape_cast %180 : vector<1x32x32xbf16> to vector<32x32xbf16>
    %cst_99 = arith.constant dense<0.000000e+00> : vector<48x32xf32>
    %182 = tpu.matmul %179, %181, %cst_99 {dimension_numbers = #tpu.dot_dimension_numbers<[1], [0], [0], [1], [0, 0, 1, 1], [], []>} : vector<48x32xbf16>, vector<32x32xbf16>, vector<48x32xf32> -> vector<48x32xf32>
    %183 = arith.addf %177, %182 : vector<48x32xf32>
    %184 = vector.extract_strided_slice %171 {offsets = [0, 4, 0], sizes = [2, 24, 32], strides = [1, 1, 1]} : vector<2x32x32xbf16> to vector<2x24x32xbf16>
    %185 = vector.shape_cast %184 : vector<2x24x32xbf16> to vector<48x32xbf16>
    %c8_100 = arith.constant 8 : index
    %c0_101 = arith.constant 0 : index
    %c0_102 = arith.constant 0 : index
    %186 = vector.load %arg4[%c8_100, %c0_101, %c0_102] : memref<9x32x32xbf16, #tpu.memory_space<vmem>>, vector<1x32x32xbf16>
    %187 = vector.shape_cast %186 : vector<1x32x32xbf16> to vector<32x32xbf16>
    %cst_103 = arith.constant dense<0.000000e+00> : vector<48x32xf32>
    %188 = tpu.matmul %185, %187, %cst_103 {dimension_numbers = #tpu.dot_dimension_numbers<[1], [0], [0], [1], [0, 0, 1, 1], [], []>} : vector<48x32xbf16>, vector<32x32xbf16>, vector<48x32xf32> -> vector<48x32xf32>
    %189 = arith.addf %183, %188 : vector<48x32xf32>
    %190 = vector.extract_strided_slice %189 {offsets = [0, 0], sizes = [24, 32], strides = [1, 1]} : vector<48x32xf32> to vector<24x32xf32>
    %191 = vector.extract_strided_slice %189 {offsets = [24, 0], sizes = [24, 32], strides = [1, 1]} : vector<48x32xf32> to vector<24x32xf32>
    %192 = arith.maximumf %190, %191 : vector<24x32xf32>
    %193 = vector.extract_strided_slice %192 {offsets = [0, 0], sizes = [2, 32], strides = [1, 1]} : vector<24x32xf32> to vector<2x32xf32>
    %194 = vector.extract_strided_slice %192 {offsets = [2, 0], sizes = [2, 32], strides = [1, 1]} : vector<24x32xf32> to vector<2x32xf32>
    %195 = arith.maximumf %193, %194 : vector<2x32xf32>
    %196 = vector.broadcast %1 : vector<1x32xf32> to vector<2x32xf32>
    %197 = arith.addf %195, %196 : vector<2x32xf32>
    %cst_104 = arith.constant 0.000000e+00 : f32
    %198 = vector.broadcast %cst_104 : f32 to vector<2x32xf32>
    %199 = arith.maximumf %197, %198 : vector<2x32xf32>
    %200 = vector.extract_strided_slice %192 {offsets = [4, 0], sizes = [2, 32], strides = [1, 1]} : vector<24x32xf32> to vector<2x32xf32>
    %201 = vector.extract_strided_slice %192 {offsets = [6, 0], sizes = [2, 32], strides = [1, 1]} : vector<24x32xf32> to vector<2x32xf32>
    %202 = arith.maximumf %200, %201 : vector<2x32xf32>
    %203 = vector.broadcast %1 : vector<1x32xf32> to vector<2x32xf32>
    %204 = arith.addf %202, %203 : vector<2x32xf32>
    %cst_105 = arith.constant 0.000000e+00 : f32
    %205 = vector.broadcast %cst_105 : f32 to vector<2x32xf32>
    %206 = arith.maximumf %204, %205 : vector<2x32xf32>
    %207 = vector.extract_strided_slice %192 {offsets = [8, 0], sizes = [2, 32], strides = [1, 1]} : vector<24x32xf32> to vector<2x32xf32>
    %208 = vector.extract_strided_slice %192 {offsets = [10, 0], sizes = [2, 32], strides = [1, 1]} : vector<24x32xf32> to vector<2x32xf32>
    %209 = arith.maximumf %207, %208 : vector<2x32xf32>
    %210 = vector.broadcast %1 : vector<1x32xf32> to vector<2x32xf32>
    %211 = arith.addf %209, %210 : vector<2x32xf32>
    %cst_106 = arith.constant 0.000000e+00 : f32
    %212 = vector.broadcast %cst_106 : f32 to vector<2x32xf32>
    %213 = arith.maximumf %211, %212 : vector<2x32xf32>
    %214 = vector.extract_strided_slice %192 {offsets = [12, 0], sizes = [2, 32], strides = [1, 1]} : vector<24x32xf32> to vector<2x32xf32>
    %215 = vector.extract_strided_slice %192 {offsets = [14, 0], sizes = [2, 32], strides = [1, 1]} : vector<24x32xf32> to vector<2x32xf32>
    %216 = arith.maximumf %214, %215 : vector<2x32xf32>
    %217 = vector.broadcast %1 : vector<1x32xf32> to vector<2x32xf32>
    %218 = arith.addf %216, %217 : vector<2x32xf32>
    %cst_107 = arith.constant 0.000000e+00 : f32
    %219 = vector.broadcast %cst_107 : f32 to vector<2x32xf32>
    %220 = arith.maximumf %218, %219 : vector<2x32xf32>
    %221 = vector.extract_strided_slice %192 {offsets = [16, 0], sizes = [2, 32], strides = [1, 1]} : vector<24x32xf32> to vector<2x32xf32>
    %222 = vector.extract_strided_slice %192 {offsets = [18, 0], sizes = [2, 32], strides = [1, 1]} : vector<24x32xf32> to vector<2x32xf32>
    %223 = arith.maximumf %221, %222 : vector<2x32xf32>
    %224 = vector.broadcast %1 : vector<1x32xf32> to vector<2x32xf32>
    %225 = arith.addf %223, %224 : vector<2x32xf32>
    %cst_108 = arith.constant 0.000000e+00 : f32
    %226 = vector.broadcast %cst_108 : f32 to vector<2x32xf32>
    %227 = arith.maximumf %225, %226 : vector<2x32xf32>
    %228 = vector.extract_strided_slice %192 {offsets = [20, 0], sizes = [2, 32], strides = [1, 1]} : vector<24x32xf32> to vector<2x32xf32>
    %229 = vector.extract_strided_slice %192 {offsets = [22, 0], sizes = [2, 32], strides = [1, 1]} : vector<24x32xf32> to vector<2x32xf32>
    %230 = arith.maximumf %228, %229 : vector<2x32xf32>
    %231 = vector.broadcast %1 : vector<1x32xf32> to vector<2x32xf32>
    %232 = arith.addf %230, %231 : vector<2x32xf32>
    %cst_109 = arith.constant 0.000000e+00 : f32
    %233 = vector.broadcast %cst_109 : f32 to vector<2x32xf32>
    %234 = arith.maximumf %232, %233 : vector<2x32xf32>
    %235 = tpu.concatenate %199, %206, %213, %220, %227, %234 in 1 : vector<2x32xf32>, vector<2x32xf32>, vector<2x32xf32>, vector<2x32xf32>, vector<2x32xf32>, vector<2x32xf32> -> vector<2x192xf32>
    %236 = arith.truncf %235 : vector<2x192xf32> to vector<2x192xbf16>
    %237 = arith.index_cast %c1_i32_54 : i32 to index
    %c0_110 = arith.constant 0 : index
    %c0_111 = arith.constant 0 : index
    %238 = vector.load %arg6[%237, %c0_110, %c0_111] : memref<6x192x32xbf16, #tpu.memory_space<vmem>>, vector<1x192x32xbf16>
    %239 = vector.shape_cast %238 : vector<1x192x32xbf16> to vector<192x32xbf16>
    %cst_112 = arith.constant dense<0.000000e+00> : vector<2x32xf32>
    %240 = tpu.matmul %236, %239, %cst_112 {dimension_numbers = #tpu.dot_dimension_numbers<[1], [0], [0], [1], [0, 0, 1, 1], [], []>} : vector<2x192xbf16>, vector<192x32xbf16>, vector<2x32xf32> -> vector<2x32xf32>
    %241 = arith.addf %122, %240 : vector<2x32xf32>
    %c2_i32_113 = arith.constant 2 : i32
    %cst_114 = arith.constant 0.000000e+00 : f32
    %242 = vector.broadcast %cst_114 : f32 to vector<48x32xf32>
    %c2_i32_115 = arith.constant 2 : i32
    %243 = arith.muli %c2_i32_115, %c2_i32_113 : i32
    %c0_i32_116 = arith.constant 0 : i32
    %244 = arith.addi %243, %c0_i32_116 : i32
    %245 = arith.index_cast %244 : i32 to index
    %c0_117 = arith.constant 0 : index
    %c0_118 = arith.constant 0 : index
    %246 = vector.load %arg11[%245, %c0_117, %c0_118] : memref<14x32x32xbf16, #tpu.memory_space<vmem>>, vector<2x32x32xbf16>
    %247 = vector.extract_strided_slice %246 {offsets = [0, 0, 0], sizes = [2, 24, 32], strides = [1, 1, 1]} : vector<2x32x32xbf16> to vector<2x24x32xbf16>
    %248 = vector.shape_cast %247 : vector<2x24x32xbf16> to vector<48x32xbf16>
    %c0_119 = arith.constant 0 : index
    %c0_120 = arith.constant 0 : index
    %c0_121 = arith.constant 0 : index
    %249 = vector.load %arg4[%c0_119, %c0_120, %c0_121] : memref<9x32x32xbf16, #tpu.memory_space<vmem>>, vector<1x32x32xbf16>
    %250 = vector.shape_cast %249 : vector<1x32x32xbf16> to vector<32x32xbf16>
    %cst_122 = arith.constant dense<0.000000e+00> : vector<48x32xf32>
    %251 = tpu.matmul %248, %250, %cst_122 {dimension_numbers = #tpu.dot_dimension_numbers<[1], [0], [0], [1], [0, 0, 1, 1], [], []>} : vector<48x32xbf16>, vector<32x32xbf16>, vector<48x32xf32> -> vector<48x32xf32>
    %252 = arith.addf %242, %251 : vector<48x32xf32>
    %253 = vector.extract_strided_slice %246 {offsets = [0, 2, 0], sizes = [2, 24, 32], strides = [1, 1, 1]} : vector<2x32x32xbf16> to vector<2x24x32xbf16>
    %254 = vector.shape_cast %253 : vector<2x24x32xbf16> to vector<48x32xbf16>
    %c1_123 = arith.constant 1 : index
    %c0_124 = arith.constant 0 : index
    %c0_125 = arith.constant 0 : index
    %255 = vector.load %arg4[%c1_123, %c0_124, %c0_125] : memref<9x32x32xbf16, #tpu.memory_space<vmem>>, vector<1x32x32xbf16>
    %256 = vector.shape_cast %255 : vector<1x32x32xbf16> to vector<32x32xbf16>
    %cst_126 = arith.constant dense<0.000000e+00> : vector<48x32xf32>
    %257 = tpu.matmul %254, %256, %cst_126 {dimension_numbers = #tpu.dot_dimension_numbers<[1], [0], [0], [1], [0, 0, 1, 1], [], []>} : vector<48x32xbf16>, vector<32x32xbf16>, vector<48x32xf32> -> vector<48x32xf32>
    %258 = arith.addf %252, %257 : vector<48x32xf32>
    %259 = vector.extract_strided_slice %246 {offsets = [0, 4, 0], sizes = [2, 24, 32], strides = [1, 1, 1]} : vector<2x32x32xbf16> to vector<2x24x32xbf16>
    %260 = vector.shape_cast %259 : vector<2x24x32xbf16> to vector<48x32xbf16>
    %c2_127 = arith.constant 2 : index
    %c0_128 = arith.constant 0 : index
    %c0_129 = arith.constant 0 : index
    %261 = vector.load %arg4[%c2_127, %c0_128, %c0_129] : memref<9x32x32xbf16, #tpu.memory_space<vmem>>, vector<1x32x32xbf16>
    %262 = vector.shape_cast %261 : vector<1x32x32xbf16> to vector<32x32xbf16>
    %cst_130 = arith.constant dense<0.000000e+00> : vector<48x32xf32>
    %263 = tpu.matmul %260, %262, %cst_130 {dimension_numbers = #tpu.dot_dimension_numbers<[1], [0], [0], [1], [0, 0, 1, 1], [], []>} : vector<48x32xbf16>, vector<32x32xbf16>, vector<48x32xf32> -> vector<48x32xf32>
    %264 = arith.addf %258, %263 : vector<48x32xf32>
    %c2_i32_131 = arith.constant 2 : i32
    %265 = arith.muli %c2_i32_131, %c2_i32_113 : i32
    %c1_i32_132 = arith.constant 1 : i32
    %266 = arith.addi %265, %c1_i32_132 : i32
    %267 = arith.index_cast %266 : i32 to index
    %c0_133 = arith.constant 0 : index
    %c0_134 = arith.constant 0 : index
    %268 = vector.load %arg11[%267, %c0_133, %c0_134] : memref<14x32x32xbf16, #tpu.memory_space<vmem>>, vector<2x32x32xbf16>
    %269 = vector.extract_strided_slice %268 {offsets = [0, 0, 0], sizes = [2, 24, 32], strides = [1, 1, 1]} : vector<2x32x32xbf16> to vector<2x24x32xbf16>
    %270 = vector.shape_cast %269 : vector<2x24x32xbf16> to vector<48x32xbf16>
    %c3_135 = arith.constant 3 : index
    %c0_136 = arith.constant 0 : index
    %c0_137 = arith.constant 0 : index
    %271 = vector.load %arg4[%c3_135, %c0_136, %c0_137] : memref<9x32x32xbf16, #tpu.memory_space<vmem>>, vector<1x32x32xbf16>
    %272 = vector.shape_cast %271 : vector<1x32x32xbf16> to vector<32x32xbf16>
    %cst_138 = arith.constant dense<0.000000e+00> : vector<48x32xf32>
    %273 = tpu.matmul %270, %272, %cst_138 {dimension_numbers = #tpu.dot_dimension_numbers<[1], [0], [0], [1], [0, 0, 1, 1], [], []>} : vector<48x32xbf16>, vector<32x32xbf16>, vector<48x32xf32> -> vector<48x32xf32>
    %274 = arith.addf %264, %273 : vector<48x32xf32>
    %275 = vector.extract_strided_slice %268 {offsets = [0, 2, 0], sizes = [2, 24, 32], strides = [1, 1, 1]} : vector<2x32x32xbf16> to vector<2x24x32xbf16>
    %276 = vector.shape_cast %275 : vector<2x24x32xbf16> to vector<48x32xbf16>
    %c4_139 = arith.constant 4 : index
    %c0_140 = arith.constant 0 : index
    %c0_141 = arith.constant 0 : index
    %277 = vector.load %arg4[%c4_139, %c0_140, %c0_141] : memref<9x32x32xbf16, #tpu.memory_space<vmem>>, vector<1x32x32xbf16>
    %278 = vector.shape_cast %277 : vector<1x32x32xbf16> to vector<32x32xbf16>
    %cst_142 = arith.constant dense<0.000000e+00> : vector<48x32xf32>
    %279 = tpu.matmul %276, %278, %cst_142 {dimension_numbers = #tpu.dot_dimension_numbers<[1], [0], [0], [1], [0, 0, 1, 1], [], []>} : vector<48x32xbf16>, vector<32x32xbf16>, vector<48x32xf32> -> vector<48x32xf32>
    %280 = arith.addf %274, %279 : vector<48x32xf32>
    %281 = vector.extract_strided_slice %268 {offsets = [0, 4, 0], sizes = [2, 24, 32], strides = [1, 1, 1]} : vector<2x32x32xbf16> to vector<2x24x32xbf16>
    %282 = vector.shape_cast %281 : vector<2x24x32xbf16> to vector<48x32xbf16>
    %c5_143 = arith.constant 5 : index
    %c0_144 = arith.constant 0 : index
    %c0_145 = arith.constant 0 : index
    %283 = vector.load %arg4[%c5_143, %c0_144, %c0_145] : memref<9x32x32xbf16, #tpu.memory_space<vmem>>, vector<1x32x32xbf16>
    %284 = vector.shape_cast %283 : vector<1x32x32xbf16> to vector<32x32xbf16>
    %cst_146 = arith.constant dense<0.000000e+00> : vector<48x32xf32>
    %285 = tpu.matmul %282, %284, %cst_146 {dimension_numbers = #tpu.dot_dimension_numbers<[1], [0], [0], [1], [0, 0, 1, 1], [], []>} : vector<48x32xbf16>, vector<32x32xbf16>, vector<48x32xf32> -> vector<48x32xf32>
    %286 = arith.addf %280, %285 : vector<48x32xf32>
    %c2_i32_147 = arith.constant 2 : i32
    %287 = arith.muli %c2_i32_147, %c2_i32_113 : i32
    %c2_i32_148 = arith.constant 2 : i32
    %288 = arith.addi %287, %c2_i32_148 : i32
    %289 = arith.index_cast %288 : i32 to index
    %c0_149 = arith.constant 0 : index
    %c0_150 = arith.constant 0 : index
    %290 = vector.load %arg11[%289, %c0_149, %c0_150] : memref<14x32x32xbf16, #tpu.memory_space<vmem>>, vector<2x32x32xbf16>
    %291 = vector.extract_strided_slice %290 {offsets = [0, 0, 0], sizes = [2, 24, 32], strides = [1, 1, 1]} : vector<2x32x32xbf16> to vector<2x24x32xbf16>
    %292 = vector.shape_cast %291 : vector<2x24x32xbf16> to vector<48x32xbf16>
    %c6_151 = arith.constant 6 : index
    %c0_152 = arith.constant 0 : index
    %c0_153 = arith.constant 0 : index
    %293 = vector.load %arg4[%c6_151, %c0_152, %c0_153] : memref<9x32x32xbf16, #tpu.memory_space<vmem>>, vector<1x32x32xbf16>
    %294 = vector.shape_cast %293 : vector<1x32x32xbf16> to vector<32x32xbf16>
    %cst_154 = arith.constant dense<0.000000e+00> : vector<48x32xf32>
    %295 = tpu.matmul %292, %294, %cst_154 {dimension_numbers = #tpu.dot_dimension_numbers<[1], [0], [0], [1], [0, 0, 1, 1], [], []>} : vector<48x32xbf16>, vector<32x32xbf16>, vector<48x32xf32> -> vector<48x32xf32>
    %296 = arith.addf %286, %295 : vector<48x32xf32>
    %297 = vector.extract_strided_slice %290 {offsets = [0, 2, 0], sizes = [2, 24, 32], strides = [1, 1, 1]} : vector<2x32x32xbf16> to vector<2x24x32xbf16>
    %298 = vector.shape_cast %297 : vector<2x24x32xbf16> to vector<48x32xbf16>
    %c7_155 = arith.constant 7 : index
    %c0_156 = arith.constant 0 : index
    %c0_157 = arith.constant 0 : index
    %299 = vector.load %arg4[%c7_155, %c0_156, %c0_157] : memref<9x32x32xbf16, #tpu.memory_space<vmem>>, vector<1x32x32xbf16>
    %300 = vector.shape_cast %299 : vector<1x32x32xbf16> to vector<32x32xbf16>
    %cst_158 = arith.constant dense<0.000000e+00> : vector<48x32xf32>
    %301 = tpu.matmul %298, %300, %cst_158 {dimension_numbers = #tpu.dot_dimension_numbers<[1], [0], [0], [1], [0, 0, 1, 1], [], []>} : vector<48x32xbf16>, vector<32x32xbf16>, vector<48x32xf32> -> vector<48x32xf32>
    %302 = arith.addf %296, %301 : vector<48x32xf32>
    %303 = vector.extract_strided_slice %290 {offsets = [0, 4, 0], sizes = [2, 24, 32], strides = [1, 1, 1]} : vector<2x32x32xbf16> to vector<2x24x32xbf16>
    %304 = vector.shape_cast %303 : vector<2x24x32xbf16> to vector<48x32xbf16>
    %c8_159 = arith.constant 8 : index
    %c0_160 = arith.constant 0 : index
    %c0_161 = arith.constant 0 : index
    %305 = vector.load %arg4[%c8_159, %c0_160, %c0_161] : memref<9x32x32xbf16, #tpu.memory_space<vmem>>, vector<1x32x32xbf16>
    %306 = vector.shape_cast %305 : vector<1x32x32xbf16> to vector<32x32xbf16>
    %cst_162 = arith.constant dense<0.000000e+00> : vector<48x32xf32>
    %307 = tpu.matmul %304, %306, %cst_162 {dimension_numbers = #tpu.dot_dimension_numbers<[1], [0], [0], [1], [0, 0, 1, 1], [], []>} : vector<48x32xbf16>, vector<32x32xbf16>, vector<48x32xf32> -> vector<48x32xf32>
    %308 = arith.addf %302, %307 : vector<48x32xf32>
    %309 = vector.extract_strided_slice %308 {offsets = [0, 0], sizes = [24, 32], strides = [1, 1]} : vector<48x32xf32> to vector<24x32xf32>
    %310 = vector.extract_strided_slice %308 {offsets = [24, 0], sizes = [24, 32], strides = [1, 1]} : vector<48x32xf32> to vector<24x32xf32>
    %311 = arith.maximumf %309, %310 : vector<24x32xf32>
    %312 = vector.extract_strided_slice %311 {offsets = [0, 0], sizes = [2, 32], strides = [1, 1]} : vector<24x32xf32> to vector<2x32xf32>
    %313 = vector.extract_strided_slice %311 {offsets = [2, 0], sizes = [2, 32], strides = [1, 1]} : vector<24x32xf32> to vector<2x32xf32>
    %314 = arith.maximumf %312, %313 : vector<2x32xf32>
    %315 = vector.broadcast %1 : vector<1x32xf32> to vector<2x32xf32>
    %316 = arith.addf %314, %315 : vector<2x32xf32>
    %cst_163 = arith.constant 0.000000e+00 : f32
    %317 = vector.broadcast %cst_163 : f32 to vector<2x32xf32>
    %318 = arith.maximumf %316, %317 : vector<2x32xf32>
    %319 = vector.extract_strided_slice %311 {offsets = [4, 0], sizes = [2, 32], strides = [1, 1]} : vector<24x32xf32> to vector<2x32xf32>
    %320 = vector.extract_strided_slice %311 {offsets = [6, 0], sizes = [2, 32], strides = [1, 1]} : vector<24x32xf32> to vector<2x32xf32>
    %321 = arith.maximumf %319, %320 : vector<2x32xf32>
    %322 = vector.broadcast %1 : vector<1x32xf32> to vector<2x32xf32>
    %323 = arith.addf %321, %322 : vector<2x32xf32>
    %cst_164 = arith.constant 0.000000e+00 : f32
    %324 = vector.broadcast %cst_164 : f32 to vector<2x32xf32>
    %325 = arith.maximumf %323, %324 : vector<2x32xf32>
    %326 = vector.extract_strided_slice %311 {offsets = [8, 0], sizes = [2, 32], strides = [1, 1]} : vector<24x32xf32> to vector<2x32xf32>
    %327 = vector.extract_strided_slice %311 {offsets = [10, 0], sizes = [2, 32], strides = [1, 1]} : vector<24x32xf32> to vector<2x32xf32>
    %328 = arith.maximumf %326, %327 : vector<2x32xf32>
    %329 = vector.broadcast %1 : vector<1x32xf32> to vector<2x32xf32>
    %330 = arith.addf %328, %329 : vector<2x32xf32>
    %cst_165 = arith.constant 0.000000e+00 : f32
    %331 = vector.broadcast %cst_165 : f32 to vector<2x32xf32>
    %332 = arith.maximumf %330, %331 : vector<2x32xf32>
    %333 = vector.extract_strided_slice %311 {offsets = [12, 0], sizes = [2, 32], strides = [1, 1]} : vector<24x32xf32> to vector<2x32xf32>
    %334 = vector.extract_strided_slice %311 {offsets = [14, 0], sizes = [2, 32], strides = [1, 1]} : vector<24x32xf32> to vector<2x32xf32>
    %335 = arith.maximumf %333, %334 : vector<2x32xf32>
    %336 = vector.broadcast %1 : vector<1x32xf32> to vector<2x32xf32>
    %337 = arith.addf %335, %336 : vector<2x32xf32>
    %cst_166 = arith.constant 0.000000e+00 : f32
    %338 = vector.broadcast %cst_166 : f32 to vector<2x32xf32>
    %339 = arith.maximumf %337, %338 : vector<2x32xf32>
    %340 = vector.extract_strided_slice %311 {offsets = [16, 0], sizes = [2, 32], strides = [1, 1]} : vector<24x32xf32> to vector<2x32xf32>
    %341 = vector.extract_strided_slice %311 {offsets = [18, 0], sizes = [2, 32], strides = [1, 1]} : vector<24x32xf32> to vector<2x32xf32>
    %342 = arith.maximumf %340, %341 : vector<2x32xf32>
    %343 = vector.broadcast %1 : vector<1x32xf32> to vector<2x32xf32>
    %344 = arith.addf %342, %343 : vector<2x32xf32>
    %cst_167 = arith.constant 0.000000e+00 : f32
    %345 = vector.broadcast %cst_167 : f32 to vector<2x32xf32>
    %346 = arith.maximumf %344, %345 : vector<2x32xf32>
    %347 = vector.extract_strided_slice %311 {offsets = [20, 0], sizes = [2, 32], strides = [1, 1]} : vector<24x32xf32> to vector<2x32xf32>
    %348 = vector.extract_strided_slice %311 {offsets = [22, 0], sizes = [2, 32], strides = [1, 1]} : vector<24x32xf32> to vector<2x32xf32>
    %349 = arith.maximumf %347, %348 : vector<2x32xf32>
    %350 = vector.broadcast %1 : vector<1x32xf32> to vector<2x32xf32>
    %351 = arith.addf %349, %350 : vector<2x32xf32>
    %cst_168 = arith.constant 0.000000e+00 : f32
    %352 = vector.broadcast %cst_168 : f32 to vector<2x32xf32>
    %353 = arith.maximumf %351, %352 : vector<2x32xf32>
    %354 = tpu.concatenate %318, %325, %332, %339, %346, %353 in 1 : vector<2x32xf32>, vector<2x32xf32>, vector<2x32xf32>, vector<2x32xf32>, vector<2x32xf32>, vector<2x32xf32> -> vector<2x192xf32>
    %355 = arith.truncf %354 : vector<2x192xf32> to vector<2x192xbf16>
    %356 = arith.index_cast %c2_i32_113 : i32 to index
    %c0_169 = arith.constant 0 : index
    %c0_170 = arith.constant 0 : index
    %357 = vector.load %arg6[%356, %c0_169, %c0_170] : memref<6x192x32xbf16, #tpu.memory_space<vmem>>, vector<1x192x32xbf16>
    %358 = vector.shape_cast %357 : vector<1x192x32xbf16> to vector<192x32xbf16>
    %cst_171 = arith.constant dense<0.000000e+00> : vector<2x32xf32>
    %359 = tpu.matmul %355, %358, %cst_171 {dimension_numbers = #tpu.dot_dimension_numbers<[1], [0], [0], [1], [0, 0, 1, 1], [], []>} : vector<2x192xbf16>, vector<192x32xbf16>, vector<2x32xf32> -> vector<2x32xf32>
    %360 = arith.addf %241, %359 : vector<2x32xf32>
    %c3_i32 = arith.constant 3 : i32
    %cst_172 = arith.constant 0.000000e+00 : f32
    %361 = vector.broadcast %cst_172 : f32 to vector<48x32xf32>
    %c2_i32_173 = arith.constant 2 : i32
    %362 = arith.muli %c2_i32_173, %c3_i32 : i32
    %c0_i32_174 = arith.constant 0 : i32
    %363 = arith.addi %362, %c0_i32_174 : i32
    %364 = arith.index_cast %363 : i32 to index
    %c0_175 = arith.constant 0 : index
    %c0_176 = arith.constant 0 : index
    %365 = vector.load %arg11[%364, %c0_175, %c0_176] : memref<14x32x32xbf16, #tpu.memory_space<vmem>>, vector<2x32x32xbf16>
    %366 = vector.extract_strided_slice %365 {offsets = [0, 0, 0], sizes = [2, 24, 32], strides = [1, 1, 1]} : vector<2x32x32xbf16> to vector<2x24x32xbf16>
    %367 = vector.shape_cast %366 : vector<2x24x32xbf16> to vector<48x32xbf16>
    %c0_177 = arith.constant 0 : index
    %c0_178 = arith.constant 0 : index
    %c0_179 = arith.constant 0 : index
    %368 = vector.load %arg4[%c0_177, %c0_178, %c0_179] : memref<9x32x32xbf16, #tpu.memory_space<vmem>>, vector<1x32x32xbf16>
    %369 = vector.shape_cast %368 : vector<1x32x32xbf16> to vector<32x32xbf16>
    %cst_180 = arith.constant dense<0.000000e+00> : vector<48x32xf32>
    %370 = tpu.matmul %367, %369, %cst_180 {dimension_numbers = #tpu.dot_dimension_numbers<[1], [0], [0], [1], [0, 0, 1, 1], [], []>} : vector<48x32xbf16>, vector<32x32xbf16>, vector<48x32xf32> -> vector<48x32xf32>
    %371 = arith.addf %361, %370 : vector<48x32xf32>
    %372 = vector.extract_strided_slice %365 {offsets = [0, 2, 0], sizes = [2, 24, 32], strides = [1, 1, 1]} : vector<2x32x32xbf16> to vector<2x24x32xbf16>
    %373 = vector.shape_cast %372 : vector<2x24x32xbf16> to vector<48x32xbf16>
    %c1_181 = arith.constant 1 : index
    %c0_182 = arith.constant 0 : index
    %c0_183 = arith.constant 0 : index
    %374 = vector.load %arg4[%c1_181, %c0_182, %c0_183] : memref<9x32x32xbf16, #tpu.memory_space<vmem>>, vector<1x32x32xbf16>
    %375 = vector.shape_cast %374 : vector<1x32x32xbf16> to vector<32x32xbf16>
    %cst_184 = arith.constant dense<0.000000e+00> : vector<48x32xf32>
    %376 = tpu.matmul %373, %375, %cst_184 {dimension_numbers = #tpu.dot_dimension_numbers<[1], [0], [0], [1], [0, 0, 1, 1], [], []>} : vector<48x32xbf16>, vector<32x32xbf16>, vector<48x32xf32> -> vector<48x32xf32>
    %377 = arith.addf %371, %376 : vector<48x32xf32>
    %378 = vector.extract_strided_slice %365 {offsets = [0, 4, 0], sizes = [2, 24, 32], strides = [1, 1, 1]} : vector<2x32x32xbf16> to vector<2x24x32xbf16>
    %379 = vector.shape_cast %378 : vector<2x24x32xbf16> to vector<48x32xbf16>
    %c2_185 = arith.constant 2 : index
    %c0_186 = arith.constant 0 : index
    %c0_187 = arith.constant 0 : index
    %380 = vector.load %arg4[%c2_185, %c0_186, %c0_187] : memref<9x32x32xbf16, #tpu.memory_space<vmem>>, vector<1x32x32xbf16>
    %381 = vector.shape_cast %380 : vector<1x32x32xbf16> to vector<32x32xbf16>
    %cst_188 = arith.constant dense<0.000000e+00> : vector<48x32xf32>
    %382 = tpu.matmul %379, %381, %cst_188 {dimension_numbers = #tpu.dot_dimension_numbers<[1], [0], [0], [1], [0, 0, 1, 1], [], []>} : vector<48x32xbf16>, vector<32x32xbf16>, vector<48x32xf32> -> vector<48x32xf32>
    %383 = arith.addf %377, %382 : vector<48x32xf32>
    %c2_i32_189 = arith.constant 2 : i32
    %384 = arith.muli %c2_i32_189, %c3_i32 : i32
    %c1_i32_190 = arith.constant 1 : i32
    %385 = arith.addi %384, %c1_i32_190 : i32
    %386 = arith.index_cast %385 : i32 to index
    %c0_191 = arith.constant 0 : index
    %c0_192 = arith.constant 0 : index
    %387 = vector.load %arg11[%386, %c0_191, %c0_192] : memref<14x32x32xbf16, #tpu.memory_space<vmem>>, vector<2x32x32xbf16>
    %388 = vector.extract_strided_slice %387 {offsets = [0, 0, 0], sizes = [2, 24, 32], strides = [1, 1, 1]} : vector<2x32x32xbf16> to vector<2x24x32xbf16>
    %389 = vector.shape_cast %388 : vector<2x24x32xbf16> to vector<48x32xbf16>
    %c3_193 = arith.constant 3 : index
    %c0_194 = arith.constant 0 : index
    %c0_195 = arith.constant 0 : index
    %390 = vector.load %arg4[%c3_193, %c0_194, %c0_195] : memref<9x32x32xbf16, #tpu.memory_space<vmem>>, vector<1x32x32xbf16>
    %391 = vector.shape_cast %390 : vector<1x32x32xbf16> to vector<32x32xbf16>
    %cst_196 = arith.constant dense<0.000000e+00> : vector<48x32xf32>
    %392 = tpu.matmul %389, %391, %cst_196 {dimension_numbers = #tpu.dot_dimension_numbers<[1], [0], [0], [1], [0, 0, 1, 1], [], []>} : vector<48x32xbf16>, vector<32x32xbf16>, vector<48x32xf32> -> vector<48x32xf32>
    %393 = arith.addf %383, %392 : vector<48x32xf32>
    %394 = vector.extract_strided_slice %387 {offsets = [0, 2, 0], sizes = [2, 24, 32], strides = [1, 1, 1]} : vector<2x32x32xbf16> to vector<2x24x32xbf16>
    %395 = vector.shape_cast %394 : vector<2x24x32xbf16> to vector<48x32xbf16>
    %c4_197 = arith.constant 4 : index
    %c0_198 = arith.constant 0 : index
    %c0_199 = arith.constant 0 : index
    %396 = vector.load %arg4[%c4_197, %c0_198, %c0_199] : memref<9x32x32xbf16, #tpu.memory_space<vmem>>, vector<1x32x32xbf16>
    %397 = vector.shape_cast %396 : vector<1x32x32xbf16> to vector<32x32xbf16>
    %cst_200 = arith.constant dense<0.000000e+00> : vector<48x32xf32>
    %398 = tpu.matmul %395, %397, %cst_200 {dimension_numbers = #tpu.dot_dimension_numbers<[1], [0], [0], [1], [0, 0, 1, 1], [], []>} : vector<48x32xbf16>, vector<32x32xbf16>, vector<48x32xf32> -> vector<48x32xf32>
    %399 = arith.addf %393, %398 : vector<48x32xf32>
    %400 = vector.extract_strided_slice %387 {offsets = [0, 4, 0], sizes = [2, 24, 32], strides = [1, 1, 1]} : vector<2x32x32xbf16> to vector<2x24x32xbf16>
    %401 = vector.shape_cast %400 : vector<2x24x32xbf16> to vector<48x32xbf16>
    %c5_201 = arith.constant 5 : index
    %c0_202 = arith.constant 0 : index
    %c0_203 = arith.constant 0 : index
    %402 = vector.load %arg4[%c5_201, %c0_202, %c0_203] : memref<9x32x32xbf16, #tpu.memory_space<vmem>>, vector<1x32x32xbf16>
    %403 = vector.shape_cast %402 : vector<1x32x32xbf16> to vector<32x32xbf16>
    %cst_204 = arith.constant dense<0.000000e+00> : vector<48x32xf32>
    %404 = tpu.matmul %401, %403, %cst_204 {dimension_numbers = #tpu.dot_dimension_numbers<[1], [0], [0], [1], [0, 0, 1, 1], [], []>} : vector<48x32xbf16>, vector<32x32xbf16>, vector<48x32xf32> -> vector<48x32xf32>
    %405 = arith.addf %399, %404 : vector<48x32xf32>
    %c2_i32_205 = arith.constant 2 : i32
    %406 = arith.muli %c2_i32_205, %c3_i32 : i32
    %c2_i32_206 = arith.constant 2 : i32
    %407 = arith.addi %406, %c2_i32_206 : i32
    %408 = arith.index_cast %407 : i32 to index
    %c0_207 = arith.constant 0 : index
    %c0_208 = arith.constant 0 : index
    %409 = vector.load %arg11[%408, %c0_207, %c0_208] : memref<14x32x32xbf16, #tpu.memory_space<vmem>>, vector<2x32x32xbf16>
    %410 = vector.extract_strided_slice %409 {offsets = [0, 0, 0], sizes = [2, 24, 32], strides = [1, 1, 1]} : vector<2x32x32xbf16> to vector<2x24x32xbf16>
    %411 = vector.shape_cast %410 : vector<2x24x32xbf16> to vector<48x32xbf16>
    %c6_209 = arith.constant 6 : index
    %c0_210 = arith.constant 0 : index
    %c0_211 = arith.constant 0 : index
    %412 = vector.load %arg4[%c6_209, %c0_210, %c0_211] : memref<9x32x32xbf16, #tpu.memory_space<vmem>>, vector<1x32x32xbf16>
    %413 = vector.shape_cast %412 : vector<1x32x32xbf16> to vector<32x32xbf16>
    %cst_212 = arith.constant dense<0.000000e+00> : vector<48x32xf32>
    %414 = tpu.matmul %411, %413, %cst_212 {dimension_numbers = #tpu.dot_dimension_numbers<[1], [0], [0], [1], [0, 0, 1, 1], [], []>} : vector<48x32xbf16>, vector<32x32xbf16>, vector<48x32xf32> -> vector<48x32xf32>
    %415 = arith.addf %405, %414 : vector<48x32xf32>
    %416 = vector.extract_strided_slice %409 {offsets = [0, 2, 0], sizes = [2, 24, 32], strides = [1, 1, 1]} : vector<2x32x32xbf16> to vector<2x24x32xbf16>
    %417 = vector.shape_cast %416 : vector<2x24x32xbf16> to vector<48x32xbf16>
    %c7_213 = arith.constant 7 : index
    %c0_214 = arith.constant 0 : index
    %c0_215 = arith.constant 0 : index
    %418 = vector.load %arg4[%c7_213, %c0_214, %c0_215] : memref<9x32x32xbf16, #tpu.memory_space<vmem>>, vector<1x32x32xbf16>
    %419 = vector.shape_cast %418 : vector<1x32x32xbf16> to vector<32x32xbf16>
    %cst_216 = arith.constant dense<0.000000e+00> : vector<48x32xf32>
    %420 = tpu.matmul %417, %419, %cst_216 {dimension_numbers = #tpu.dot_dimension_numbers<[1], [0], [0], [1], [0, 0, 1, 1], [], []>} : vector<48x32xbf16>, vector<32x32xbf16>, vector<48x32xf32> -> vector<48x32xf32>
    %421 = arith.addf %415, %420 : vector<48x32xf32>
    %422 = vector.extract_strided_slice %409 {offsets = [0, 4, 0], sizes = [2, 24, 32], strides = [1, 1, 1]} : vector<2x32x32xbf16> to vector<2x24x32xbf16>
    %423 = vector.shape_cast %422 : vector<2x24x32xbf16> to vector<48x32xbf16>
    %c8_217 = arith.constant 8 : index
    %c0_218 = arith.constant 0 : index
    %c0_219 = arith.constant 0 : index
    %424 = vector.load %arg4[%c8_217, %c0_218, %c0_219] : memref<9x32x32xbf16, #tpu.memory_space<vmem>>, vector<1x32x32xbf16>
    %425 = vector.shape_cast %424 : vector<1x32x32xbf16> to vector<32x32xbf16>
    %cst_220 = arith.constant dense<0.000000e+00> : vector<48x32xf32>
    %426 = tpu.matmul %423, %425, %cst_220 {dimension_numbers = #tpu.dot_dimension_numbers<[1], [0], [0], [1], [0, 0, 1, 1], [], []>} : vector<48x32xbf16>, vector<32x32xbf16>, vector<48x32xf32> -> vector<48x32xf32>
    %427 = arith.addf %421, %426 : vector<48x32xf32>
    %428 = vector.extract_strided_slice %427 {offsets = [0, 0], sizes = [24, 32], strides = [1, 1]} : vector<48x32xf32> to vector<24x32xf32>
    %429 = vector.extract_strided_slice %427 {offsets = [24, 0], sizes = [24, 32], strides = [1, 1]} : vector<48x32xf32> to vector<24x32xf32>
    %430 = arith.maximumf %428, %429 : vector<24x32xf32>
    %431 = vector.extract_strided_slice %430 {offsets = [0, 0], sizes = [2, 32], strides = [1, 1]} : vector<24x32xf32> to vector<2x32xf32>
    %432 = vector.extract_strided_slice %430 {offsets = [2, 0], sizes = [2, 32], strides = [1, 1]} : vector<24x32xf32> to vector<2x32xf32>
    %433 = arith.maximumf %431, %432 : vector<2x32xf32>
    %434 = vector.broadcast %1 : vector<1x32xf32> to vector<2x32xf32>
    %435 = arith.addf %433, %434 : vector<2x32xf32>
    %cst_221 = arith.constant 0.000000e+00 : f32
    %436 = vector.broadcast %cst_221 : f32 to vector<2x32xf32>
    %437 = arith.maximumf %435, %436 : vector<2x32xf32>
    %438 = vector.extract_strided_slice %430 {offsets = [4, 0], sizes = [2, 32], strides = [1, 1]} : vector<24x32xf32> to vector<2x32xf32>
    %439 = vector.extract_strided_slice %430 {offsets = [6, 0], sizes = [2, 32], strides = [1, 1]} : vector<24x32xf32> to vector<2x32xf32>
    %440 = arith.maximumf %438, %439 : vector<2x32xf32>
    %441 = vector.broadcast %1 : vector<1x32xf32> to vector<2x32xf32>
    %442 = arith.addf %440, %441 : vector<2x32xf32>
    %cst_222 = arith.constant 0.000000e+00 : f32
    %443 = vector.broadcast %cst_222 : f32 to vector<2x32xf32>
    %444 = arith.maximumf %442, %443 : vector<2x32xf32>
    %445 = vector.extract_strided_slice %430 {offsets = [8, 0], sizes = [2, 32], strides = [1, 1]} : vector<24x32xf32> to vector<2x32xf32>
    %446 = vector.extract_strided_slice %430 {offsets = [10, 0], sizes = [2, 32], strides = [1, 1]} : vector<24x32xf32> to vector<2x32xf32>
    %447 = arith.maximumf %445, %446 : vector<2x32xf32>
    %448 = vector.broadcast %1 : vector<1x32xf32> to vector<2x32xf32>
    %449 = arith.addf %447, %448 : vector<2x32xf32>
    %cst_223 = arith.constant 0.000000e+00 : f32
    %450 = vector.broadcast %cst_223 : f32 to vector<2x32xf32>
    %451 = arith.maximumf %449, %450 : vector<2x32xf32>
    %452 = vector.extract_strided_slice %430 {offsets = [12, 0], sizes = [2, 32], strides = [1, 1]} : vector<24x32xf32> to vector<2x32xf32>
    %453 = vector.extract_strided_slice %430 {offsets = [14, 0], sizes = [2, 32], strides = [1, 1]} : vector<24x32xf32> to vector<2x32xf32>
    %454 = arith.maximumf %452, %453 : vector<2x32xf32>
    %455 = vector.broadcast %1 : vector<1x32xf32> to vector<2x32xf32>
    %456 = arith.addf %454, %455 : vector<2x32xf32>
    %cst_224 = arith.constant 0.000000e+00 : f32
    %457 = vector.broadcast %cst_224 : f32 to vector<2x32xf32>
    %458 = arith.maximumf %456, %457 : vector<2x32xf32>
    %459 = vector.extract_strided_slice %430 {offsets = [16, 0], sizes = [2, 32], strides = [1, 1]} : vector<24x32xf32> to vector<2x32xf32>
    %460 = vector.extract_strided_slice %430 {offsets = [18, 0], sizes = [2, 32], strides = [1, 1]} : vector<24x32xf32> to vector<2x32xf32>
    %461 = arith.maximumf %459, %460 : vector<2x32xf32>
    %462 = vector.broadcast %1 : vector<1x32xf32> to vector<2x32xf32>
    %463 = arith.addf %461, %462 : vector<2x32xf32>
    %cst_225 = arith.constant 0.000000e+00 : f32
    %464 = vector.broadcast %cst_225 : f32 to vector<2x32xf32>
    %465 = arith.maximumf %463, %464 : vector<2x32xf32>
    %466 = vector.extract_strided_slice %430 {offsets = [20, 0], sizes = [2, 32], strides = [1, 1]} : vector<24x32xf32> to vector<2x32xf32>
    %467 = vector.extract_strided_slice %430 {offsets = [22, 0], sizes = [2, 32], strides = [1, 1]} : vector<24x32xf32> to vector<2x32xf32>
    %468 = arith.maximumf %466, %467 : vector<2x32xf32>
    %469 = vector.broadcast %1 : vector<1x32xf32> to vector<2x32xf32>
    %470 = arith.addf %468, %469 : vector<2x32xf32>
    %cst_226 = arith.constant 0.000000e+00 : f32
    %471 = vector.broadcast %cst_226 : f32 to vector<2x32xf32>
    %472 = arith.maximumf %470, %471 : vector<2x32xf32>
    %473 = tpu.concatenate %437, %444, %451, %458, %465, %472 in 1 : vector<2x32xf32>, vector<2x32xf32>, vector<2x32xf32>, vector<2x32xf32>, vector<2x32xf32>, vector<2x32xf32> -> vector<2x192xf32>
    %474 = arith.truncf %473 : vector<2x192xf32> to vector<2x192xbf16>
    %475 = arith.index_cast %c3_i32 : i32 to index
    %c0_227 = arith.constant 0 : index
    %c0_228 = arith.constant 0 : index
    %476 = vector.load %arg6[%475, %c0_227, %c0_228] : memref<6x192x32xbf16, #tpu.memory_space<vmem>>, vector<1x192x32xbf16>
    %477 = vector.shape_cast %476 : vector<1x192x32xbf16> to vector<192x32xbf16>
    %cst_229 = arith.constant dense<0.000000e+00> : vector<2x32xf32>
    %478 = tpu.matmul %474, %477, %cst_229 {dimension_numbers = #tpu.dot_dimension_numbers<[1], [0], [0], [1], [0, 0, 1, 1], [], []>} : vector<2x192xbf16>, vector<192x32xbf16>, vector<2x32xf32> -> vector<2x32xf32>
    %479 = arith.addf %360, %478 : vector<2x32xf32>
    %c4_i32 = arith.constant 4 : i32
    %cst_230 = arith.constant 0.000000e+00 : f32
    %480 = vector.broadcast %cst_230 : f32 to vector<48x32xf32>
    %c2_i32_231 = arith.constant 2 : i32
    %481 = arith.muli %c2_i32_231, %c4_i32 : i32
    %c0_i32_232 = arith.constant 0 : i32
    %482 = arith.addi %481, %c0_i32_232 : i32
    %483 = arith.index_cast %482 : i32 to index
    %c0_233 = arith.constant 0 : index
    %c0_234 = arith.constant 0 : index
    %484 = vector.load %arg11[%483, %c0_233, %c0_234] : memref<14x32x32xbf16, #tpu.memory_space<vmem>>, vector<2x32x32xbf16>
    %485 = vector.extract_strided_slice %484 {offsets = [0, 0, 0], sizes = [2, 24, 32], strides = [1, 1, 1]} : vector<2x32x32xbf16> to vector<2x24x32xbf16>
    %486 = vector.shape_cast %485 : vector<2x24x32xbf16> to vector<48x32xbf16>
    %c0_235 = arith.constant 0 : index
    %c0_236 = arith.constant 0 : index
    %c0_237 = arith.constant 0 : index
    %487 = vector.load %arg4[%c0_235, %c0_236, %c0_237] : memref<9x32x32xbf16, #tpu.memory_space<vmem>>, vector<1x32x32xbf16>
    %488 = vector.shape_cast %487 : vector<1x32x32xbf16> to vector<32x32xbf16>
    %cst_238 = arith.constant dense<0.000000e+00> : vector<48x32xf32>
    %489 = tpu.matmul %486, %488, %cst_238 {dimension_numbers = #tpu.dot_dimension_numbers<[1], [0], [0], [1], [0, 0, 1, 1], [], []>} : vector<48x32xbf16>, vector<32x32xbf16>, vector<48x32xf32> -> vector<48x32xf32>
    %490 = arith.addf %480, %489 : vector<48x32xf32>
    %491 = vector.extract_strided_slice %484 {offsets = [0, 2, 0], sizes = [2, 24, 32], strides = [1, 1, 1]} : vector<2x32x32xbf16> to vector<2x24x32xbf16>
    %492 = vector.shape_cast %491 : vector<2x24x32xbf16> to vector<48x32xbf16>
    %c1_239 = arith.constant 1 : index
    %c0_240 = arith.constant 0 : index
    %c0_241 = arith.constant 0 : index
    %493 = vector.load %arg4[%c1_239, %c0_240, %c0_241] : memref<9x32x32xbf16, #tpu.memory_space<vmem>>, vector<1x32x32xbf16>
    %494 = vector.shape_cast %493 : vector<1x32x32xbf16> to vector<32x32xbf16>
    %cst_242 = arith.constant dense<0.000000e+00> : vector<48x32xf32>
    %495 = tpu.matmul %492, %494, %cst_242 {dimension_numbers = #tpu.dot_dimension_numbers<[1], [0], [0], [1], [0, 0, 1, 1], [], []>} : vector<48x32xbf16>, vector<32x32xbf16>, vector<48x32xf32> -> vector<48x32xf32>
    %496 = arith.addf %490, %495 : vector<48x32xf32>
    %497 = vector.extract_strided_slice %484 {offsets = [0, 4, 0], sizes = [2, 24, 32], strides = [1, 1, 1]} : vector<2x32x32xbf16> to vector<2x24x32xbf16>
    %498 = vector.shape_cast %497 : vector<2x24x32xbf16> to vector<48x32xbf16>
    %c2_243 = arith.constant 2 : index
    %c0_244 = arith.constant 0 : index
    %c0_245 = arith.constant 0 : index
    %499 = vector.load %arg4[%c2_243, %c0_244, %c0_245] : memref<9x32x32xbf16, #tpu.memory_space<vmem>>, vector<1x32x32xbf16>
    %500 = vector.shape_cast %499 : vector<1x32x32xbf16> to vector<32x32xbf16>
    %cst_246 = arith.constant dense<0.000000e+00> : vector<48x32xf32>
    %501 = tpu.matmul %498, %500, %cst_246 {dimension_numbers = #tpu.dot_dimension_numbers<[1], [0], [0], [1], [0, 0, 1, 1], [], []>} : vector<48x32xbf16>, vector<32x32xbf16>, vector<48x32xf32> -> vector<48x32xf32>
    %502 = arith.addf %496, %501 : vector<48x32xf32>
    %c2_i32_247 = arith.constant 2 : i32
    %503 = arith.muli %c2_i32_247, %c4_i32 : i32
    %c1_i32_248 = arith.constant 1 : i32
    %504 = arith.addi %503, %c1_i32_248 : i32
    %505 = arith.index_cast %504 : i32 to index
    %c0_249 = arith.constant 0 : index
    %c0_250 = arith.constant 0 : index
    %506 = vector.load %arg11[%505, %c0_249, %c0_250] : memref<14x32x32xbf16, #tpu.memory_space<vmem>>, vector<2x32x32xbf16>
    %507 = vector.extract_strided_slice %506 {offsets = [0, 0, 0], sizes = [2, 24, 32], strides = [1, 1, 1]} : vector<2x32x32xbf16> to vector<2x24x32xbf16>
    %508 = vector.shape_cast %507 : vector<2x24x32xbf16> to vector<48x32xbf16>
    %c3_251 = arith.constant 3 : index
    %c0_252 = arith.constant 0 : index
    %c0_253 = arith.constant 0 : index
    %509 = vector.load %arg4[%c3_251, %c0_252, %c0_253] : memref<9x32x32xbf16, #tpu.memory_space<vmem>>, vector<1x32x32xbf16>
    %510 = vector.shape_cast %509 : vector<1x32x32xbf16> to vector<32x32xbf16>
    %cst_254 = arith.constant dense<0.000000e+00> : vector<48x32xf32>
    %511 = tpu.matmul %508, %510, %cst_254 {dimension_numbers = #tpu.dot_dimension_numbers<[1], [0], [0], [1], [0, 0, 1, 1], [], []>} : vector<48x32xbf16>, vector<32x32xbf16>, vector<48x32xf32> -> vector<48x32xf32>
    %512 = arith.addf %502, %511 : vector<48x32xf32>
    %513 = vector.extract_strided_slice %506 {offsets = [0, 2, 0], sizes = [2, 24, 32], strides = [1, 1, 1]} : vector<2x32x32xbf16> to vector<2x24x32xbf16>
    %514 = vector.shape_cast %513 : vector<2x24x32xbf16> to vector<48x32xbf16>
    %c4_255 = arith.constant 4 : index
    %c0_256 = arith.constant 0 : index
    %c0_257 = arith.constant 0 : index
    %515 = vector.load %arg4[%c4_255, %c0_256, %c0_257] : memref<9x32x32xbf16, #tpu.memory_space<vmem>>, vector<1x32x32xbf16>
    %516 = vector.shape_cast %515 : vector<1x32x32xbf16> to vector<32x32xbf16>
    %cst_258 = arith.constant dense<0.000000e+00> : vector<48x32xf32>
    %517 = tpu.matmul %514, %516, %cst_258 {dimension_numbers = #tpu.dot_dimension_numbers<[1], [0], [0], [1], [0, 0, 1, 1], [], []>} : vector<48x32xbf16>, vector<32x32xbf16>, vector<48x32xf32> -> vector<48x32xf32>
    %518 = arith.addf %512, %517 : vector<48x32xf32>
    %519 = vector.extract_strided_slice %506 {offsets = [0, 4, 0], sizes = [2, 24, 32], strides = [1, 1, 1]} : vector<2x32x32xbf16> to vector<2x24x32xbf16>
    %520 = vector.shape_cast %519 : vector<2x24x32xbf16> to vector<48x32xbf16>
    %c5_259 = arith.constant 5 : index
    %c0_260 = arith.constant 0 : index
    %c0_261 = arith.constant 0 : index
    %521 = vector.load %arg4[%c5_259, %c0_260, %c0_261] : memref<9x32x32xbf16, #tpu.memory_space<vmem>>, vector<1x32x32xbf16>
    %522 = vector.shape_cast %521 : vector<1x32x32xbf16> to vector<32x32xbf16>
    %cst_262 = arith.constant dense<0.000000e+00> : vector<48x32xf32>
    %523 = tpu.matmul %520, %522, %cst_262 {dimension_numbers = #tpu.dot_dimension_numbers<[1], [0], [0], [1], [0, 0, 1, 1], [], []>} : vector<48x32xbf16>, vector<32x32xbf16>, vector<48x32xf32> -> vector<48x32xf32>
    %524 = arith.addf %518, %523 : vector<48x32xf32>
    %c2_i32_263 = arith.constant 2 : i32
    %525 = arith.muli %c2_i32_263, %c4_i32 : i32
    %c2_i32_264 = arith.constant 2 : i32
    %526 = arith.addi %525, %c2_i32_264 : i32
    %527 = arith.index_cast %526 : i32 to index
    %c0_265 = arith.constant 0 : index
    %c0_266 = arith.constant 0 : index
    %528 = vector.load %arg11[%527, %c0_265, %c0_266] : memref<14x32x32xbf16, #tpu.memory_space<vmem>>, vector<2x32x32xbf16>
    %529 = vector.extract_strided_slice %528 {offsets = [0, 0, 0], sizes = [2, 24, 32], strides = [1, 1, 1]} : vector<2x32x32xbf16> to vector<2x24x32xbf16>
    %530 = vector.shape_cast %529 : vector<2x24x32xbf16> to vector<48x32xbf16>
    %c6_267 = arith.constant 6 : index
    %c0_268 = arith.constant 0 : index
    %c0_269 = arith.constant 0 : index
    %531 = vector.load %arg4[%c6_267, %c0_268, %c0_269] : memref<9x32x32xbf16, #tpu.memory_space<vmem>>, vector<1x32x32xbf16>
    %532 = vector.shape_cast %531 : vector<1x32x32xbf16> to vector<32x32xbf16>
    %cst_270 = arith.constant dense<0.000000e+00> : vector<48x32xf32>
    %533 = tpu.matmul %530, %532, %cst_270 {dimension_numbers = #tpu.dot_dimension_numbers<[1], [0], [0], [1], [0, 0, 1, 1], [], []>} : vector<48x32xbf16>, vector<32x32xbf16>, vector<48x32xf32> -> vector<48x32xf32>
    %534 = arith.addf %524, %533 : vector<48x32xf32>
    %535 = vector.extract_strided_slice %528 {offsets = [0, 2, 0], sizes = [2, 24, 32], strides = [1, 1, 1]} : vector<2x32x32xbf16> to vector<2x24x32xbf16>
    %536 = vector.shape_cast %535 : vector<2x24x32xbf16> to vector<48x32xbf16>
    %c7_271 = arith.constant 7 : index
    %c0_272 = arith.constant 0 : index
    %c0_273 = arith.constant 0 : index
    %537 = vector.load %arg4[%c7_271, %c0_272, %c0_273] : memref<9x32x32xbf16, #tpu.memory_space<vmem>>, vector<1x32x32xbf16>
    %538 = vector.shape_cast %537 : vector<1x32x32xbf16> to vector<32x32xbf16>
    %cst_274 = arith.constant dense<0.000000e+00> : vector<48x32xf32>
    %539 = tpu.matmul %536, %538, %cst_274 {dimension_numbers = #tpu.dot_dimension_numbers<[1], [0], [0], [1], [0, 0, 1, 1], [], []>} : vector<48x32xbf16>, vector<32x32xbf16>, vector<48x32xf32> -> vector<48x32xf32>
    %540 = arith.addf %534, %539 : vector<48x32xf32>
    %541 = vector.extract_strided_slice %528 {offsets = [0, 4, 0], sizes = [2, 24, 32], strides = [1, 1, 1]} : vector<2x32x32xbf16> to vector<2x24x32xbf16>
    %542 = vector.shape_cast %541 : vector<2x24x32xbf16> to vector<48x32xbf16>
    %c8_275 = arith.constant 8 : index
    %c0_276 = arith.constant 0 : index
    %c0_277 = arith.constant 0 : index
    %543 = vector.load %arg4[%c8_275, %c0_276, %c0_277] : memref<9x32x32xbf16, #tpu.memory_space<vmem>>, vector<1x32x32xbf16>
    %544 = vector.shape_cast %543 : vector<1x32x32xbf16> to vector<32x32xbf16>
    %cst_278 = arith.constant dense<0.000000e+00> : vector<48x32xf32>
    %545 = tpu.matmul %542, %544, %cst_278 {dimension_numbers = #tpu.dot_dimension_numbers<[1], [0], [0], [1], [0, 0, 1, 1], [], []>} : vector<48x32xbf16>, vector<32x32xbf16>, vector<48x32xf32> -> vector<48x32xf32>
    %546 = arith.addf %540, %545 : vector<48x32xf32>
    %547 = vector.extract_strided_slice %546 {offsets = [0, 0], sizes = [24, 32], strides = [1, 1]} : vector<48x32xf32> to vector<24x32xf32>
    %548 = vector.extract_strided_slice %546 {offsets = [24, 0], sizes = [24, 32], strides = [1, 1]} : vector<48x32xf32> to vector<24x32xf32>
    %549 = arith.maximumf %547, %548 : vector<24x32xf32>
    %550 = vector.extract_strided_slice %549 {offsets = [0, 0], sizes = [2, 32], strides = [1, 1]} : vector<24x32xf32> to vector<2x32xf32>
    %551 = vector.extract_strided_slice %549 {offsets = [2, 0], sizes = [2, 32], strides = [1, 1]} : vector<24x32xf32> to vector<2x32xf32>
    %552 = arith.maximumf %550, %551 : vector<2x32xf32>
    %553 = vector.broadcast %1 : vector<1x32xf32> to vector<2x32xf32>
    %554 = arith.addf %552, %553 : vector<2x32xf32>
    %cst_279 = arith.constant 0.000000e+00 : f32
    %555 = vector.broadcast %cst_279 : f32 to vector<2x32xf32>
    %556 = arith.maximumf %554, %555 : vector<2x32xf32>
    %557 = vector.extract_strided_slice %549 {offsets = [4, 0], sizes = [2, 32], strides = [1, 1]} : vector<24x32xf32> to vector<2x32xf32>
    %558 = vector.extract_strided_slice %549 {offsets = [6, 0], sizes = [2, 32], strides = [1, 1]} : vector<24x32xf32> to vector<2x32xf32>
    %559 = arith.maximumf %557, %558 : vector<2x32xf32>
    %560 = vector.broadcast %1 : vector<1x32xf32> to vector<2x32xf32>
    %561 = arith.addf %559, %560 : vector<2x32xf32>
    %cst_280 = arith.constant 0.000000e+00 : f32
    %562 = vector.broadcast %cst_280 : f32 to vector<2x32xf32>
    %563 = arith.maximumf %561, %562 : vector<2x32xf32>
    %564 = vector.extract_strided_slice %549 {offsets = [8, 0], sizes = [2, 32], strides = [1, 1]} : vector<24x32xf32> to vector<2x32xf32>
    %565 = vector.extract_strided_slice %549 {offsets = [10, 0], sizes = [2, 32], strides = [1, 1]} : vector<24x32xf32> to vector<2x32xf32>
    %566 = arith.maximumf %564, %565 : vector<2x32xf32>
    %567 = vector.broadcast %1 : vector<1x32xf32> to vector<2x32xf32>
    %568 = arith.addf %566, %567 : vector<2x32xf32>
    %cst_281 = arith.constant 0.000000e+00 : f32
    %569 = vector.broadcast %cst_281 : f32 to vector<2x32xf32>
    %570 = arith.maximumf %568, %569 : vector<2x32xf32>
    %571 = vector.extract_strided_slice %549 {offsets = [12, 0], sizes = [2, 32], strides = [1, 1]} : vector<24x32xf32> to vector<2x32xf32>
    %572 = vector.extract_strided_slice %549 {offsets = [14, 0], sizes = [2, 32], strides = [1, 1]} : vector<24x32xf32> to vector<2x32xf32>
    %573 = arith.maximumf %571, %572 : vector<2x32xf32>
    %574 = vector.broadcast %1 : vector<1x32xf32> to vector<2x32xf32>
    %575 = arith.addf %573, %574 : vector<2x32xf32>
    %cst_282 = arith.constant 0.000000e+00 : f32
    %576 = vector.broadcast %cst_282 : f32 to vector<2x32xf32>
    %577 = arith.maximumf %575, %576 : vector<2x32xf32>
    %578 = vector.extract_strided_slice %549 {offsets = [16, 0], sizes = [2, 32], strides = [1, 1]} : vector<24x32xf32> to vector<2x32xf32>
    %579 = vector.extract_strided_slice %549 {offsets = [18, 0], sizes = [2, 32], strides = [1, 1]} : vector<24x32xf32> to vector<2x32xf32>
    %580 = arith.maximumf %578, %579 : vector<2x32xf32>
    %581 = vector.broadcast %1 : vector<1x32xf32> to vector<2x32xf32>
    %582 = arith.addf %580, %581 : vector<2x32xf32>
    %cst_283 = arith.constant 0.000000e+00 : f32
    %583 = vector.broadcast %cst_283 : f32 to vector<2x32xf32>
    %584 = arith.maximumf %582, %583 : vector<2x32xf32>
    %585 = vector.extract_strided_slice %549 {offsets = [20, 0], sizes = [2, 32], strides = [1, 1]} : vector<24x32xf32> to vector<2x32xf32>
    %586 = vector.extract_strided_slice %549 {offsets = [22, 0], sizes = [2, 32], strides = [1, 1]} : vector<24x32xf32> to vector<2x32xf32>
    %587 = arith.maximumf %585, %586 : vector<2x32xf32>
    %588 = vector.broadcast %1 : vector<1x32xf32> to vector<2x32xf32>
    %589 = arith.addf %587, %588 : vector<2x32xf32>
    %cst_284 = arith.constant 0.000000e+00 : f32
    %590 = vector.broadcast %cst_284 : f32 to vector<2x32xf32>
    %591 = arith.maximumf %589, %590 : vector<2x32xf32>
    %592 = tpu.concatenate %556, %563, %570, %577, %584, %591 in 1 : vector<2x32xf32>, vector<2x32xf32>, vector<2x32xf32>, vector<2x32xf32>, vector<2x32xf32>, vector<2x32xf32> -> vector<2x192xf32>
    %593 = arith.truncf %592 : vector<2x192xf32> to vector<2x192xbf16>
    %594 = arith.index_cast %c4_i32 : i32 to index
    %c0_285 = arith.constant 0 : index
    %c0_286 = arith.constant 0 : index
    %595 = vector.load %arg6[%594, %c0_285, %c0_286] : memref<6x192x32xbf16, #tpu.memory_space<vmem>>, vector<1x192x32xbf16>
    %596 = vector.shape_cast %595 : vector<1x192x32xbf16> to vector<192x32xbf16>
    %cst_287 = arith.constant dense<0.000000e+00> : vector<2x32xf32>
    %597 = tpu.matmul %593, %596, %cst_287 {dimension_numbers = #tpu.dot_dimension_numbers<[1], [0], [0], [1], [0, 0, 1, 1], [], []>} : vector<2x192xbf16>, vector<192x32xbf16>, vector<2x32xf32> -> vector<2x32xf32>
    %598 = arith.addf %479, %597 : vector<2x32xf32>
    %c5_i32 = arith.constant 5 : i32
    %cst_288 = arith.constant 0.000000e+00 : f32
    %599 = vector.broadcast %cst_288 : f32 to vector<48x32xf32>
    %c2_i32_289 = arith.constant 2 : i32
    %600 = arith.muli %c2_i32_289, %c5_i32 : i32
    %c0_i32_290 = arith.constant 0 : i32
    %601 = arith.addi %600, %c0_i32_290 : i32
    %602 = arith.index_cast %601 : i32 to index
    %c0_291 = arith.constant 0 : index
    %c0_292 = arith.constant 0 : index
    %603 = vector.load %arg11[%602, %c0_291, %c0_292] : memref<14x32x32xbf16, #tpu.memory_space<vmem>>, vector<2x32x32xbf16>
    %604 = vector.extract_strided_slice %603 {offsets = [0, 0, 0], sizes = [2, 24, 32], strides = [1, 1, 1]} : vector<2x32x32xbf16> to vector<2x24x32xbf16>
    %605 = vector.shape_cast %604 : vector<2x24x32xbf16> to vector<48x32xbf16>
    %c0_293 = arith.constant 0 : index
    %c0_294 = arith.constant 0 : index
    %c0_295 = arith.constant 0 : index
    %606 = vector.load %arg4[%c0_293, %c0_294, %c0_295] : memref<9x32x32xbf16, #tpu.memory_space<vmem>>, vector<1x32x32xbf16>
    %607 = vector.shape_cast %606 : vector<1x32x32xbf16> to vector<32x32xbf16>
    %cst_296 = arith.constant dense<0.000000e+00> : vector<48x32xf32>
    %608 = tpu.matmul %605, %607, %cst_296 {dimension_numbers = #tpu.dot_dimension_numbers<[1], [0], [0], [1], [0, 0, 1, 1], [], []>} : vector<48x32xbf16>, vector<32x32xbf16>, vector<48x32xf32> -> vector<48x32xf32>
    %609 = arith.addf %599, %608 : vector<48x32xf32>
    %610 = vector.extract_strided_slice %603 {offsets = [0, 2, 0], sizes = [2, 24, 32], strides = [1, 1, 1]} : vector<2x32x32xbf16> to vector<2x24x32xbf16>
    %611 = vector.shape_cast %610 : vector<2x24x32xbf16> to vector<48x32xbf16>
    %c1_297 = arith.constant 1 : index
    %c0_298 = arith.constant 0 : index
    %c0_299 = arith.constant 0 : index
    %612 = vector.load %arg4[%c1_297, %c0_298, %c0_299] : memref<9x32x32xbf16, #tpu.memory_space<vmem>>, vector<1x32x32xbf16>
    %613 = vector.shape_cast %612 : vector<1x32x32xbf16> to vector<32x32xbf16>
    %cst_300 = arith.constant dense<0.000000e+00> : vector<48x32xf32>
    %614 = tpu.matmul %611, %613, %cst_300 {dimension_numbers = #tpu.dot_dimension_numbers<[1], [0], [0], [1], [0, 0, 1, 1], [], []>} : vector<48x32xbf16>, vector<32x32xbf16>, vector<48x32xf32> -> vector<48x32xf32>
    %615 = arith.addf %609, %614 : vector<48x32xf32>
    %616 = vector.extract_strided_slice %603 {offsets = [0, 4, 0], sizes = [2, 24, 32], strides = [1, 1, 1]} : vector<2x32x32xbf16> to vector<2x24x32xbf16>
    %617 = vector.shape_cast %616 : vector<2x24x32xbf16> to vector<48x32xbf16>
    %c2_301 = arith.constant 2 : index
    %c0_302 = arith.constant 0 : index
    %c0_303 = arith.constant 0 : index
    %618 = vector.load %arg4[%c2_301, %c0_302, %c0_303] : memref<9x32x32xbf16, #tpu.memory_space<vmem>>, vector<1x32x32xbf16>
    %619 = vector.shape_cast %618 : vector<1x32x32xbf16> to vector<32x32xbf16>
    %cst_304 = arith.constant dense<0.000000e+00> : vector<48x32xf32>
    %620 = tpu.matmul %617, %619, %cst_304 {dimension_numbers = #tpu.dot_dimension_numbers<[1], [0], [0], [1], [0, 0, 1, 1], [], []>} : vector<48x32xbf16>, vector<32x32xbf16>, vector<48x32xf32> -> vector<48x32xf32>
    %621 = arith.addf %615, %620 : vector<48x32xf32>
    %c2_i32_305 = arith.constant 2 : i32
    %622 = arith.muli %c2_i32_305, %c5_i32 : i32
    %c1_i32_306 = arith.constant 1 : i32
    %623 = arith.addi %622, %c1_i32_306 : i32
    %624 = arith.index_cast %623 : i32 to index
    %c0_307 = arith.constant 0 : index
    %c0_308 = arith.constant 0 : index
    %625 = vector.load %arg11[%624, %c0_307, %c0_308] : memref<14x32x32xbf16, #tpu.memory_space<vmem>>, vector<2x32x32xbf16>
    %626 = vector.extract_strided_slice %625 {offsets = [0, 0, 0], sizes = [2, 24, 32], strides = [1, 1, 1]} : vector<2x32x32xbf16> to vector<2x24x32xbf16>
    %627 = vector.shape_cast %626 : vector<2x24x32xbf16> to vector<48x32xbf16>
    %c3_309 = arith.constant 3 : index
    %c0_310 = arith.constant 0 : index
    %c0_311 = arith.constant 0 : index
    %628 = vector.load %arg4[%c3_309, %c0_310, %c0_311] : memref<9x32x32xbf16, #tpu.memory_space<vmem>>, vector<1x32x32xbf16>
    %629 = vector.shape_cast %628 : vector<1x32x32xbf16> to vector<32x32xbf16>
    %cst_312 = arith.constant dense<0.000000e+00> : vector<48x32xf32>
    %630 = tpu.matmul %627, %629, %cst_312 {dimension_numbers = #tpu.dot_dimension_numbers<[1], [0], [0], [1], [0, 0, 1, 1], [], []>} : vector<48x32xbf16>, vector<32x32xbf16>, vector<48x32xf32> -> vector<48x32xf32>
    %631 = arith.addf %621, %630 : vector<48x32xf32>
    %632 = vector.extract_strided_slice %625 {offsets = [0, 2, 0], sizes = [2, 24, 32], strides = [1, 1, 1]} : vector<2x32x32xbf16> to vector<2x24x32xbf16>
    %633 = vector.shape_cast %632 : vector<2x24x32xbf16> to vector<48x32xbf16>
    %c4_313 = arith.constant 4 : index
    %c0_314 = arith.constant 0 : index
    %c0_315 = arith.constant 0 : index
    %634 = vector.load %arg4[%c4_313, %c0_314, %c0_315] : memref<9x32x32xbf16, #tpu.memory_space<vmem>>, vector<1x32x32xbf16>
    %635 = vector.shape_cast %634 : vector<1x32x32xbf16> to vector<32x32xbf16>
    %cst_316 = arith.constant dense<0.000000e+00> : vector<48x32xf32>
    %636 = tpu.matmul %633, %635, %cst_316 {dimension_numbers = #tpu.dot_dimension_numbers<[1], [0], [0], [1], [0, 0, 1, 1], [], []>} : vector<48x32xbf16>, vector<32x32xbf16>, vector<48x32xf32> -> vector<48x32xf32>
    %637 = arith.addf %631, %636 : vector<48x32xf32>
    %638 = vector.extract_strided_slice %625 {offsets = [0, 4, 0], sizes = [2, 24, 32], strides = [1, 1, 1]} : vector<2x32x32xbf16> to vector<2x24x32xbf16>
    %639 = vector.shape_cast %638 : vector<2x24x32xbf16> to vector<48x32xbf16>
    %c5_317 = arith.constant 5 : index
    %c0_318 = arith.constant 0 : index
    %c0_319 = arith.constant 0 : index
    %640 = vector.load %arg4[%c5_317, %c0_318, %c0_319] : memref<9x32x32xbf16, #tpu.memory_space<vmem>>, vector<1x32x32xbf16>
    %641 = vector.shape_cast %640 : vector<1x32x32xbf16> to vector<32x32xbf16>
    %cst_320 = arith.constant dense<0.000000e+00> : vector<48x32xf32>
    %642 = tpu.matmul %639, %641, %cst_320 {dimension_numbers = #tpu.dot_dimension_numbers<[1], [0], [0], [1], [0, 0, 1, 1], [], []>} : vector<48x32xbf16>, vector<32x32xbf16>, vector<48x32xf32> -> vector<48x32xf32>
    %643 = arith.addf %637, %642 : vector<48x32xf32>
    %c2_i32_321 = arith.constant 2 : i32
    %644 = arith.muli %c2_i32_321, %c5_i32 : i32
    %c2_i32_322 = arith.constant 2 : i32
    %645 = arith.addi %644, %c2_i32_322 : i32
    %646 = arith.index_cast %645 : i32 to index
    %c0_323 = arith.constant 0 : index
    %c0_324 = arith.constant 0 : index
    %647 = vector.load %arg11[%646, %c0_323, %c0_324] : memref<14x32x32xbf16, #tpu.memory_space<vmem>>, vector<2x32x32xbf16>
    %648 = vector.extract_strided_slice %647 {offsets = [0, 0, 0], sizes = [2, 24, 32], strides = [1, 1, 1]} : vector<2x32x32xbf16> to vector<2x24x32xbf16>
    %649 = vector.shape_cast %648 : vector<2x24x32xbf16> to vector<48x32xbf16>
    %c6_325 = arith.constant 6 : index
    %c0_326 = arith.constant 0 : index
    %c0_327 = arith.constant 0 : index
    %650 = vector.load %arg4[%c6_325, %c0_326, %c0_327] : memref<9x32x32xbf16, #tpu.memory_space<vmem>>, vector<1x32x32xbf16>
    %651 = vector.shape_cast %650 : vector<1x32x32xbf16> to vector<32x32xbf16>
    %cst_328 = arith.constant dense<0.000000e+00> : vector<48x32xf32>
    %652 = tpu.matmul %649, %651, %cst_328 {dimension_numbers = #tpu.dot_dimension_numbers<[1], [0], [0], [1], [0, 0, 1, 1], [], []>} : vector<48x32xbf16>, vector<32x32xbf16>, vector<48x32xf32> -> vector<48x32xf32>
    %653 = arith.addf %643, %652 : vector<48x32xf32>
    %654 = vector.extract_strided_slice %647 {offsets = [0, 2, 0], sizes = [2, 24, 32], strides = [1, 1, 1]} : vector<2x32x32xbf16> to vector<2x24x32xbf16>
    %655 = vector.shape_cast %654 : vector<2x24x32xbf16> to vector<48x32xbf16>
    %c7_329 = arith.constant 7 : index
    %c0_330 = arith.constant 0 : index
    %c0_331 = arith.constant 0 : index
    %656 = vector.load %arg4[%c7_329, %c0_330, %c0_331] : memref<9x32x32xbf16, #tpu.memory_space<vmem>>, vector<1x32x32xbf16>
    %657 = vector.shape_cast %656 : vector<1x32x32xbf16> to vector<32x32xbf16>
    %cst_332 = arith.constant dense<0.000000e+00> : vector<48x32xf32>
    %658 = tpu.matmul %655, %657, %cst_332 {dimension_numbers = #tpu.dot_dimension_numbers<[1], [0], [0], [1], [0, 0, 1, 1], [], []>} : vector<48x32xbf16>, vector<32x32xbf16>, vector<48x32xf32> -> vector<48x32xf32>
    %659 = arith.addf %653, %658 : vector<48x32xf32>
    %660 = vector.extract_strided_slice %647 {offsets = [0, 4, 0], sizes = [2, 24, 32], strides = [1, 1, 1]} : vector<2x32x32xbf16> to vector<2x24x32xbf16>
    %661 = vector.shape_cast %660 : vector<2x24x32xbf16> to vector<48x32xbf16>
    %c8_333 = arith.constant 8 : index
    %c0_334 = arith.constant 0 : index
    %c0_335 = arith.constant 0 : index
    %662 = vector.load %arg4[%c8_333, %c0_334, %c0_335] : memref<9x32x32xbf16, #tpu.memory_space<vmem>>, vector<1x32x32xbf16>
    %663 = vector.shape_cast %662 : vector<1x32x32xbf16> to vector<32x32xbf16>
    %cst_336 = arith.constant dense<0.000000e+00> : vector<48x32xf32>
    %664 = tpu.matmul %661, %663, %cst_336 {dimension_numbers = #tpu.dot_dimension_numbers<[1], [0], [0], [1], [0, 0, 1, 1], [], []>} : vector<48x32xbf16>, vector<32x32xbf16>, vector<48x32xf32> -> vector<48x32xf32>
    %665 = arith.addf %659, %664 : vector<48x32xf32>
    %666 = vector.extract_strided_slice %665 {offsets = [0, 0], sizes = [24, 32], strides = [1, 1]} : vector<48x32xf32> to vector<24x32xf32>
    %667 = vector.extract_strided_slice %665 {offsets = [24, 0], sizes = [24, 32], strides = [1, 1]} : vector<48x32xf32> to vector<24x32xf32>
    %668 = arith.maximumf %666, %667 : vector<24x32xf32>
    %669 = vector.extract_strided_slice %668 {offsets = [0, 0], sizes = [2, 32], strides = [1, 1]} : vector<24x32xf32> to vector<2x32xf32>
    %670 = vector.extract_strided_slice %668 {offsets = [2, 0], sizes = [2, 32], strides = [1, 1]} : vector<24x32xf32> to vector<2x32xf32>
    %671 = arith.maximumf %669, %670 : vector<2x32xf32>
    %672 = vector.broadcast %1 : vector<1x32xf32> to vector<2x32xf32>
    %673 = arith.addf %671, %672 : vector<2x32xf32>
    %cst_337 = arith.constant 0.000000e+00 : f32
    %674 = vector.broadcast %cst_337 : f32 to vector<2x32xf32>
    %675 = arith.maximumf %673, %674 : vector<2x32xf32>
    %676 = vector.extract_strided_slice %668 {offsets = [4, 0], sizes = [2, 32], strides = [1, 1]} : vector<24x32xf32> to vector<2x32xf32>
    %677 = vector.extract_strided_slice %668 {offsets = [6, 0], sizes = [2, 32], strides = [1, 1]} : vector<24x32xf32> to vector<2x32xf32>
    %678 = arith.maximumf %676, %677 : vector<2x32xf32>
    %679 = vector.broadcast %1 : vector<1x32xf32> to vector<2x32xf32>
    %680 = arith.addf %678, %679 : vector<2x32xf32>
    %cst_338 = arith.constant 0.000000e+00 : f32
    %681 = vector.broadcast %cst_338 : f32 to vector<2x32xf32>
    %682 = arith.maximumf %680, %681 : vector<2x32xf32>
    %683 = vector.extract_strided_slice %668 {offsets = [8, 0], sizes = [2, 32], strides = [1, 1]} : vector<24x32xf32> to vector<2x32xf32>
    %684 = vector.extract_strided_slice %668 {offsets = [10, 0], sizes = [2, 32], strides = [1, 1]} : vector<24x32xf32> to vector<2x32xf32>
    %685 = arith.maximumf %683, %684 : vector<2x32xf32>
    %686 = vector.broadcast %1 : vector<1x32xf32> to vector<2x32xf32>
    %687 = arith.addf %685, %686 : vector<2x32xf32>
    %cst_339 = arith.constant 0.000000e+00 : f32
    %688 = vector.broadcast %cst_339 : f32 to vector<2x32xf32>
    %689 = arith.maximumf %687, %688 : vector<2x32xf32>
    %690 = vector.extract_strided_slice %668 {offsets = [12, 0], sizes = [2, 32], strides = [1, 1]} : vector<24x32xf32> to vector<2x32xf32>
    %691 = vector.extract_strided_slice %668 {offsets = [14, 0], sizes = [2, 32], strides = [1, 1]} : vector<24x32xf32> to vector<2x32xf32>
    %692 = arith.maximumf %690, %691 : vector<2x32xf32>
    %693 = vector.broadcast %1 : vector<1x32xf32> to vector<2x32xf32>
    %694 = arith.addf %692, %693 : vector<2x32xf32>
    %cst_340 = arith.constant 0.000000e+00 : f32
    %695 = vector.broadcast %cst_340 : f32 to vector<2x32xf32>
    %696 = arith.maximumf %694, %695 : vector<2x32xf32>
    %697 = vector.extract_strided_slice %668 {offsets = [16, 0], sizes = [2, 32], strides = [1, 1]} : vector<24x32xf32> to vector<2x32xf32>
    %698 = vector.extract_strided_slice %668 {offsets = [18, 0], sizes = [2, 32], strides = [1, 1]} : vector<24x32xf32> to vector<2x32xf32>
    %699 = arith.maximumf %697, %698 : vector<2x32xf32>
    %700 = vector.broadcast %1 : vector<1x32xf32> to vector<2x32xf32>
    %701 = arith.addf %699, %700 : vector<2x32xf32>
    %cst_341 = arith.constant 0.000000e+00 : f32
    %702 = vector.broadcast %cst_341 : f32 to vector<2x32xf32>
    %703 = arith.maximumf %701, %702 : vector<2x32xf32>
    %704 = vector.extract_strided_slice %668 {offsets = [20, 0], sizes = [2, 32], strides = [1, 1]} : vector<24x32xf32> to vector<2x32xf32>
    %705 = vector.extract_strided_slice %668 {offsets = [22, 0], sizes = [2, 32], strides = [1, 1]} : vector<24x32xf32> to vector<2x32xf32>
    %706 = arith.maximumf %704, %705 : vector<2x32xf32>
    %707 = vector.broadcast %1 : vector<1x32xf32> to vector<2x32xf32>
    %708 = arith.addf %706, %707 : vector<2x32xf32>
    %cst_342 = arith.constant 0.000000e+00 : f32
    %709 = vector.broadcast %cst_342 : f32 to vector<2x32xf32>
    %710 = arith.maximumf %708, %709 : vector<2x32xf32>
    %711 = tpu.concatenate %675, %682, %689, %696, %703, %710 in 1 : vector<2x32xf32>, vector<2x32xf32>, vector<2x32xf32>, vector<2x32xf32>, vector<2x32xf32>, vector<2x32xf32> -> vector<2x192xf32>
    %712 = arith.truncf %711 : vector<2x192xf32> to vector<2x192xbf16>
    %713 = arith.index_cast %c5_i32 : i32 to index
    %c0_343 = arith.constant 0 : index
    %c0_344 = arith.constant 0 : index
    %714 = vector.load %arg6[%713, %c0_343, %c0_344] : memref<6x192x32xbf16, #tpu.memory_space<vmem>>, vector<1x192x32xbf16>
    %715 = vector.shape_cast %714 : vector<1x192x32xbf16> to vector<192x32xbf16>
    %cst_345 = arith.constant dense<0.000000e+00> : vector<2x32xf32>
    %716 = tpu.matmul %712, %715, %cst_345 {dimension_numbers = #tpu.dot_dimension_numbers<[1], [0], [0], [1], [0, 0, 1, 1], [], []>} : vector<2x192xbf16>, vector<192x32xbf16>, vector<2x32xf32> -> vector<2x32xf32>
    %717 = arith.addf %598, %716 : vector<2x32xf32>
    %c6_i32 = arith.constant 6 : i32
    %c0_346 = arith.constant 0 : index
    %c0_347 = arith.constant 0 : index
    %718 = vector.load %arg7[%c0_346, %c0_347] : memref<1x32xf32, #tpu.memory_space<vmem>>, vector<1x32xf32>
    %719 = vector.broadcast %718 : vector<1x32xf32> to vector<2x32xf32>
    %720 = arith.addf %717, %719 : vector<2x32xf32>
    %cst_348 = arith.constant 0.000000e+00 : f32
    %721 = vector.broadcast %cst_348 : f32 to vector<2x32xf32>
    %722 = arith.maximumf %720, %721 : vector<2x32xf32>
    %723 = arith.truncf %722 : vector<2x32xf32> to vector<2x32xbf16>
    %c0_349 = arith.constant 0 : index
    %c0_350 = arith.constant 0 : index
    %724 = vector.load %arg8[%c0_349, %c0_350] : memref<32x32xbf16, #tpu.memory_space<vmem>>, vector<32x32xbf16>
    %cst_351 = arith.constant dense<0.000000e+00> : vector<2x32xf32>
    %725 = tpu.matmul %723, %724, %cst_351 {dimension_numbers = #tpu.dot_dimension_numbers<[1], [0], [0], [1], [0, 0, 1, 1], [], []>} : vector<2x32xbf16>, vector<32x32xbf16>, vector<2x32xf32> -> vector<2x32xf32>
    %c0_352 = arith.constant 0 : index
    %c0_353 = arith.constant 0 : index
    %726 = vector.load %arg9[%c0_352, %c0_353] : memref<1x32xf32, #tpu.memory_space<vmem>>, vector<1x32xf32>
    %727 = vector.broadcast %726 : vector<1x32xf32> to vector<2x32xf32>
    %728 = arith.addf %725, %727 : vector<2x32xf32>
    %cst_354 = arith.constant 0.000000e+00 : f32
    %729 = vector.broadcast %cst_354 : f32 to vector<2x32xf32>
    %730 = arith.maximumf %728, %729 : vector<2x32xf32>
    %731 = tpu.concatenate %722, %730 in 1 : vector<2x32xf32>, vector<2x32xf32> -> vector<2x64xf32>
    %c0_355 = arith.constant 0 : index
    %c0_356 = arith.constant 0 : index
    %c0_357 = arith.constant 0 : index
    %732 = vector.load %arg10[%c0_355, %c0_356, %c0_357] : memref<1x2x64xf32, #tpu.memory_space<vmem>>, vector<1x2x64xf32>
    %733 = vector.shape_cast %732 : vector<1x2x64xf32> to vector<2x64xf32>
    %734 = vector.shape_cast %731 : vector<2x64xf32> to vector<1x2x64xf32>
    tpu.vector_store %arg10[%c0_355, %c0_356, %c0_357], %734 {strides = array<i32>} : memref<1x2x64xf32, #tpu.memory_space<vmem>>, vector<1x2x64xf32>,
    return
  }
  func.func @transform_0(%arg0: i32) -> (i32, i32, i32, i32) {
    %c0_i32 = arith.constant 0 : i32
    %c0_i32_0 = arith.constant 0 : i32
    %c0_i32_1 = arith.constant 0 : i32
    %c0_i32_2 = arith.constant 0 : i32
    return %arg0, %c0_i32, %c0_i32_0, %c0_i32_1 : i32, i32, i32, i32
  }
  func.func @transform_1(%arg0: i32) -> (i32, i32) {
    %c0_i32 = arith.constant 0 : i32
    %c0_i32_0 = arith.constant 0 : i32
    %c0_i32_1 = arith.constant 0 : i32
    return %c0_i32, %c0_i32_0 : i32, i32
  }
  func.func @transform_2(%arg0: i32) -> (i32, i32) {
    %c0_i32 = arith.constant 0 : i32
    %c0_i32_0 = arith.constant 0 : i32
    %c0_i32_1 = arith.constant 0 : i32
    return %c0_i32, %c0_i32_0 : i32, i32
  }
  func.func @transform_3(%arg0: i32) -> (i32, i32, i32) {
    %c0_i32 = arith.constant 0 : i32
    %c0_i32_0 = arith.constant 0 : i32
    %c0_i32_1 = arith.constant 0 : i32
    %c0_i32_2 = arith.constant 0 : i32
    return %c0_i32, %c0_i32_0, %c0_i32_1 : i32, i32, i32
  }
  func.func @transform_4(%arg0: i32) -> (i32, i32) {
    %c0_i32 = arith.constant 0 : i32
    %c0_i32_0 = arith.constant 0 : i32
    %c0_i32_1 = arith.constant 0 : i32
    return %c0_i32, %c0_i32_0 : i32, i32
  }
  func.func @transform_5(%arg0: i32) -> (i32, i32, i32) {
    %c0_i32 = arith.constant 0 : i32
    %c0_i32_0 = arith.constant 0 : i32
    %c0_i32_1 = arith.constant 0 : i32
    %c0_i32_2 = arith.constant 0 : i32
    return %c0_i32, %c0_i32_0, %c0_i32_1 : i32, i32, i32
  }
  func.func @transform_6(%arg0: i32) -> (i32, i32) {
    %c0_i32 = arith.constant 0 : i32
    %c0_i32_0 = arith.constant 0 : i32
    %c0_i32_1 = arith.constant 0 : i32
    return %c0_i32, %c0_i32_0 : i32, i32
  }
  func.func @transform_7(%arg0: i32) -> (i32, i32) {
    %c0_i32 = arith.constant 0 : i32
    %c0_i32_0 = arith.constant 0 : i32
    %c0_i32_1 = arith.constant 0 : i32
    return %c0_i32, %c0_i32_0 : i32, i32
  }
  func.func @transform_8(%arg0: i32) -> (i32, i32) {
    %c0_i32 = arith.constant 0 : i32
    %c0_i32_0 = arith.constant 0 : i32
    %c0_i32_1 = arith.constant 0 : i32
    return %c0_i32, %c0_i32_0 : i32, i32
  }
  func.func @transform_9(%arg0: i32) -> (i32, i32, i32) {
    %c0_i32 = arith.constant 0 : i32
    %c0_i32_0 = arith.constant 0 : i32
    %c0_i32_1 = arith.constant 0 : i32
    return %arg0, %c0_i32, %c0_i32_0 : i32, i32, i32
  }
}

</mosaic_0001>

<bundles_post_ra>
// kernel: _private_forward.1
= control target key start
LH: loop header
LB: loop body
LE: loop exit
PB: predicated region body
PF: predicated region fallthrough
CT: control target
= control target key end

     0   :  { %s9309_s13 = smov 0   ;;  %s11379_s0 = inlined_call_operand.vmem [shape: bf16[1,14,128,48], index: 0, kind: input, shape index: {}]   ;;  %s11380_s1 = inlined_call_operand.vmem [shape: bf16[48,32], index: 1, kind: input, shape index: {}]   ;;  %s11381_s2 = inlined_call_operand.vmem [shape: f32[1,32], index: 2, kind: input, shape index: {}]   ;;  %s11382_s3 = inlined_call_operand.vmem [shape: bf16[9,32,32], index: 3, kind: input, shape index: {}]   ;;  %s11383_s4 = inlined_call_operand.vmem [shape: f32[1,32], index: 4, kind: input, shape index: {}]   ;;  %s11384_s5 = inlined_call_operand.vmem [shape: bf16[6,192,32], index: 5, kind: input, shape index: {}]   ;;  %s11385_s6 = inlined_call_operand.vmem [shape: f32[1,32], index: 6, kind: input, shape index: {}]   ;;  %s11386_s7 = inlined_call_operand.vmem [shape: bf16[32,32], index: 7, kind: input, shape index: {}]   ;;  %s11387_s8 = inlined_call_operand.vmem [shape: f32[1,32], index: 8, kind: input, shape index: {}]   ;;  %s11388_s9 = inlined_call_operand.vmem [shape: f32[1,2,64], index: 9, kind: output, shape index: {}]  }
   0x1   :  { %v9302_v0 = vld [vmem:[%s11381_s2] ss:$0 sm:$0xff] }
   0x2   :  { %v9307_v1 = vld [vmem:[%s11383_s4] ss:$0 sm:$0xff] }
   0x3 LB: > { %v9009_v2 = vld [vmem:[%s11380_s1] sm:$0xff]   ;;  %v9010_v3 = vld [vmem:[%s11380_s1 + $0x8] sm:$0xff]   ;;  %s7147_s4 = sshll.u32 %s9241_s13, 6  ;;  %v9011_v4 = vld [vmem:[%s11380_s1 + $0x10] sm:$0xff]   ;;  %vm124_vm0 = vcmask 392192   ;;  %s7148_s22 = sshll.u32 %s9241_s13, 4  ;;  %s9241_s13 = sphi %s9309_s13, %s40_s13  }
   0x4   : > { %7519 = vmatprep.subr.bf16.mxu0 %v9009_v2  ;;  %8413 = vmatprep.subr.bf16.mxu1 %v9009_v2  ;;  %s43_s21 = scalar_lea.vmem %s11379_s0, %s7147_s4  ;;  %vm277_vm1 = vcmask 261120   ;;  %s276_s23 = scalar_lea.vmem [#allocation2], %s7148_s22 }
   0x5   : > { %7520 = vmatpush3.bf16.msra.mxu0 %v9009_v2  ;;  %8416 = vmatpush3.bf16.msra.mxu1 %v9009_v2  ;;  %v9012_v5 = vld [vmem:[%s43_s21] sm:$0xff]   ;;  %v9014_v7 = vld [vmem:[%s43_s21 + $0x8] sm:$0xff]   ;;  %v9016_v9 = vld [vmem:[%s43_s21 + $0x10] sm:$0xff]   ;;  %s40_s13 = sadd.s32 1, %s9241_s13  }
   0x6   : > { %7521 = vmatprep.subr.bf16.mxu0 %v9010_v3  ;;  %8414 = vmatprep.subr.bf16.mxu1 %v9010_v3  ;;  %v9013_v6 = vld [vmem:[%s43_s21 + $0x20] sm:$0xff]   ;;  %v9015_v8 = vld [vmem:[%s43_s21 + $0x28] sm:$0xff]   ;;  %v9017_v10 = vld [vmem:[%s43_s21 + $0x30] sm:$0xff]   ;;  %p37_p0 = scmp.ge.s32.totalorder %s40_s13, 14  }
   0x7   : > { %7525 = vmatprep.mubr.msk.bf16.mxu0 %vm124_vm0, %v9012_v5  ;;  %7533 = vmatprep.mubr.msk.bf16.mxu1 %vm124_vm0, %v9013_v6  ;;  %v9018_v11 = vld [vmem:[%s43_s21 + $0x18] sm:$0xff]   ;;  %v9050_v51 = vld [vmem:[%s11382_s3 + $0x10] sm:$0xff] (%p37_p0)   ;;  %v9243_v52 = vmov (%p37_p0), 0.0   ;;  %vm308_vm2 = vcmask (%p37_p0), 1042432   ;;  %vm309_vm3 = vcmask (%p37_p0), 1046532   ;;  %vm9244_vm4 = vmmov (%p37_p0), 0  }
   0x8   : > { %v9019_v12 = vld [vmem:[%s43_s21 + $0x38] sm:$0xff]   ;;  %vm9379_vm5 = vmor (%p37_p0), %vm308_vm2, %vm309_vm3  ;;  %vm505_vm6 = vcmask (%p37_p0), 1041408   ;;  %vm506_vm7 = vcmask (%p37_p0), 1045508   ;;  %s9246_s10 = smov (%p37_p0), 96   ;;  %s9247_s11 = smov (%p37_p0), 32   ;;  %vm1378_vm9 = vcmask (%p37_p0), 523264  }
   0x9   : > { %7522 = vmatpush3.bf16.msra.mxu0 %v9010_v3  ;;  %8417 = vmatpush3.bf16.msra.mxu1 %v9010_v3  ;;  %v9051_v53 = vld [vmem:[%s11382_s3 + $0x18] sm:$0xff] (%p37_p0)   ;;  %vm9543_vm8 = vmor (%p37_p0), %vm505_vm6, %vm506_vm7  ;;  %s9248_s12 = smov (%p37_p0), 64   ;;  %vm1380_vm10 = vcmask (%p37_p0), 785408   ;;  %vm6440_vm11 = vcmask (%p37_p0), 517120  }
   0xa   : > { %7523 = vmatprep.subr.bf16.mxu0 %v9011_v4  ;;  %8415 = vmatprep.subr.bf16.mxu1 %v9011_v4 }
   0xd   : > { %7524 = vmatpush3.bf16.msra.mxu0 %v9011_v4  ;;  %8418 = vmatpush3.bf16.msra.mxu1 %v9011_v4 }
   0xe   :  { %7541 = vmatprep.subr.bf16.mxu0 (%p37_p0), %v9243_v52  ;;  %7685 = vmatprep.subr.bf16.mxu1 (%p37_p0), %v9243_v52 }
  0x10   : > { %7526 = vmatmul.mubr.msk.bf16.vlgmr.msra.gmra.mrb[0].mxu0 %vm124_vm0, %v9014_v7  ;;  %7534 = vmatmul.mubr.msk.bf16.vlgmr.msra.gmra.mrb[0].mxu1 %vm124_vm0, %v9015_v8 }
  0x11   : > { %7529 = vmatprep.mubr.msk.bf16.mxu0 %vm124_vm0, %v9016_v9  ;;  %7537 = vmatprep.mubr.msk.bf16.mxu1 %vm124_vm0, %v9017_v10 }
  0x12   :  { %7542 = vmatpush3.bf16.msra.mxu0 (%p37_p0), %v9050_v51  ;;  %7686 = vmatpush3.bf16.msra.mxu1 (%p37_p0), %v9050_v51 }
  0x13   :  { %7543 = vmatprep.subr.bf16.mxu0 (%p37_p0), %v9243_v52  ;;  %7687 = vmatprep.subr.bf16.mxu1 (%p37_p0), %v9243_v52 }
  0x16   :  { %7544 = vmatpush3.bf16.msra.mxu0 (%p37_p0), %v9051_v53  ;;  %7688 = vmatpush3.bf16.msra.mxu1 (%p37_p0), %v9051_v53 }
  0x17   :  { %7701 = vmatprep.subr.bf16.mxu1 (%p37_p0), %v9243_v52  ;;  %7557 = vmatprep.subr.bf16.mxu0 (%p37_p0), %v9243_v52 }
  0x18   : > { %7530 = vmatmul.mubr.msk.bf16.gmra.mrb[4].mxu0 %vm124_vm0, %v9018_v11  ;;  %7538 = vmatmul.mubr.msk.bf16.gmra.mrb[4].mxu1 %vm124_vm0, %v9019_v12 }
  0x19   :  { %7545 = vmatprep.mubr.msk.bf16.mxu0 (%p37_p0), %vm9244_vm4, %v9243_v52  ;;  %7689 = vmatprep.mubr.msk.bf16.mxu1 (%p37_p0), %vm9244_vm4, %v9243_v52 }
  0xe3   : > { %v7527_v13 = vpop.f32.mrb[0].mxu0  ;;  %v7535_v14 = vpop.f32.mrb[0].mxu1 }
  0xe4   : > { %v183_v15 = vpop.f32.mrb[1].mxu0  ;;  %v215_v16 = vpop.f32.mrb[1].mxu1 }
  0xe5   : > { %v7528_v17 = vpop.f32.mrb[2].mxu0  ;;  %v7536_v18 = vpop.f32.mrb[2].mxu1 }
  0xe6   : > { %v186_v19 = vpop.f32.mrb[3].mxu0  ;;  %v218_v20 = vpop.f32.mrb[3].mxu1 }
  0xeb   : > { %v7531_v21 = vpop.f32.mrb[4].mxu0  ;;  %v7539_v22 = vpop.f32.mrb[4].mxu1 }
  0xec   : > { %v248_v23 = vmax.f32 %v7527_v13, %v7531_v21  ;;  %v252_v24 = vmax.f32 %v7535_v14, %v7539_v22  ;;  %v199_v25 = vpop.f32.mrb[5].mxu0  ;;  %v231_v26 = vpop.f32.mrb[5].mxu1 }
  0xed   : > { %v246_v27 = vmax.f32 %v183_v15, %v199_v25  ;;  %v250_v28 = vmax.f32 %v215_v16, %v231_v26  ;;  %v7532_v29 = vpop.f32.mrb[6].mxu0  ;;  %v7540_v30 = vpop.f32.mrb[6].mxu1 }
  0xee   : > { %v256_v31 = vmax.f32 %v248_v23, %v252_v24  ;;  %v249_v32 = vmax.f32 %v7528_v17, %v7532_v29  ;;  %v253_v33 = vmax.f32 %v7536_v18, %v7540_v30  ;;  %v202_v34 = vpop.f32.mrb[7].mxu0  ;;  %v234_v35 = vpop.f32.mrb[7].mxu1 }
  0xef   : > { %v254_v36 = vmax.f32 %v246_v27, %v250_v28  ;;  %v247_v37 = vmax.f32 %v186_v19, %v202_v34  ;;  %v251_v38 = vmax.f32 %v218_v20, %v234_v35  ;;  %v9058_v19 = vld [vmem:[%s11382_s3] sm:$0xff] (%p37_p0)  }
  0xf0   : > { %v266_v39 = vadd.f32 %v9302_v0, %v256_v31  ;;  %v257_v40 = vmax.f32 %v249_v32, %v253_v33 }
  0xf1   : > { %v264_v41 = vadd.f32 %v9302_v0, %v254_v36  ;;  %v255_v42 = vmax.f32 %v247_v37, %v251_v38 }
  0xf2   : > { %v267_v43 = vadd.f32 %v9302_v0, %v257_v40  ;;  %v270_v45 = vmax.f32 %v266_v39, 0.0  ;;  %v9065_v39 = vld [vmem:[%s11382_s3 + $0x8] sm:$0xff] (%p37_p0)  }
  0xf3   : > { %v265_v44 = vadd.f32 %v9302_v0, %v255_v42  ;;  %v268_v47 = vmax.f32 %v264_v41, 0.0  ;;  %39 = sbr.rel (!%p37_p0) target bundleno = 3 (0x3), region = 90 }
  0xf4   : > { %v271_v46 = vmax.f32 %v267_v43, 0.0 }
  0xf5   : > { %v269_v48 = vmax.f32 %v265_v44, 0.0 }
  0xf6   : > { %v273_v49 = vpack.c.bf16 %v271_v46, %v270_v45 }
  0xf7   : > { %v272_v50 = vpack.c.bf16 %v269_v48, %v268_v47 }
  0xf8   : > { %279 = vst.msk [vmem:[%s276_s23 + $0x8] sm:$0xff] %vm277_vm1, %v273_v49 }
  0xf9   : > { %278 = vst.msk [vmem:[%s276_s23] sm:$0xff] %vm277_vm1, %v272_v50 }
 0x100   :  { %v9353_v54 = vld [vmem:[#allocation2] sm:$0xff]  ;;  %v9355_v55 = vld [vmem:[#allocation2 + $0x8] sm:$0xff]  ;;  %v9400_v7 = vld [vmem:[#allocation2 + $0x10] sm:$0xff] }
 0x101   :  { %v9357_v56 = vld [vmem:[#allocation2 + $0x20] sm:$0xff]  ;;  %v9363_v57 = vcombine.low %v9353_v54, %v9353_v54  ;;  %v9367_v58 = vcombine.high %v9353_v54, %v9353_v54  ;;  %v9371_v59 = vcombine.low %v9355_v55, %v9355_v55  ;;  %v9373_v60 = vld [vmem:[#allocation2 + $0x28] sm:$0xff]  ;;  %v9415_v14 = vcombine.high %v9355_v55, %v9355_v55  ;;  %v9421_v16 = vld [vmem:[#allocation2 + $0x30] sm:$0xff] }
 0x102   :  { %v9385_v62 = vcombine.low %v9357_v56, %v9357_v56  ;;  %v9389_v63 = vcombine.high %v9357_v56, %v9357_v56  ;;  %v9393_v0 = vcombine.low %v9373_v60, %v9373_v60  ;;  %v9419_v15 = vcombine.low %v9400_v7, %v9400_v7  ;;  %v9434_v21 = vld [vmem:[#allocation2 + $0x18] sm:$0xff] }
 0x103   :  { %v6487_v2 = vrot.slane %v9363_v57, 9  ;;  %v313_v3 = vrot.slane %v9367_v58, 5  ;;  %v316_v4 = vrot.slane %v9371_v59, 5  ;;  %v9432_v20 = vcombine.high %v9400_v7, %v9400_v7  ;;  %v9468_v34 = vld [vmem:[#allocation2 + $0x38] sm:$0xff] }
 0x104   :  { %v6590_v5 = vrot.slane %v9385_v62, 9  ;;  %v1098_v6 = vrot.slane %v9389_v63, 5  ;;  %v1101_v10 = vrot.slane %v9393_v0, 5  ;;  %v319_v24 = vrot.slane %v9415_v14, 5 }
 0x105   :  { %v314_v8 = vsel %vm9379_vm5, %v6487_v2, %v313_v3  ;;  %v315_v9 = vrot.slane %v313_v3, 4  ;;  %v318_v23 = vrot.slane %v316_v4, 4  ;;  %v6488_v25 = vrot.slane %v9419_v15, 9 }
 0x106   :  { %v9409_v11 = vsel %vm9379_vm5, %v6590_v5, %v1098_v6  ;;  %v1100_v12 = vrot.slane %v1098_v6, 4  ;;  %v323_v26 = vrot.slane %v9432_v20, 5  ;;  %v9446_v27 = vcombine.high %v9373_v60, %v9373_v60 }
 0x107   :  { %v317_v13 = vsel %vm9379_vm5, %v315_v9, %v316_v4  ;;  %v9450_v28 = vcombine.low %v9421_v16, %v9421_v16  ;;  %v9454_v29 = vcombine.high %v9421_v16, %v9421_v16  ;;  %v320_v30 = vsel %vm9379_vm5, %v318_v23, %v319_v24 }
 0x108   :  { %v6493_v17 = vcombine.low %v314_v8, %v317_v13  ;;  %v9425_v18 = vsel %vm9379_vm5, %v1100_v12, %v1101_v10  ;;  %v1103_v31 = vrot.slane %v1101_v10, 4  ;;  %v9464_v32 = vcombine.low %v9434_v21, %v9434_v21 }
 0x109   :  { %v9438_v22 = vcombine.low %v9409_v11, %v9425_v18  ;;  %v6486_v33 = vcombine.high %v9434_v21, %v9434_v21  ;;  %v9474_v35 = vsel %vm9379_vm5, %v6488_v25, %v323_v26  ;;  %v1104_v36 = vrot.slane %v9446_v27, 5 }
 0x10a   :  { %7546 = vmatmul.mubr.msk.bf16.vlgmr.msra.gmra.mrb[0].mxu0 %vm277_vm1, %v6493_v17  ;;  %v6591_v37 = vrot.slane %v9450_v28, 9  ;;  %v1108_v38 = vrot.slane %v9454_v29, 5  ;;  %v6494_v40 = vcombine.low %v320_v30, %v9474_v35  ;;  %v325_v41 = vrot.slane %v323_v26, 4 }
 0x10b   :  { %7690 = vmatmul.mubr.msk.bf16.vlgmr.msra.gmra.mrb[0].mxu1 %vm277_vm1, %v9438_v22  ;;  %7549 = vmatprep.mubr.msk.bf16.mxu0 %vm9244_vm4, %v9243_v52  ;;  %v326_v42 = vrot.slane %v9464_v32, 5  ;;  %v9487_v43 = vsel %vm9379_vm5, %v1103_v31, %v1104_v36  ;;  %v9495_v45 = vcombine.low %v9468_v34, %v9468_v34  ;;  %v9499_v46 = vcombine.high %v9468_v34, %v9468_v34 }
 0x10c   :  { %7702 = vmatpush3.bf16.msra.mxu1 %v9058_v19  ;;  %7693 = vmatprep.mubr.msk.bf16.mxu1 %vm9244_vm4, %v9243_v52  ;;  %v9491_v44 = vsel %vm9379_vm5, %v6591_v37, %v1108_v38  ;;  %v329_v49 = vrot.slane %v6486_v33, 5  ;;  %v1110_v50 = vrot.slane %v1108_v38, 4  ;;  %v1216_v5 = vrot.slane %v9389_v63, 6 }
 0x10d   :  { %7703 = vmatprep.subr.bf16.mxu1 %v9243_v52  ;;  %7558 = vmatpush3.bf16.msra.mxu0 %v9058_v19  ;;  %v9504_v47 = vcombine.low %v9487_v43, %v9491_v44  ;;  %v328_v48 = vrot.slane %v326_v42, 4  ;;  %v1111_v51 = vrot.slane %v9495_v45, 5  ;;  %v1114_v53 = vrot.slane %v9499_v46, 5  ;;  %v9198_v19 = vld [vmem:[%s11384_s5 + $0x1e8] sm:$0xff]  }
 0x10e   :  { %7559 = vmatprep.subr.bf16.mxu0 %v9243_v52  ;;  %v9517_v3 = vsel %vm9379_vm5, %v325_v41, %v326_v42  ;;  %v523_v10 = vrot.slane %v9464_v32, 6  ;;  %v6604_v63 = vrot.slane %v9385_v62, 10  ;;  %v1218_v13 = vrot.slane %v1216_v5, 4 }
 0x10f   :  { %v1113_v2 = vrot.slane %v1111_v51, 4  ;;  %v9521_v4 = vsel %vm9379_vm5, %v328_v48, %v329_v49  ;;  %v9528_v6 = vsel %vm9379_vm5, %v1110_v50, %v1111_v51  ;;  %v1219_v17 = vrot.slane %v9393_v0, 6  ;;  %v9073_v49 = vld [vmem:[%s11382_s3 + $0x28] sm:$0xff]  }
 0x110   :  { %7704 = vmatpush3.bf16.msra.mxu1 %v9065_v39  ;;  %v6495_v9 = vcombine.low %v9517_v3, %v9521_v4  ;;  %v525_v23 = vrot.slane %v523_v10, 4  ;;  %v526_v24 = vrot.slane %v6486_v33, 6  ;;  %v1222_v25 = vrot.slane %v9446_v27, 6 }
 0x111   :  { %7560 = vmatpush3.bf16.msra.mxu0 %v9065_v39  ;;  %7717 = vmatprep.subr.bf16.mxu1 %v9243_v52  ;;  %v9532_v8 = vsel %vm9379_vm5, %v1113_v2, %v1114_v53  ;;  %v1221_v62 = vrot.slane %v1219_v17, 4  ;;  %v6550_v0 = vcombine.low %v9474_v35, %v9517_v3  ;;  %v6642_v26 = vcombine.low %v9491_v44, %v9528_v6  ;;  %v9794_v35 = vld [vmem:[%s11382_s3 + $0x58] sm:$0xff]  }
 0x112   :  { %7550 = vmatmul.mubr.msk.bf16.gmra.mrb[4].mxu0 %vm277_vm1, %v6494_v40  ;;  %7573 = vmatprep.subr.bf16.mxu0 %v9243_v52  ;;  %v9540_v12 = vcombine.low %v9528_v6, %v9532_v8  ;;  %v6551_v30 = vcombine.low %v9521_v4, %v9409_v11  ;;  %v9565_v31 = vsel %vm9543_vm8, %v6604_v63, %v1216_v5  ;;  %v510_v37 = vrot.slane %v9367_v58, 6  ;;  %v9070_v40 = vld [vmem:[%s11382_s3 + $0x20] sm:$0xff]  }
 0x113   :  { %7694 = vmatmul.mubr.msk.bf16.gmra.mrb[4].mxu1 %vm277_vm1, %v9504_v47  ;;  %7553 = vmatprep.mubr.msk.bf16.mxu0 %vm9244_vm4, %v9243_v52  ;;  %v9569_v33 = vsel %vm9543_vm8, %v525_v23, %v526_v24  ;;  %v6552_v27 = vcombine.low %v9425_v18, %v9487_v43  ;;  %v9578_v38 = vsel %vm9543_vm8, %v1218_v13, %v1219_v17  ;;  %v6512_v42 = vrot.slane %v9363_v57, 10  ;;  %v9842_v18 = vld [vmem:[%s11382_s3 + $0x60] sm:$0xff]  }
 0x114   :  { %7697 = vmatprep.mubr.msk.bf16.mxu1 %vm9244_vm4, %v9243_v52  ;;  %v6565_v36 = vcombine.low %v9569_v33, %v9565_v31  ;;  %v9582_v39 = vsel %vm9543_vm8, %v1221_v62, %v1222_v25  ;;  %v513_v48 = vrot.slane %v9371_v59, 6  ;;  %v512_v58 = vrot.slane %v510_v37, 4 }
 0x115   :  { %v6566_v41 = vcombine.low %v9578_v38, %v9582_v39  ;;  %v9608_v57 = vcombine.low %v9373_v60, %v9421_v16  ;;  %v516_v50 = vrot.slane %v9415_v14, 6  ;;  %v9620_v60 = vld [vmem:[#allocation2 + $0x34] sm:$0xff]  ;;  %v511_v14 = vsel %vm9543_vm8, %v6512_v42, %v510_v37 }
 0x116   :  { %v515_v59 = vrot.slane %v513_v48, 4  ;;  %v514_v51 = vsel %vm9543_vm8, %v512_v58, %v513_v48  ;;  %v6513_v53 = vrot.slane %v9419_v15, 10  ;;  %v520_v2 = vrot.slane %v9432_v20, 6 }
 0x117   :  { %v6518_v5 = vcombine.low %v511_v14, %v514_v51  ;;  %v6605_v63 = vrot.slane %v9450_v28, 10  ;;  %v1226_v13 = vrot.slane %v9454_v29, 6  ;;  %v9644_v17 = vcombine.low %v9565_v31, %v9578_v38  ;;  %v9770_v14 = vld [vmem:[%s11382_s3 + $0x50] sm:$0xff]   ;;  %v9916_v38 = vld [vmem:[%s11382_s3 + $0x78] sm:$0xff]  }
 0x118   :  { %v1229_v15 = vrot.slane %v9495_v45, 6  ;;  %v517_v20 = vsel %vm9543_vm8, %v515_v59, %v516_v50  ;;  %v9656_v28 = vsel %vm9543_vm8, %v6513_v53, %v520_v2  ;;  %v9668_v45 = vld [vmem:[%s11382_s3 + $0x38] sm:$0xff]   ;;  %v522_v23 = vrot.slane %v520_v2, 4 }
 0x119   :  { %v9663_v29 = vsel %vm9543_vm8, %v6605_v63, %v1226_v13  ;;  %v6519_v24 = vcombine.low %v517_v20, %v9656_v28  ;;  %v1228_v62 = vrot.slane %v1226_v13, 4  ;;  %v1232_v37 = vrot.slane %v9499_v46, 6  ;;  %v9858_v20 = vld [vmem:[%s11382_s3 + $0x68] sm:$0xff]  }
 0x11a   :  { %7554 = vmatmul.mubr.msk.bf16.gmra.mrb[8].mxu0 %vm277_vm1, %v6495_v9  ;;  %v9638_v9 = vld [vmem:[%s11382_s3 + $0x30] sm:$0xff]   ;;  %v1231_v25 = vrot.slane %v1229_v15, 4  ;;  %v9692_v46 = vsel %vm9543_vm8, %v522_v23, %v523_v10  ;;  %v9720_v10 = vld [vmem:[%s11382_s3 + $0x40] sm:$0xff]  }
 0x11b   :  { %7698 = vmatmul.mubr.msk.bf16.gmra.mrb[8].mxu1 %vm277_vm1, %v9540_v12  ;;  %7561 = vmatprep.mubr.msk.bf16.mxu0 %vm9244_vm4, %v9243_v52  ;;  %v9698_v42 = vsel %vm9543_vm8, %v1228_v62, %v1229_v15  ;;  %v6520_v58 = vcombine.low %v9692_v46, %v9569_v33  ;;  %v6564_v4 = vcombine.low %v9656_v28, %v9692_v46  ;;  %v9900_v33 = vld [vmem:[%s11382_s3 + $0x70] sm:$0xff]   ;;  %v9951_v46 = vld [vmem:[#allocation2 + $0x58] sm:$0xff] }
 0x11c   :  { %7705 = vmatprep.mubr.msk.bf16.mxu1 %vm9244_vm4, %v9243_v52  ;;  %v9702_v48 = vsel %vm9543_vm8, %v1231_v25, %v1232_v37 }
 0x11d   :  { %v9708_v32 = vcombine.low %v9698_v42, %v9702_v48 }
 0x122   :  { %7562 = vmatmul.mubr.msk.bf16.vlgmr.msra.gmra.mrb[0].mxu0 %vm277_vm1, %v9353_v54  ;;  %v6501_v54 = vcombine.low %v9355_v55, %v9400_v7  ;;  %v7150_v55 = vld [vmem:[#allocation2 + $0x14] sm:$0xff] }
 0x123   :  { %7706 = vmatmul.mubr.msk.bf16.vlgmr.msra.gmra.mrb[0].mxu1 %vm277_vm1, %v9357_v56  ;;  %7565 = vmatprep.mubr.msk.bf16.mxu0 %vm9244_vm4, %v9243_v52 }
 0x124   :  { %7718 = vmatpush3.bf16.msra.mxu1 %v9070_v40  ;;  %7709 = vmatprep.mubr.msk.bf16.mxu1 %vm9244_vm4, %v9243_v52 }
 0x125   :  { %7719 = vmatprep.subr.bf16.mxu1 %v9243_v52  ;;  %7574 = vmatpush3.bf16.msra.mxu0 %v9070_v40  ;;  %v9677_v40 = vcombine.low %v9582_v39, %v9663_v29  ;;  %v9937_v39 = vld [vmem:[#allocation2 + $0x54] sm:$0xff] }
 0x126   :  { %7575 = vmatprep.subr.bf16.mxu0 %v9243_v52 }
 0x128   :  { %7720 = vmatpush3.bf16.msra.mxu1 %v9073_v49 }
 0x129   :  { %7576 = vmatpush3.bf16.msra.mxu0 %v9073_v49  ;;  %7733 = vmatprep.subr.bf16.mxu1 %v9243_v52  ;;  %v9731_v49 = vld [vmem:[#allocation2 + $0x40] sm:$0xff] }
 0x12a   :  { %7566 = vmatmul.mubr.msk.bf16.gmra.mrb[4].mxu0 %vm277_vm1, %v6501_v54  ;;  %7589 = vmatprep.subr.bf16.mxu0 %v9243_v52  ;;  %v9736_v54 = vld [vmem:[%s11382_s3 + $0x48] sm:$0xff]   ;;  %v6636_v59 = vcombine.low %v9731_v49, %v9731_v49  ;;  %v6637_v50 = vcombine.high %v9731_v49, %v9731_v49 }
 0x12b   :  { %7710 = vmatmul.mubr.msk.bf16.gmra.mrb[4].mxu1 %vm277_vm1, %v9608_v57  ;;  %7569 = vmatprep.mubr.msk.bf16.mxu0 %vm9244_vm4, %v9243_v52 }
 0x12c   :  { %7713 = vmatprep.mubr.msk.bf16.mxu1 %vm9244_vm4, %v9243_v52  ;;  %v6641_v51 = vrot.slane %v6636_v59, 9  ;;  %v1698_v53 = vrot.slane %v6637_v50, 5  ;;  %v6649_v43 = vrot.slane %v6636_v59, 10 }
 0x132   :  { %7570 = vmatmul.mubr.msk.bf16.gmra.mrb[8].mxu0 %vm277_vm1, %v7150_v55  ;;  %v9765_v55 = vld [vmem:[#allocation2 + $0x48] sm:$0xff] }
 0x133   :  { %7714 = vmatmul.mubr.msk.bf16.gmra.mrb[8].mxu1 %vm277_vm1, %v9620_v60  ;;  %7577 = vmatprep.mubr.msk.bf16.mxu0 %vm9244_vm4, %v9243_v52  ;;  %v6638_v2 = vcombine.low %v9765_v55, %v9765_v55  ;;  %v6639_v44 = vcombine.high %v9765_v55, %v9765_v55 }
 0x134   :  { %7721 = vmatprep.mubr.msk.bf16.mxu1 %vm9244_vm4, %v9243_v52 }
 0x135   :  { %v1701_v3 = vrot.slane %v6638_v2, 5  ;;  %v1704_v63 = vrot.slane %v6639_v44, 5  ;;  %v1802_v28 = vrot.slane %v6638_v2, 6  ;;  %v1805_v62 = vrot.slane %v6639_v44, 6 }
 0x13a   :  { %7578 = vmatmul.mubr.msk.bf16.vlgmr.msra.gmra.mrb[0].mxu0 %vm277_vm1, %v6518_v5  ;;  %v9789_v5 = vsel %vm9379_vm5, %v6641_v51, %v1698_v53 }
 0x13b   :  { %7722 = vmatmul.mubr.msk.bf16.vlgmr.msra.gmra.mrb[0].mxu1 %vm277_vm1, %v9644_v17  ;;  %7581 = vmatprep.mubr.msk.bf16.mxu0 %vm9244_vm4, %v9243_v52  ;;  %v6643_v6 = vcombine.low %v9532_v8, %v9789_v5 }
 0x13c   :  { %7734 = vmatpush3.bf16.msra.mxu1 %v9638_v9  ;;  %7725 = vmatprep.mubr.msk.bf16.mxu1 %vm9244_vm4, %v9243_v52 }
 0x13d   :  { %7735 = vmatprep.subr.bf16.mxu1 %v9243_v52  ;;  %7590 = vmatpush3.bf16.msra.mxu0 %v9638_v9 }
 0x13e   :  { %7591 = vmatprep.subr.bf16.mxu0 %v9243_v52 }
 0x140   :  { %7736 = vmatpush3.bf16.msra.mxu1 %v9668_v45 }
 0x141   :  { %7592 = vmatpush3.bf16.msra.mxu0 %v9668_v45  ;;  %7749 = vmatprep.subr.bf16.mxu1 %v9243_v52 }
 0x142   :  { %7582 = vmatmul.mubr.msk.bf16.gmra.mrb[4].mxu0 %vm277_vm1, %v6519_v24  ;;  %7605 = vmatprep.subr.bf16.mxu0 %v9243_v52  ;;  %v1804_v24 = vrot.slane %v1802_v28, 4 }
 0x143   :  { %7726 = vmatmul.mubr.msk.bf16.gmra.mrb[4].mxu1 %vm277_vm1, %v9677_v40  ;;  %7585 = vmatprep.mubr.msk.bf16.mxu0 %vm9244_vm4, %v9243_v52 }
 0x144   :  { %7729 = vmatprep.mubr.msk.bf16.mxu1 %vm9244_vm4, %v9243_v52  ;;  %v9884_v37 = vsel %vm9543_vm8, %v1804_v24, %v1805_v62  ;;  %v9107_v24 = vld [vmem:[%s11384_s5 + $0x20] sm:$0xff]   ;;  %v9106_v62 = vld [vmem:[%s11384_s5 + $0x88] sm:$0xff]  }
 0x14a   :  { %7586 = vmatmul.mubr.msk.bf16.gmra.mrb[8].mxu0 %vm277_vm1, %v6520_v58 }
 0x14b   :  { %7730 = vmatmul.mubr.msk.bf16.gmra.mrb[8].mxu1 %vm277_vm1, %v9708_v32  ;;  %7593 = vmatprep.mubr.msk.bf16.mxu0 %vm9244_vm4, %v9243_v52 }
 0x14c   :  { %7737 = vmatprep.mubr.msk.bf16.mxu1 %vm9244_vm4, %v9243_v52 }
 0x152   :  { %7594 = vmatmul.mubr.msk.bf16.vlgmr.msra.gmra.mrb[0].mxu0 %vm277_vm1, %v9400_v7  ;;  %v6530_v7 = vcombine.low %v9434_v21, %v9357_v56  ;;  %v7212_v21 = vld [vmem:[#allocation2 + $0x24] sm:$0xff] }
 0x153   :  { %7738 = vmatmul.mubr.msk.bf16.vlgmr.msra.gmra.mrb[0].mxu1 %vm277_vm1, %v9421_v16  ;;  %7597 = vmatprep.mubr.msk.bf16.mxu0 %vm9244_vm4, %v9243_v52  ;;  %v6628_v16 = vcombine.low %v9468_v34, %v9731_v49  ;;  %v7216_v34 = vld [vmem:[#allocation2 + $0x44] sm:$0xff] }
 0x154   :  { %7750 = vmatpush3.bf16.msra.mxu1 %v9720_v10  ;;  %7741 = vmatprep.mubr.msk.bf16.mxu1 %vm9244_vm4, %v9243_v52 }
 0x155   :  { %7751 = vmatprep.subr.bf16.mxu1 %v9243_v52  ;;  %7606 = vmatpush3.bf16.msra.mxu0 %v9720_v10 }
 0x156   :  { %7607 = vmatprep.subr.bf16.mxu0 %v9243_v52 }
 0x158   :  { %7752 = vmatpush3.bf16.msra.mxu1 %v9736_v54 }
 0x159   :  { %7608 = vmatpush3.bf16.msra.mxu0 %v9736_v54  ;;  %7765 = vmatprep.subr.bf16.mxu1 %v9243_v52 }
 0x15a   :  { %7598 = vmatmul.mubr.msk.bf16.gmra.mrb[4].mxu0 %vm277_vm1, %v6530_v7  ;;  %7621 = vmatprep.subr.bf16.mxu0 %v9243_v52  ;;  %v6666_v7 = vcombine.low %v9951_v46, %v9951_v46 }
 0x15b   :  { %7742 = vmatmul.mubr.msk.bf16.gmra.mrb[4].mxu1 %vm277_vm1, %v6628_v16  ;;  %7601 = vmatprep.mubr.msk.bf16.mxu0 %vm9244_vm4, %v9243_v52 }
 0x15c   :  { %7745 = vmatprep.mubr.msk.bf16.mxu1 %vm9244_vm4, %v9243_v52 }
 0x162   :  { %7602 = vmatmul.mubr.msk.bf16.gmra.mrb[8].mxu0 %vm277_vm1, %v7212_v21  ;;  %v9980_v21 = vld [vmem:[%s11382_s3 + $0x88] sm:$0xff]  }
 0x163   :  { %7746 = vmatmul.mubr.msk.bf16.gmra.mrb[8].mxu1 %vm277_vm1, %v7216_v34  ;;  %7609 = vmatprep.mubr.msk.bf16.mxu0 %vm9244_vm4, %v9243_v52  ;;  %v2003_v34 = vrot.slane %v6666_v7, 5 }
 0x164   :  { %7753 = vmatprep.mubr.msk.bf16.mxu1 %vm9244_vm4, %v9243_v52 }
 0x16a   :  { %7610 = vmatmul.mubr.msk.bf16.vlgmr.msra.gmra.mrb[0].mxu0 %vm277_vm1, %v6550_v0  ;;  %v1700_v0 = vrot.slane %v1698_v53, 4 }
 0x16b   :  { %7754 = vmatmul.mubr.msk.bf16.vlgmr.msra.gmra.mrb[0].mxu1 %vm277_vm1, %v6642_v26  ;;  %7613 = vmatprep.mubr.msk.bf16.mxu0 %vm9244_vm4, %v9243_v52  ;;  %v1703_v26 = vrot.slane %v1701_v3, 4 }
 0x16c   :  { %7766 = vmatpush3.bf16.msra.mxu1 %v9770_v14  ;;  %7757 = vmatprep.mubr.msk.bf16.mxu1 %vm9244_vm4, %v9243_v52  ;;  %v9818_v8 = vsel %vm9379_vm5, %v1700_v0, %v1701_v3 }
 0x16d   :  { %7767 = vmatprep.subr.bf16.mxu1 %v9243_v52  ;;  %7622 = vmatpush3.bf16.msra.mxu0 %v9770_v14  ;;  %v9822_v13 = vsel %vm9379_vm5, %v1703_v26, %v1704_v63 }
 0x16e   :  { %7623 = vmatprep.subr.bf16.mxu0 %v9243_v52  ;;  %v6644_v11 = vcombine.low %v9818_v8, %v9822_v13 }
 0x170   :  { %7768 = vmatpush3.bf16.msra.mxu1 %v9794_v35 }
 0x171   :  { %7624 = vmatpush3.bf16.msra.mxu0 %v9794_v35  ;;  %7781 = vmatprep.subr.bf16.mxu1 %v9243_v52 }
 0x172   :  { %7614 = vmatmul.mubr.msk.bf16.gmra.mrb[4].mxu0 %vm277_vm1, %v6551_v30  ;;  %7637 = vmatprep.subr.bf16.mxu0 %v9243_v52  ;;  %v6650_v30 = vcombine.low %v9663_v29, %v9698_v42  ;;  %v9960_v42 = vld [vmem:[%s11382_s3 + $0x80] sm:$0xff]  }
 0x173   :  { %7758 = vmatmul.mubr.msk.bf16.gmra.mrb[4].mxu1 %vm277_vm1, %v6643_v6  ;;  %7617 = vmatprep.mubr.msk.bf16.mxu0 %vm9244_vm4, %v9243_v52  ;;  %v2104_v6 = vrot.slane %v6666_v7, 6 }
 0x174   :  { %7761 = vmatprep.mubr.msk.bf16.mxu1 %vm9244_vm4, %v9243_v52 }
 0x17a   :  { %7618 = vmatmul.mubr.msk.bf16.gmra.mrb[8].mxu0 %vm277_vm1, %v6552_v27  ;;  %v1799_v27 = vrot.slane %v6637_v50, 6 }
 0x17b   :  { %7762 = vmatmul.mubr.msk.bf16.gmra.mrb[8].mxu1 %vm277_vm1, %v6644_v11  ;;  %7625 = vmatprep.mubr.msk.bf16.mxu0 %vm9244_vm4, %v9243_v52  ;;  %v9097_v11 = vld [vmem:[%s11384_s5 + $0x60] sm:$0xff]  }
 0x17c   :  { %7769 = vmatprep.mubr.msk.bf16.mxu1 %vm9244_vm4, %v9243_v52  ;;  %v9853_v15 = vsel %vm9543_vm8, %v6649_v43, %v1799_v27  ;;  %v1801_v23 = vrot.slane %v1799_v27, 4  ;;  %v9101_v43 = vld [vmem:[%s11384_s5 + $0x8] sm:$0xff]   ;;  %v9100_v27 = vld [vmem:[%s11384_s5 + $0x70] sm:$0xff]  }
 0x17d   :  { %v6651_v29 = vcombine.low %v9702_v48, %v9853_v15 }
 0x17e   :  { %v9880_v25 = vsel %vm9543_vm8, %v1801_v23, %v1802_v28  ;;  %v9102_v28 = vld [vmem:[%s11384_s5 + $0x78] sm:$0xff]   ;;  %v9104_v23 = vld [vmem:[%s11384_s5 + $0x80] sm:$0xff]  }
 0x17f   :  { %v6652_v31 = vcombine.low %v9880_v25, %v9884_v37 }
 0x182   :  { %7626 = vmatmul.mubr.msk.bf16.vlgmr.msra.gmra.mrb[0].mxu0 %vm277_vm1, %v6564_v4  ;;  %v9099_v4 = vld [vmem:[%s11384_s5] sm:$0xff]  }
 0x183   :  { %7770 = vmatmul.mubr.msk.bf16.vlgmr.msra.gmra.mrb[0].mxu1 %vm277_vm1, %v6650_v30  ;;  %7629 = vmatprep.mubr.msk.bf16.mxu0 %vm9244_vm4, %v9243_v52  ;;  %v9245_v30 = vmov 0  }
 0x184   :  { %7782 = vmatpush3.bf16.msra.mxu1 %v9842_v18  ;;  %7773 = vmatprep.mubr.msk.bf16.mxu1 %vm9244_vm4, %v9243_v52 }
 0x185   :  { %7783 = vmatprep.subr.bf16.mxu1 %v9243_v52  ;;  %7638 = vmatpush3.bf16.msra.mxu0 %v9842_v18 }
 0x186   :  { %7639 = vmatprep.subr.bf16.mxu0 %v9243_v52 }
 0x188   :  { %7784 = vmatpush3.bf16.msra.mxu1 %v9858_v20 }
 0x189   :  { %7640 = vmatpush3.bf16.msra.mxu0 %v9858_v20  ;;  %7797 = vmatprep.subr.bf16.mxu1 %v9243_v52 }
 0x18a   :  { %7630 = vmatmul.mubr.msk.bf16.gmra.mrb[4].mxu0 %vm277_vm1, %v6565_v36  ;;  %7653 = vmatprep.subr.bf16.mxu0 %v9243_v52  ;;  %v9911_v36 = vld [vmem:[#allocation2 + $0x50] sm:$0xff] }
 0x18b   :  { %7774 = vmatmul.mubr.msk.bf16.gmra.mrb[4].mxu1 %vm277_vm1, %v6651_v29  ;;  %7633 = vmatprep.mubr.msk.bf16.mxu0 %vm9244_vm4, %v9243_v52  ;;  %v9105_v29 = vld [vmem:[%s11384_s5 + $0x18] sm:$0xff]  }
 0x18c   :  { %7777 = vmatprep.mubr.msk.bf16.mxu1 %vm9244_vm4, %v9243_v52 }
 0x192   :  { %7634 = vmatmul.mubr.msk.bf16.gmra.mrb[8].mxu0 %vm277_vm1, %v6566_v41  ;;  %v6664_v41 = vcombine.low %v9911_v36, %v9911_v36 }
 0x193   :  { %7778 = vmatmul.mubr.msk.bf16.gmra.mrb[8].mxu1 %vm277_vm1, %v6652_v31  ;;  %7641 = vmatprep.mubr.msk.bf16.mxu0 %vm9244_vm4, %v9243_v52  ;;  %v9111_v31 = vld [vmem:[%s11384_s5 + $0x30] sm:$0xff]  }
 0x194   :  { %7785 = vmatprep.mubr.msk.bf16.mxu1 %vm9244_vm4, %v9243_v52  ;;  %v6669_v48 = vrot.slane %v6664_v41, 9  ;;  %v6677_v44 = vrot.slane %v6664_v41, 10  ;;  %v9110_v41 = vld [vmem:[%s11384_s5 + $0x98] sm:$0xff]  }
 0x19a   :  { %7642 = vmatmul.mubr.msk.bf16.vlgmr.msra.gmra.mrb[0].mxu0 %vm277_vm1, %v9357_v56  ;;  %v9923_v56 = vcombine.low %v9765_v55, %v9911_v36  ;;  %v2005_v55 = vrot.slane %v2003_v34, 4 }
 0x19b   :  { %7786 = vmatmul.mubr.msk.bf16.vlgmr.msra.gmra.mrb[0].mxu1 %vm277_vm1, %v9731_v49  ;;  %7645 = vmatprep.mubr.msk.bf16.mxu0 %vm9244_vm4, %v9243_v52 }
 0x19c   :  { %7798 = vmatpush3.bf16.msra.mxu1 %v9900_v33  ;;  %7789 = vmatprep.mubr.msk.bf16.mxu1 %vm9244_vm4, %v9243_v52 }
 0x19d   :  { %7799 = vmatprep.subr.bf16.mxu1 %v9243_v52  ;;  %7654 = vmatpush3.bf16.msra.mxu0 %v9900_v33 }
 0x19e   :  { %7655 = vmatprep.subr.bf16.mxu0 %v9243_v52 }
 0x1a0   :  { %7800 = vmatpush3.bf16.msra.mxu1 %v9916_v38 }
 0x1a1   :  { %7656 = vmatpush3.bf16.msra.mxu0 %v9916_v38  ;;  %7813 = vmatprep.subr.bf16.mxu1 %v9243_v52 }
 0x1a2   :  { %7646 = vmatmul.mubr.msk.bf16.gmra.mrb[4].mxu0 %vm277_vm1, %v9608_v57  ;;  %7669 = vmatprep.subr.bf16.mxu0 %v9243_v52  ;;  %v6665_v57 = vcombine.high %v9911_v36, %v9911_v36 }
 0x1a3   :  { %7790 = vmatmul.mubr.msk.bf16.gmra.mrb[4].mxu1 %vm277_vm1, %v9923_v56  ;;  %7649 = vmatprep.mubr.msk.bf16.mxu0 %vm9244_vm4, %v9243_v52 }
 0x1a4   :  { %7793 = vmatprep.mubr.msk.bf16.mxu1 %vm9244_vm4, %v9243_v52  ;;  %v2000_v58 = vrot.slane %v6665_v57, 5  ;;  %v2101_v3 = vrot.slane %v6665_v57, 6  ;;  %v9113_v57 = vld [vmem:[%s11384_s5 + $0x38] sm:$0xff]  }
 0x1a6   :  { %v9975_v16 = vsel %vm9379_vm5, %v6669_v48, %v2000_v58  ;;  %v2002_v50 = vrot.slane %v2000_v58, 4  ;;  %v2103_v26 = vrot.slane %v2101_v3, 4  ;;  %v9112_v48 = vld [vmem:[%s11384_s5 + $0xa0] sm:$0xff]  }
 0x1a7   :  { %v9989_v59 = vcombine.low %v9822_v13, %v9975_v16 }
 0x1a8   :  { %v10003_v53 = vsel %vm9379_vm5, %v2002_v50, %v2003_v34 }
 0x1aa   :  { %7650 = vmatmul.mubr.msk.bf16.gmra.mrb[8].mxu0 %vm277_vm1, %v9620_v60  ;;  %v9955_v60 = vcombine.low %v9789_v5, %v9818_v8  ;;  %v10023_v5 = vcombine.low %v9853_v15, %v9880_v25  ;;  %v10051_v8 = vsel %vm9543_vm8, %v2103_v26, %v2104_v6  ;;  %v9103_v15 = vld [vmem:[%s11384_s5 + $0x10] sm:$0xff]   ;;  %v9109_v25 = vld [vmem:[%s11384_s5 + $0x28] sm:$0xff]  }
 0x1ab   :  { %7794 = vmatmul.mubr.msk.bf16.gmra.mrb[8].mxu1 %vm277_vm1, %v9937_v39  ;;  %7657 = vmatprep.mubr.msk.bf16.mxu0 %vm9244_vm4, %v9243_v52 }
 0x1ac   :  { %7801 = vmatprep.mubr.msk.bf16.mxu1 %vm9244_vm4, %v9243_v52 }
 0x1b2   :  { %7658 = vmatmul.mubr.msk.bf16.vlgmr.msra.gmra.mrb[0].mxu0 %vm277_vm1, %v9438_v22  ;;  %v6667_v22 = vcombine.high %v9951_v46, %v9951_v46 }
 0x1b3   :  { %7802 = vmatmul.mubr.msk.bf16.vlgmr.msra.gmra.mrb[0].mxu1 %vm277_vm1, %v9955_v60  ;;  %7661 = vmatprep.mubr.msk.bf16.mxu0 %vm9244_vm4, %v9243_v52 }
 0x1b4   :  { %7814 = vmatpush3.bf16.msra.mxu1 %v9960_v42  ;;  %7805 = vmatprep.mubr.msk.bf16.mxu1 %vm9244_vm4, %v9243_v52  ;;  %v2006_v51 = vrot.slane %v6667_v22, 5  ;;  %v2107_v63 = vrot.slane %v6667_v22, 6 }
 0x1b5   :  { %7815 = vmatprep.subr.bf16.mxu1 %v9243_v52  ;;  %7670 = vmatpush3.bf16.msra.mxu0 %v9960_v42 }
 0x1b6   :  { %7671 = vmatprep.subr.bf16.mxu0 %v9243_v52  ;;  %v10007_v2 = vsel %vm9379_vm5, %v2005_v55, %v2006_v51 }
 0x1b8   :  { %7816 = vmatpush3.bf16.msra.mxu1 %v9980_v21 }
 0x1b9   :  { %7672 = vmatpush3.bf16.msra.mxu0 %v9980_v21  ;;  %2450 = vmatprep.subr.bf16.mxu1 %v9245_v30 }
 0x1ba   :  { %7662 = vmatmul.mubr.msk.bf16.gmra.mrb[4].mxu0 %vm277_vm1, %v9504_v47  ;;  %v10011_v47 = vcombine.low %v10003_v53, %v10007_v2  ;;  %2335 = vmatprep.subr.bf16.mxu0 %v9245_v30 }
 0x1bb   :  { %7806 = vmatmul.mubr.msk.bf16.gmra.mrb[4].mxu1 %vm277_vm1, %v9989_v59  ;;  %7665 = vmatprep.mubr.msk.bf16.mxu0 %vm9244_vm4, %v9243_v52 }
 0x1bc   :  { %7809 = vmatprep.mubr.msk.bf16.mxu1 %vm9244_vm4, %v9243_v52 }
 0x1c2   :  { %7666 = vmatmul.mubr.msk.bf16.gmra.mrb[8].mxu0 %vm277_vm1, %v9540_v12  ;;  %v10035_v12 = vsel %vm9543_vm8, %v6677_v44, %v2101_v3 }
 0x1c3   :  { %7810 = vmatmul.mubr.msk.bf16.gmra.mrb[8].mxu1 %vm277_vm1, %v10011_v47  ;;  %7673 = vmatprep.mubr.msk.bf16.mxu0 %vm9244_vm4, %v9243_v52  ;;  %v10039_v0 = vcombine.low %v9884_v37, %v10035_v12  ;;  %v9108_v37 = vld [vmem:[%s11384_s5 + $0x90] sm:$0xff]  }
 0x1c4   :  { %7817 = vmatprep.mubr.msk.bf16.mxu1 %vm9244_vm4, %v9243_v52 }
 0x1ca   :  { %7674 = vmatmul.mubr.msk.bf16.vlgmr.msra.gmra.mrb[0].mxu0 %vm277_vm1, %v9644_v17  ;;  %v2106_v17 = vrot.slane %v2104_v6, 4 }
 0x1cb   :  { %7818 = vmatmul.mubr.msk.bf16.vlgmr.msra.gmra.mrb[0].mxu1 %vm277_vm1, %v10023_v5  ;;  %7677 = vmatprep.mubr.msk.bf16.mxu0 %vm9244_vm4, %v9243_v52 }
 0x1cc   :  { %7821 = vmatprep.mubr.msk.bf16.mxu1 %vm9244_vm4, %v9243_v52  ;;  %v10055_v13 = vsel %vm9543_vm8, %v2106_v17, %v2107_v63  ;;  %2336 = vmatpush1.bf16.msra.mxu0 %v9097_v11 }
 0x1cd   :  { %2451 = vmatpush1.bf16.msra.mxu1 %v9099_v4  ;;  %2337 = vmatprep.subr.bf16.mxu0 %v9245_v30 }
 0x1ce   :  { %2452 = vmatprep.subr.bf16.mxu1 %v9245_v30 }
 0x1d1   :  { %2453 = vmatpush1.bf16.msra.mxu1 %v9101_v43 }
 0x1d2   :  { %7678 = vmatmul.mubr.msk.bf16.gmra.mrb[4].mxu0 %vm277_vm1, %v9677_v40  ;;  %v10059_v40 = vcombine.low %v10051_v8, %v10055_v13  ;;  %2454 = vmatprep.subr.bf16.mxu1 %v9245_v30 }
 0x1d3   :  { %7822 = vmatmul.mubr.msk.bf16.gmra.mrb[4].mxu1 %vm277_vm1, %v10039_v0  ;;  %7681 = vmatprep.mubr.msk.bf16.mxu0 %vm9244_vm4, %v9243_v52 }
 0x1d4   :  { %7825 = vmatprep.mubr.msk.bf16.mxu1 %vm9244_vm4, %v9243_v52 }
 0x1d5   :  { %2455 = vmatpush1.bf16.msra.mxu1 %v9103_v15 }
 0x1d6   :  { %2456 = vmatprep.subr.bf16.mxu1 %v9245_v30 }
 0x1d9   :  { %2457 = vmatpush1.bf16.msra.mxu1 %v9105_v29 }
 0x1da   :  { %7682 = vmatmul.mubr.msk.bf16.gmra.mrb[8].mxu0 %vm277_vm1, %v9708_v32  ;;  %v9098_v32 = vld [vmem:[%s11384_s5 + $0x68] sm:$0xff]   ;;  %2458 = vmatprep.subr.bf16.mxu1 %v9245_v30 }
 0x1db   :  { %7826 = vmatmul.mubr.msk.bf16.gmra.mrb[8].mxu1 %vm277_vm1, %v10059_v40  ;;  %2338 = vmatpush1.bf16.msra.mxu0 %v9098_v32 }
 0x1dc   :  { %2339 = vmatprep.subr.bf16.mxu0 %v9245_v30 }
 0x1dd   :  { %2459 = vmatpush1.bf16.msra.mxu1 %v9107_v24  ;;  %v9114_v24 = vld [vmem:[%s11384_s5 + $0xa8] sm:$0xff]  }
 0x1de   :  { %2460 = vmatprep.subr.bf16.mxu1 %v9245_v30 }
 0x1df   :  { %2340 = vmatpush1.bf16.msra.mxu0 %v9100_v27 }
 0x1e0   :  { %2341 = vmatprep.subr.bf16.mxu0 %v9245_v30 }
 0x1e1   :  { %2461 = vmatpush1.bf16.msra.mxu1 %v9109_v25 }
 0x1e2   :  { %2462 = vmatprep.subr.bf16.mxu1 %v9245_v30 }
 0x1e3   :  { %2342 = vmatpush1.bf16.msra.mxu0 %v9102_v28 }
 0x1e4   :  { %2343 = vmatprep.subr.bf16.mxu0 %v9245_v30 }
 0x1e5   :  { %2463 = vmatpush1.bf16.msra.mxu1 %v9111_v31 }
 0x1e6   :  { %2464 = vmatprep.subr.bf16.mxu1 %v9245_v30 }
 0x1e7   :  { %2344 = vmatpush1.bf16.msra.mxu0 %v9104_v23 }
 0x1e8   :  { %2345 = vmatprep.subr.bf16.mxu0 %v9245_v30 }
 0x1e9   :  { %2465 = vmatpush1.bf16.msra.mxu1 %v9113_v57 }
 0x1ea   :  { %2466 = vmatprep.subr.bf16.mxu1 %v9245_v30 }
 0x1eb   :  { %2346 = vmatpush1.bf16.msra.mxu0 %v9106_v62  ;;  %v9115_v62 = vld [vmem:[%s11384_s5 + $0x40] sm:$0xff]  }
 0x1ec   :  { %2347 = vmatprep.subr.bf16.mxu0 %v9245_v30 }
 0x1ed   :  { %2467 = vmatpush1.bf16.msra.mxu1 %v9115_v62 }
 0x1ee   :  { %2468 = vmatprep.subr.bf16.mxu1 %v9245_v30 }
 0x1ef   :  { %2348 = vmatpush1.bf16.msra.mxu0 %v9108_v37 }
 0x1f0   :  { %2349 = vmatprep.subr.bf16.mxu0 %v9245_v30 }
 0x1f3   :  { %2350 = vmatpush1.bf16.msra.mxu0 %v9110_v41 }
 0x1f4   :  { %2351 = vmatprep.subr.bf16.mxu0 %v9245_v30 }
 0x1f7   :  { %2352 = vmatpush1.bf16.msra.mxu0 %v9112_v48 }
 0x1f8   :  { %2353 = vmatprep.subr.bf16.mxu0 %v9245_v30 }
 0x1fb   :  { %2354 = vmatpush1.bf16.msra.mxu0 %v9114_v24 }
 0x1fc   :  { %2355 = vmatprep.subr.bf16.mxu0 %v9245_v30 }
 0x29d   :  { %v1303_v58 = vpop.f32.mrb[0].mxu0 }
 0x29e   :  { %v2161_v7 = vpop.f32.mrb[0].mxu1  ;;  %v7675_v22 = vpop.f32.mrb[1].mxu0 }
 0x29f   :  { %v7819_v34 = vpop.f32.mrb[1].mxu1  ;;  %v1306_v50 = vpop.f32.mrb[2].mxu0 }
 0x2a0   :  { %v2164_v55 = vpop.f32.mrb[2].mxu1  ;;  %v7676_v51 = vpop.f32.mrb[3].mxu0 }
 0x2a1   :  { %v7820_v44 = vpop.f32.mrb[3].mxu1 }
 0x2a5   :  { %v1311_v3 = vpop.f32.mrb[4].mxu0 }
 0x2a6   :  { %v2169_v6 = vpop.f32.mrb[4].mxu1  ;;  %v7679_v26 = vpop.f32.mrb[5].mxu0 }
 0x2a7   :  { %v7823_v17 = vpop.f32.mrb[5].mxu1  ;;  %v1314_v63 = vpop.f32.mrb[6].mxu0 }
 0x2a8   :  { %v2172_v11 = vpop.f32.mrb[6].mxu1  ;;  %v1332_v4 = vmax.f32 %v1303_v58, %v1314_v63  ;;  %v7680_v32 = vpop.f32.mrb[7].mxu0  ;;  %v9117_v63 = vld [vmem:[%s11384_s5 + $0x48] sm:$0xff]  }
 0x2a9   :  { %v2190_v43 = vmax.f32 %v2161_v7, %v2172_v11  ;;  %v7824_v27 = vpop.f32.mrb[7].mxu1  ;;  %2469 = vmatpush1.bf16.msra.mxu1 %v9117_v63 }
 0x2aa   :  { %v1336_v15 = vrot.slane %v1332_v4, 2  ;;  %2470 = vmatprep.subr.bf16.mxu1 %v9245_v30 }
 0x2ab   :  { %v2194_v28 = vrot.slane %v2190_v43, 2 }
 0x2ac   :  { %v1338_v29 = vmax.f32 %v1332_v4, %v1336_v15 }
 0x2ad   :  { %v1319_v23 = vpop.f32.mrb[8].mxu0  ;;  %v2196_v41 = vmax.f32 %v2190_v43, %v2194_v28 }
 0x2ae   :  { %v1333_v25 = vmax.f32 %v1306_v50, %v1319_v23  ;;  %v2177_v37 = vpop.f32.mrb[8].mxu1  ;;  %v7683_v31 = vpop.f32.mrb[9].mxu0  ;;  %v10142_v7 = vadd.f32 %v9307_v1, %v1338_v29  ;;  %v9118_v29 = vld [vmem:[%s11384_s5 + $0xb8] sm:$0xff]   ;;  %v9119_v23 = vld [vmem:[%s11384_s5 + $0x50] sm:$0xff]  }
 0x2af   :  { %v2191_v57 = vmax.f32 %v2164_v55, %v2177_v37  ;;  %v7827_v48 = vpop.f32.mrb[9].mxu1  ;;  %v1322_v58 = vpop.f32.mrb[10].mxu0  ;;  %v9116_v55 = vld [vmem:[%s11384_s5 + $0xb0] sm:$0xff]   ;;  %2471 = vmatpush1.bf16.msra.mxu1 %v9119_v23 }
 0x2b0   :  { %v1348_v22 = vrot.slane %v1333_v25, 2  ;;  %v1334_v34 = vmax.f32 %v1311_v3, %v1322_v58  ;;  %v2180_v51 = vpop.f32.mrb[10].mxu1  ;;  %v7684_v44 = vpop.f32.mrb[11].mxu0  ;;  %v2197_v3 = vadd.f32 %v9307_v1, %v2196_v41  ;;  %2356 = vmatpush1.bf16.msra.mxu0 %v9116_v55  ;;  %v1346_v27 = vmax.f32 %v10142_v7, 0.0  ;;  %2472 = vmatprep.subr.bf16.mxu1 %v9245_v30  ;;  %v9120_v7 = vld [vmem:[%s11384_s5 + $0x58] sm:$0xff]  }
 0x2b1   :  { %v2200_v50 = vrot.slane %v2191_v57, 2  ;;  %v2192_v26 = vmax.f32 %v2169_v6, %v2180_v51  ;;  %v7828_v17 = vpop.f32.mrb[11].mxu1  ;;  %2357 = vmatprep.subr.bf16.mxu0 %v9245_v30 }
 0x2b2   :  { %v1354_v11 = vrot.slane %v1334_v34, 2  ;;  %v1350_v4 = vmax.f32 %v1333_v25, %v1348_v22  ;;  %v2198_v62 = vmax.f32 %v2197_v3, 0.0  ;;  %v1360_v41 = vrot.slane %v1346_v27, 4 }
 0x2b3   :  { %v2202_v32 = vmax.f32 %v2191_v57, %v2200_v50  ;;  %v2206_v43 = vrot.slane %v2192_v26, 2  ;;  %2473 = vmatpush1.bf16.msra.mxu1 %v9120_v7  ;;  %v10191_v7 = vld [vmem:[%s11382_s3 + $0x10] sm:$0xff]  }
 0x2b4   :  { %v1356_v6 = vmax.f32 %v1334_v34, %v1354_v11  ;;  %v1351_v25 = vadd.f32 %v9307_v1, %v1350_v4  ;;  %2358 = vmatpush1.bf16.msra.mxu0 %v9118_v29  ;;  %v2212_v51 = vrot.slane %v2198_v62, 4  ;;  %3416 = vmatprep.subr.bf16.mxu1 %v9245_v30 }
 0x2b5   :  { %v2203_v15 = vadd.f32 %v9307_v1, %v2202_v32  ;;  %v2208_v28 = vmax.f32 %v2192_v26, %v2206_v43  ;;  %7829 = vmatprep.subr.bf16.mxu0 %v9243_v52 }
 0x2b6   :  { %v1357_v24 = vadd.f32 %v9307_v1, %v1356_v6  ;;  %v1352_v34 = vmax.f32 %v1351_v25, 0.0 }
 0x2b7   :  { %v2209_v37 = vadd.f32 %v9307_v1, %v2208_v28  ;;  %v2204_v31 = vmax.f32 %v2203_v15, 0.0 }
 0x2b8   :  { %v1358_v57 = vmax.f32 %v1357_v24, 0.0  ;;  %v1368_v17 = vrot.slane %v1352_v34, 4 }
 0x2b9   :  { %v2210_v48 = vmax.f32 %v2209_v37, 0.0  ;;  %v2220_v58 = vrot.slane %v2204_v31, 4 }
 0x2ba   :  { %v1373_v22 = vrot.slane %v1358_v57, 4 }
 0x2bb   :  { %2221 = vrot.lane.b32.xlu1 %v2220_v58, %s9246_s10  ;;  %v2225_v44 = vrot.slane %v2210_v48, 4 }
 0x2bc   :  { %v9025_v50 = vpack.i.bf16 %v1373_v22, %v1360_v41 }
 0x2bd   :  { %v9020_v26 = vpack.i.bf16 %v2225_v44, %v2212_v51  ;;  %v10218_v51 = vld [vmem:[%s11382_s3 + $0x8] sm:$0xff]  }
 0x2bf   :  { %9021 = vrot.lane.b32.xlu0 %v9020_v26, %s9247_s11  ;;  %9026 = vrot.lane.b32.xlu1 %v9025_v50, %s9247_s11 }
 0x2c3   :  { %2217 = vrot.lane.b32.xlu0 %v2204_v31, %s9248_s12  ;;  %1369 = vrot.lane.b32.xlu1 %v1368_v17, %s9246_s10 }
 0x2c7   :  { %1365 = vrot.lane.b32.xlu0 %v1352_v34, %s9248_s12  ;;  %v10209_v34 = vld [vmem:[%s11382_s3] sm:$0xff]  }
 0x32d   :  { %v2222_v55 = vpop.permute.xlu1 %2221 }
 0x331   :  { %v9022_v63 = vpop.permute.xlu0 %9021  ;;  %v9027_v11 = vpop.permute.xlu1 %9026 }
 0x332   :  { %v9024_v3 = vunpack.i.h.bf16 %v9022_v63  ;;  %v9023_v4 = vunpack.i.l.bf16 %v9022_v63  ;;  %v9029_v32 = vunpack.i.h.bf16 %v9027_v11  ;;  %v9028_v23 = vunpack.i.l.bf16 %v9027_v11 }
 0x334   :  { %v2232_v43 = vsel %vm277_vm1, %v2210_v48, %v9024_v3  ;;  %v2229_v6 = vsel %vm277_vm1, %v2198_v62, %v9023_v4  ;;  %v1382_v15 = vsel %vm277_vm1, %v1358_v57, %v9029_v32  ;;  %v1377_v48 = vsel %vm277_vm1, %v1346_v27, %v9028_v23  ;;  %v10200_v27 = vld [vmem:[%s11382_s3 + $0x18] sm:$0xff]  }
 0x335   :  { %v2234_v28 = vpack.c.bf16 %v2232_v43, %v2232_v43  ;;  %v1384_v29 = vpack.c.bf16 %v1382_v15, %v1382_v15  ;;  %v2218_v24 = vpop.permute.xlu0 %2217  ;;  %v1370_v41 = vpop.permute.xlu1 %1369 }
 0x336   :  { %v2230_v25 = vsel %vm1378_vm9, %v2229_v6, %v2218_v24 }
 0x337   :  { %v2231_v37 = vsel %vm1380_vm10, %v2230_v25, %v2222_v55  ;;  %6720 = vmatprep.mubr.msk.bf16.mxu0 %vm1378_vm9, %v2234_v28  ;;  %6733 = vmatprep.mubr.msk.bf16.mxu1 %vm1378_vm9, %v1384_v29 }
 0x338   :  { %v2233_v31 = vpack.c.bf16 %v2231_v37, %v2231_v37 }
 0x339   :  { %v1366_v62 = vpop.permute.xlu0 %1365 }
 0x33a   :  { %v1379_v57 = vsel %vm1378_vm9, %v1377_v48, %v1366_v62  ;;  %2368 = vmatmul.mubr.bf16.vlgmr.msra.gmra.mrb[12].mxu0 %v2233_v31 }
 0x33b   :  { %v1381_v58 = vsel %vm1380_vm10, %v1379_v57, %v1370_v41  ;;  %7830 = vmatpush3.bf16.msra.mxu0 %v10191_v7  ;;  %7833 = vmatprep.mubr.msk.bf16.mxu0 %vm9244_vm4, %v9243_v52 }
 0x33c   :  { %v1383_v22 = vpack.c.bf16 %v1381_v58, %v1381_v58  ;;  %7831 = vmatprep.subr.bf16.mxu0 %v9243_v52 }
 0x33e   :  { %2483 = vmatmul.mubr.bf16.vlgmr.msra.gmra.mrb[12].mxu1 %v1383_v22 }
 0x33f   :  { %7832 = vmatpush3.bf16.msra.mxu0 %v10200_v27 }
 0x340   :  { %7845 = vmatprep.subr.bf16.mxu0 %v9243_v52 }
 0x342   :  { %7834 = vmatmul.mubr.msk.bf16.vlgmr.msra.gmra.mrb[16].mxu0 %vm277_vm1, %v9955_v60  ;;  %v10235_v60 = vld [vmem:[%s11382_s3 + $0x20] sm:$0xff]  }
 0x343   :  { %7846 = vmatpush3.bf16.msra.mxu0 %v10209_v34  ;;  %7837 = vmatprep.mubr.msk.bf16.mxu0 %vm9244_vm4, %v9243_v52 }
 0x344   :  { %7847 = vmatprep.subr.bf16.mxu0 %v9243_v52 }
 0x347   :  { %7848 = vmatpush3.bf16.msra.mxu0 %v10218_v51 }
 0x348   :  { %7861 = vmatprep.subr.bf16.mxu0 %v9243_v52 }
 0x34a   :  { %7838 = vmatmul.mubr.msk.bf16.gmra.mrb[20].mxu0 %vm277_vm1, %v9989_v59  ;;  %v10244_v59 = vld [vmem:[%s11382_s3 + $0x28] sm:$0xff]  }
 0x34b   :  { %7841 = vmatprep.mubr.msk.bf16.mxu0 %vm9244_vm4, %v9243_v52 }
 0x352   :  { %7842 = vmatmul.mubr.msk.bf16.gmra.mrb[24].mxu0 %vm277_vm1, %v10011_v47 }
 0x353   :  { %7849 = vmatprep.mubr.msk.bf16.mxu0 %vm9244_vm4, %v9243_v52 }
 0x35a   :  { %7850 = vmatmul.mubr.msk.bf16.vlgmr.msra.gmra.mrb[16].mxu0 %vm277_vm1, %v9731_v49 }
 0x35b   :  { %7862 = vmatpush3.bf16.msra.mxu0 %v10235_v60  ;;  %7853 = vmatprep.mubr.msk.bf16.mxu0 %vm9244_vm4, %v9243_v52 }
 0x35c   :  { %7863 = vmatprep.subr.bf16.mxu0 %v9243_v52 }
 0x35f   :  { %7864 = vmatpush3.bf16.msra.mxu0 %v10244_v59 }
 0x360   :  { %7877 = vmatprep.subr.bf16.mxu0 %v9243_v52 }
 0x362   :  { %7854 = vmatmul.mubr.msk.bf16.gmra.mrb[20].mxu0 %vm277_vm1, %v9923_v56  ;;  %v6757_v56 = vcombine.low %v9975_v16, %v10003_v53 }
 0x363   :  { %7857 = vmatprep.mubr.msk.bf16.mxu0 %vm9244_vm4, %v9243_v52 }
 0x36a   :  { %7858 = vmatmul.mubr.msk.bf16.gmra.mrb[24].mxu0 %vm277_vm1, %v9937_v39 }
 0x36b   :  { %7865 = vmatprep.mubr.msk.bf16.mxu0 %vm9244_vm4, %v9243_v52 }
 0x372   :  { %7866 = vmatmul.mubr.msk.bf16.vlgmr.msra.gmra.mrb[16].mxu0 %vm277_vm1, %v10023_v5 }
 0x373   :  { %7878 = vmatpush3.bf16.msra.mxu0 %v9638_v9  ;;  %7869 = vmatprep.mubr.msk.bf16.mxu0 %vm9244_vm4, %v9243_v52  ;;  %v10277_v9 = vld [vmem:[#allocation2 + $0x60] sm:$0xff] }
 0x374   :  { %7879 = vmatprep.subr.bf16.mxu0 %v9243_v52  ;;  %v6751_v49 = vcombine.low %v10277_v9, %v10277_v9 }
 0x376   :  { %v6756_v39 = vrot.slane %v6751_v49, 9 }
 0x377   :  { %7880 = vmatpush3.bf16.msra.mxu0 %v9668_v45  ;;  %v6743_v45 = vcombine.low %v9951_v46, %v10277_v9 }
 0x378   :  { %7893 = vmatprep.subr.bf16.mxu0 %v9243_v52 }
 0x37a   :  { %7870 = vmatmul.mubr.msk.bf16.gmra.mrb[20].mxu0 %vm277_vm1, %v10039_v0 }
 0x37b   :  { %7873 = vmatprep.mubr.msk.bf16.mxu0 %vm9244_vm4, %v9243_v52 }
 0x382   :  { %7874 = vmatmul.mubr.msk.bf16.gmra.mrb[24].mxu0 %vm277_vm1, %v10059_v40 }
 0x383   :  { %7881 = vmatprep.mubr.msk.bf16.mxu0 %vm9244_vm4, %v9243_v52 }
 0x38a   :  { %7882 = vmatmul.mubr.msk.bf16.vlgmr.msra.gmra.mrb[16].mxu0 %vm277_vm1, %v9911_v36  ;;  %v6752_v36 = vcombine.high %v10277_v9, %v10277_v9 }
 0x38b   :  { %7894 = vmatpush3.bf16.msra.mxu0 %v9720_v10  ;;  %7885 = vmatprep.mubr.msk.bf16.mxu0 %vm9244_vm4, %v9243_v52  ;;  %v7220_v10 = vld [vmem:[#allocation2 + $0x64] sm:$0xff] }
 0x38c   :  { %7895 = vmatprep.subr.bf16.mxu0 %v9243_v52  ;;  %v2779_v46 = vrot.slane %v6752_v36, 5  ;;  %v2880_v55 = vrot.slane %v6752_v36, 6 }
 0x38e   :  { %v2780_v5 = vsel %vm9379_vm5, %v6756_v39, %v2779_v46  ;;  %v2781_v16 = vrot.slane %v2779_v46, 4 }
 0x38f   :  { %7896 = vmatpush3.bf16.msra.mxu0 %v9736_v54  ;;  %v2671_v54 = vld [vmem:[#allocation2 + $0x68] sm:$0xff]  ;;  %v6758_v44 = vcombine.low %v10007_v2, %v2780_v5  ;;  %v6764_v2 = vrot.slane %v6751_v49, 10 }
 0x390   :  { %7909 = vmatprep.subr.bf16.mxu0 %v9243_v52  ;;  %v6753_v47 = vcombine.low %v2671_v54, %v2671_v54  ;;  %v6754_v0 = vcombine.high %v2671_v54, %v2671_v54 }
 0x391   :  { %v2881_v63 = vsel %vm9543_vm8, %v6764_v2, %v2880_v55  ;;  %v9131_v2 = vld [vmem:[%s11384_s5 + $0xc0] sm:$0xff]  }
 0x392   :  { %7886 = vmatmul.mubr.msk.bf16.gmra.mrb[20].mxu0 %vm277_vm1, %v6743_v45  ;;  %v2782_v40 = vrot.slane %v6753_v47, 5  ;;  %v2785_v50 = vrot.slane %v6754_v0, 5  ;;  %v2883_v11 = vrot.slane %v6753_v47, 6  ;;  %v6766_v3 = vcombine.low %v10055_v13, %v2881_v63  ;;  %3417 = vmatpush1.bf16.msra.mxu1 %v9131_v2 }
 0x393   :  { %7889 = vmatprep.mubr.msk.bf16.mxu0 %vm9244_vm4, %v9243_v52  ;;  %v2886_v4 = vrot.slane %v6754_v0, 6  ;;  %3418 = vmatprep.subr.bf16.mxu1 %v9245_v30 }
 0x394   :  { %v2784_v53 = vrot.slane %v2782_v40, 4 }
 0x396   :  { %v2786_v26 = vsel %vm9379_vm5, %v2784_v53, %v2785_v50 }
 0x39a   :  { %7890 = vmatmul.mubr.msk.bf16.gmra.mrb[24].mxu0 %vm277_vm1, %v7220_v10 }
 0x39b   :  { %7897 = vmatprep.mubr.msk.bf16.mxu0 %vm9244_vm4, %v9243_v52 }
 0x3a2   :  { %7898 = vmatmul.mubr.msk.bf16.vlgmr.msra.gmra.mrb[16].mxu0 %vm277_vm1, %v6757_v56 }
 0x3a3   :  { %7910 = vmatpush3.bf16.msra.mxu0 %v9770_v14  ;;  %7901 = vmatprep.mubr.msk.bf16.mxu0 %vm9244_vm4, %v9243_v52  ;;  %v2783_v14 = vsel %vm9379_vm5, %v2781_v16, %v2782_v40 }
 0x3a4   :  { %7911 = vmatprep.subr.bf16.mxu0 %v9243_v52  ;;  %v6759_v17 = vcombine.low %v2783_v14, %v2786_v26  ;;  %v10367_v28 = vcombine.low %v2780_v5, %v2783_v14 }
 0x3a7   :  { %7912 = vmatpush3.bf16.msra.mxu0 %v9794_v35  ;;  %v6765_v35 = vcombine.low %v10035_v12, %v10051_v8  ;;  %v2882_v12 = vrot.slane %v2880_v55, 4  ;;  %v2885_v8 = vrot.slane %v2883_v11, 4  ;;  %v9132_v55 = vld [vmem:[%s11384_s5 + $0xc8] sm:$0xff]  }
 0x3a8   :  { %7925 = vmatprep.subr.bf16.mxu0 %v9243_v52  ;;  %3419 = vmatpush1.bf16.msra.mxu1 %v9132_v55 }
 0x3a9   :  { %v2887_v32 = vsel %vm9543_vm8, %v2885_v8, %v2886_v4  ;;  %3420 = vmatprep.subr.bf16.mxu1 %v9245_v30  ;;  %v9137_v8 = vld [vmem:[%s11384_s5 + $0xf0] sm:$0xff]   ;;  %v9138_v4 = vld [vmem:[%s11384_s5 + $0xf8] sm:$0xff]  }
 0x3aa   :  { %7902 = vmatmul.mubr.msk.bf16.gmra.mrb[20].mxu0 %vm277_vm1, %v6758_v44 }
 0x3ab   :  { %7905 = vmatprep.mubr.msk.bf16.mxu0 %vm9244_vm4, %v9243_v52 }
 0x3b2   :  { %7906 = vmatmul.mubr.msk.bf16.gmra.mrb[24].mxu0 %vm277_vm1, %v6759_v17 }
 0x3b3   :  { %7913 = vmatprep.mubr.msk.bf16.mxu0 %vm9244_vm4, %v9243_v52 }
 0x3ba   :  { %7914 = vmatmul.mubr.msk.bf16.vlgmr.msra.gmra.mrb[16].mxu0 %vm277_vm1, %v6765_v35 }
 0x3bb   :  { %7926 = vmatpush3.bf16.msra.mxu0 %v9842_v18  ;;  %7917 = vmatprep.mubr.msk.bf16.mxu0 %vm9244_vm4, %v9243_v52  ;;  %v2884_v18 = vsel %vm9543_vm8, %v2882_v12, %v2883_v11  ;;  %v9134_v11 = vld [vmem:[%s11384_s5 + $0xd8] sm:$0xff]   ;;  %v9136_v12 = vld [vmem:[%s11384_s5 + $0xe8] sm:$0xff]  }
 0x3bc   :  { %7927 = vmatprep.subr.bf16.mxu0 %v9243_v52  ;;  %v6767_v43 = vcombine.low %v2884_v18, %v2887_v32  ;;  %v10408_v22 = vcombine.low %v2881_v63, %v2884_v18  ;;  %v9133_v63 = vld [vmem:[%s11384_s5 + $0xd0] sm:$0xff]   ;;  %v9139_v18 = vld [vmem:[%s11384_s5 + $0x100] sm:$0xff]  }
 0x3bd   :  { %3421 = vmatpush1.bf16.msra.mxu1 %v9133_v63 }
 0x3be   :  { %3422 = vmatprep.subr.bf16.mxu1 %v9245_v30 }
 0x3bf   :  { %7928 = vmatpush3.bf16.msra.mxu0 %v9858_v20  ;;  %v10343_v20 = vld [vmem:[#allocation2 + $0x70] sm:$0xff] }
 0x3c0   :  { %7941 = vmatprep.subr.bf16.mxu0 %v9243_v52  ;;  %v10347_v13 = vcombine.low %v2671_v54, %v10343_v20  ;;  %v6779_v6 = vcombine.low %v10343_v20, %v10343_v20  ;;  %v6780_v15 = vcombine.high %v10343_v20, %v10343_v20 }
 0x3c1   :  { %3423 = vmatpush1.bf16.msra.mxu1 %v9134_v11 }
 0x3c2   :  { %7918 = vmatmul.mubr.msk.bf16.gmra.mrb[20].mxu0 %vm277_vm1, %v6766_v3  ;;  %v6784_v29 = vrot.slane %v6779_v6, 9  ;;  %v3081_v23 = vrot.slane %v6780_v15, 5  ;;  %v6792_v45 = vrot.slane %v6779_v6, 10  ;;  %v3182_v10 = vrot.slane %v6780_v15, 6  ;;  %v9135_v3 = vld [vmem:[%s11384_s5 + $0xe0] sm:$0xff]   ;;  %3424 = vmatprep.subr.bf16.mxu1 %v9245_v30 }
 0x3c3   :  { %7921 = vmatprep.mubr.msk.bf16.mxu0 %vm9244_vm4, %v9243_v52 }
 0x3c4   :  { %v10378_v25 = vsel %vm9379_vm5, %v6784_v29, %v3081_v23  ;;  %v3083_v48 = vrot.slane %v3081_v23, 4  ;;  %v10416_v49 = vsel %vm9543_vm8, %v6792_v45, %v3182_v10  ;;  %v3184_v56 = vrot.slane %v3182_v10, 4 }
 0x3c5   :  { %v10384_v41 = vcombine.low %v2786_v26, %v10378_v25  ;;  %v10419_v54 = vcombine.low %v2887_v32, %v10416_v49  ;;  %3425 = vmatpush1.bf16.msra.mxu1 %v9135_v3 }
 0x3c6   :  { %3426 = vmatprep.subr.bf16.mxu1 %v9245_v30 }
 0x3c9   :  { %3427 = vmatpush1.bf16.msra.mxu1 %v9136_v12 }
 0x3ca   :  { %7922 = vmatmul.mubr.msk.bf16.gmra.mrb[24].mxu0 %vm277_vm1, %v6767_v43  ;;  %3428 = vmatprep.subr.bf16.mxu1 %v9245_v30 }
 0x3cb   :  { %7929 = vmatprep.mubr.msk.bf16.mxu0 %vm9244_vm4, %v9243_v52 }
 0x3cd   :  { %3429 = vmatpush1.bf16.msra.mxu1 %v9137_v8 }
 0x3ce   :  { %3430 = vmatprep.subr.bf16.mxu1 %v9245_v30 }
 0x3d1   :  { %3431 = vmatpush1.bf16.msra.mxu1 %v9138_v4 }
 0x3d2   :  { %7930 = vmatmul.mubr.msk.bf16.vlgmr.msra.gmra.mrb[16].mxu0 %vm277_vm1, %v10277_v9  ;;  %3432 = vmatprep.subr.bf16.mxu1 %v9245_v30 }
 0x3d3   :  { %7942 = vmatpush3.bf16.msra.mxu0 %v9900_v33  ;;  %7933 = vmatprep.mubr.msk.bf16.mxu0 %vm9244_vm4, %v9243_v52  ;;  %v10355_v33 = vld [vmem:[#allocation2 + $0x74] sm:$0xff] }
 0x3d4   :  { %7943 = vmatprep.subr.bf16.mxu0 %v9243_v52 }
 0x3d5   :  { %3433 = vmatpush1.bf16.msra.mxu1 %v9139_v18 }
 0x3d6   :  { %3434 = vmatprep.subr.bf16.mxu1 %v9245_v30 }
 0x3d7   :  { %7944 = vmatpush3.bf16.msra.mxu0 %v9916_v38  ;;  %v10365_v38 = vld [vmem:[#allocation2 + $0x78] sm:$0xff] }
 0x3d8   :  { %7957 = vmatprep.subr.bf16.mxu0 %v9243_v52  ;;  %v6781_v24 = vcombine.low %v10365_v38, %v10365_v38  ;;  %v6782_v37 = vcombine.high %v10365_v38, %v10365_v38 }
 0x3da   :  { %7934 = vmatmul.mubr.msk.bf16.gmra.mrb[20].mxu0 %vm277_vm1, %v10347_v13  ;;  %v3084_v31 = vrot.slane %v6781_v24, 5  ;;  %v3087_v62 = vrot.slane %v6782_v37, 5  ;;  %v3185_v36 = vrot.slane %v6781_v24, 6  ;;  %v3188_v46 = vrot.slane %v6782_v37, 6 }
 0x3db   :  { %7937 = vmatprep.mubr.msk.bf16.mxu0 %vm9244_vm4, %v9243_v52 }
 0x3dc   :  { %v10394_v57 = vsel %vm9379_vm5, %v3083_v48, %v3084_v31  ;;  %v3187_v39 = vrot.slane %v3185_v36, 4  ;;  %v10427_v47 = vsel %vm9543_vm8, %v3184_v56, %v3185_v36 }
 0x3de   :  { %v10431_v5 = vsel %vm9543_vm8, %v3187_v39, %v3188_v46  ;;  %v9141_v39 = vld [vmem:[%s11384_s5 + $0x110] sm:$0xff]  }
 0x3df   :  { %v10435_v44 = vcombine.low %v10427_v47, %v10431_v5 }
 0x3e2   :  { %7938 = vmatmul.mubr.msk.bf16.gmra.mrb[24].mxu0 %vm277_vm1, %v10355_v33 }
 0x3e3   :  { %7945 = vmatprep.mubr.msk.bf16.mxu0 %vm9244_vm4, %v9243_v52 }
 0x3ea   :  { %7946 = vmatmul.mubr.msk.bf16.vlgmr.msra.gmra.mrb[16].mxu0 %vm277_vm1, %v10367_v28 }
 0x3eb   :  { %7958 = vmatpush3.bf16.msra.mxu0 %v9960_v42  ;;  %7949 = vmatprep.mubr.msk.bf16.mxu0 %vm9244_vm4, %v9243_v52  ;;  %v3086_v42 = vrot.slane %v3084_v31, 4 }
 0x3ec   :  { %7959 = vmatprep.subr.bf16.mxu0 %v9243_v52 }
 0x3ed   :  { %v10398_v58 = vsel %vm9379_vm5, %v3086_v42, %v3087_v62  ;;  %v9140_v42 = vld [vmem:[%s11384_s5 + $0x108] sm:$0xff]  }
 0x3ee   :  { %3435 = vmatpush1.bf16.msra.mxu1 %v9140_v42 }
 0x3ef   :  { %7960 = vmatpush3.bf16.msra.mxu0 %v9980_v21  ;;  %v10402_v21 = vcombine.low %v10394_v57, %v10398_v58  ;;  %3436 = vmatprep.subr.bf16.mxu1 %v9245_v30 }
 0x3f0   :  { %4383 = vmatprep.subr.bf16.mxu0 %v9245_v30 }
 0x3f2   :  { %7950 = vmatmul.mubr.msk.bf16.gmra.mrb[20].mxu0 %vm277_vm1, %v10384_v41  ;;  %3437 = vmatpush1.bf16.msra.mxu1 %v9141_v39  ;;  %v10614_v39 = vld [vmem:[%s11382_s3 + $0x58] sm:$0xff]  }
 0x3f3   :  { %7953 = vmatprep.mubr.msk.bf16.mxu0 %vm9244_vm4, %v9243_v52  ;;  %3438 = vmatprep.subr.bf16.mxu1 %v9245_v30 }
 0x3fa   :  { %7954 = vmatmul.mubr.msk.bf16.gmra.mrb[24].mxu0 %vm277_vm1, %v10402_v21 }
 0x3fb   :  { %7961 = vmatprep.mubr.msk.bf16.mxu0 %vm9244_vm4, %v9243_v52 }
 0x402   :  { %7962 = vmatmul.mubr.msk.bf16.vlgmr.msra.gmra.mrb[16].mxu0 %vm277_vm1, %v10408_v22 }
 0x403   :  { %7965 = vmatprep.mubr.msk.bf16.mxu0 %vm9244_vm4, %v9243_v52 }
 0x40a   :  { %7966 = vmatmul.mubr.msk.bf16.gmra.mrb[20].mxu0 %vm277_vm1, %v10419_v54 }
 0x40b   :  { %7969 = vmatprep.mubr.msk.bf16.mxu0 %vm9244_vm4, %v9243_v52 }
 0x40d   :  { %v2369_v0 = vpop.f32.mrb[12].mxu0 }
 0x40e   :  { %v2371_v40 = vpop.f32.mrb[13].mxu0 }
 0x40f   :  { %v2372_v16 = vpop.f32.mrb[14].mxu0 }
 0x410   :  { %v2373_v53 = vpop.f32.mrb[15].mxu0 }
 0x411   :  { %v2484_v50 = vpop.f32.mrb[12].mxu1 }
 0x412   :  { %v10437_v14 = vadd.f32 %v2484_v50, %v2369_v0  ;;  %v2486_v26 = vpop.f32.mrb[13].mxu1  ;;  %7970 = vmatmul.mubr.msk.bf16.gmra.mrb[24].mxu0 %vm277_vm1, %v10435_v44 }
 0x413   :  { %v2487_v17 = vpop.f32.mrb[14].mxu1  ;;  %v9142_v26 = vld [vmem:[%s11384_s5 + $0x118] sm:$0xff]  }
 0x414   :  { %v2488_v35 = vpop.f32.mrb[15].mxu1  ;;  %3439 = vmatpush1.bf16.msra.mxu1 %v9142_v26 }
 0x415   :  { %7973 = vmatprep.subr.bf16.mxu1 %v9243_v52 }
 0x4d5   :  { %v3242_v32 = vpop.f32.mrb[16].mxu0 }
 0x4d6   :  { %v7963_v43 = vpop.f32.mrb[17].mxu0 }
 0x4d7   :  { %v3245_v6 = vpop.f32.mrb[18].mxu0 }
 0x4d8   :  { %v7964_v15 = vpop.f32.mrb[19].mxu0 }
 0x4dd   :  { %v3250_v29 = vpop.f32.mrb[20].mxu0 }
 0x4de   :  { %v7967_v23 = vpop.f32.mrb[21].mxu0 }
 0x4df   :  { %v3253_v24 = vpop.f32.mrb[22].mxu0 }
 0x4e0   :  { %v3271_v37 = vmax.f32 %v3242_v32, %v3253_v24  ;;  %v7968_v31 = vpop.f32.mrb[23].mxu0 }
 0x4e2   :  { %v3275_v48 = vrot.slane %v3271_v37, 2 }
 0x4e4   :  { %v3277_v45 = vmax.f32 %v3271_v37, %v3275_v48 }
 0x4e5   :  { %v3258_v62 = vpop.f32.mrb[24].mxu0 }
 0x4e6   :  { %v3272_v10 = vmax.f32 %v3245_v6, %v3258_v62  ;;  %v7971_v36 = vpop.f32.mrb[25].mxu0  ;;  %v3278_v16 = vadd.f32 %v9307_v1, %v3277_v45 }
 0x4e7   :  { %v3261_v56 = vpop.f32.mrb[26].mxu0 }
 0x4e8   :  { %v3281_v46 = vrot.slane %v3272_v10, 2  ;;  %v3273_v0 = vmax.f32 %v3250_v29, %v3261_v56  ;;  %v7972_v40 = vpop.f32.mrb[27].mxu0  ;;  %v3279_v2 = vmax.f32 %v3278_v16, 0.0 }
 0x4ea   :  { %v3283_v53 = vmax.f32 %v3272_v10, %v3281_v46  ;;  %v3287_v50 = vrot.slane %v3273_v0, 2  ;;  %v3293_v3 = vrot.slane %v3279_v2, 4  ;;  %v10602_v10 = vld [vmem:[%s11382_s3 + $0x50] sm:$0xff]  }
 0x4ec   :  { %v3284_v17 = vadd.f32 %v9307_v1, %v3283_v53  ;;  %v3289_v35 = vmax.f32 %v3273_v0, %v3287_v50  ;;  %v6867_v50 = vcombine.low %v10416_v49, %v10427_v47  ;;  %v10646_v47 = vld [vmem:[%s11382_s3 + $0x68] sm:$0xff]  }
 0x4ee   :  { %v3285_v55 = vmax.f32 %v3284_v17, 0.0  ;;  %v3290_v63 = vadd.f32 %v9307_v1, %v3289_v35  ;;  %v10634_v35 = vld [vmem:[%s11382_s3 + $0x60] sm:$0xff]  }
 0x4f0   :  { %v3291_v11 = vmax.f32 %v3290_v63, 0.0  ;;  %3298 = vrot.lane.b32.xlu1 %v3285_v55, %s9248_s12  ;;  %v3301_v4 = vrot.slane %v3285_v55, 4 }
 0x4f2   :  { %v3306_v12 = vrot.slane %v3291_v11, 4 }
 0x4f4   :  { %v9030_v8 = vpack.i.bf16 %v3306_v12, %v3293_v3 }
 0x4f6   :  { %9031 = vrot.lane.b32.xlu0 %v9030_v8, %s9247_s11 }
 0x4fa   :  { %3302 = vrot.lane.b32.xlu0 %v3301_v4, %s9246_s10  ;;  %v10665_v4 = vld [vmem:[%s11382_s3 + $0x70] sm:$0xff]  }
 0x562   :  { %v3299_v6 = vpop.permute.xlu1 %3298 }
 0x568   :  { %v9032_v18 = vpop.permute.xlu0 %9031 }
 0x569   :  { %v9034_v32 = vunpack.i.h.bf16 %v9032_v18  ;;  %v9033_v43 = vunpack.i.l.bf16 %v9032_v18  ;;  %v10670_v18 = vld [vmem:[#allocation2 + $0x90] sm:$0xff] }
 0x56b   :  { %v3313_v15 = vsel %vm277_vm1, %v3291_v11, %v9034_v32  ;;  %v3310_v29 = vsel %vm277_vm1, %v3279_v2, %v9033_v43  ;;  %v10679_v43 = vld [vmem:[%s11382_s3 + $0x78] sm:$0xff]  }
 0x56c   :  { %v3315_v23 = vpack.c.bf16 %v3313_v15, %v3313_v15  ;;  %v3303_v24 = vpop.permute.xlu0 %3302  ;;  %v3311_v37 = vsel %vm1378_vm9, %v3310_v29, %v3299_v6  ;;  %v10687_v6 = vld [vmem:[#allocation2 + $0x94] sm:$0xff]  ;;  %v6881_v15 = vcombine.low %v10670_v18, %v10670_v18  ;;  %v6882_v29 = vcombine.high %v10670_v18, %v10670_v18 }
 0x56d   :  { %v3312_v31 = vsel %vm1380_vm10, %v3311_v37, %v3303_v24 }
 0x56e   :  { %v3314_v48 = vpack.c.bf16 %v3312_v31, %v3312_v31  ;;  %6835 = vmatprep.mubr.msk.bf16.mxu1 %vm1378_vm9, %v3315_v23  ;;  %v10697_v23 = vld [vmem:[#allocation2 + $0x98] sm:$0xff]  ;;  %v6886_v37 = vrot.slane %v6881_v15, 9  ;;  %v4048_v31 = vrot.slane %v6882_v29, 5 }
 0x570   :  { %3449 = vmatmul.mubr.bf16.vlgmr.msra.gmra.mrb[16].mxu1 %v3314_v48  ;;  %v6883_v48 = vcombine.low %v10697_v23, %v10697_v23 }
 0x571   :  { %7974 = vmatpush3.bf16.msra.mxu1 %v10191_v7  ;;  %7977 = vmatprep.mubr.msk.bf16.mxu1 %vm9244_vm4, %v9243_v52 }
 0x572   :  { %7975 = vmatprep.subr.bf16.mxu1 %v9243_v52 }
 0x575   :  { %7976 = vmatpush3.bf16.msra.mxu1 %v10200_v27 }
 0x576   :  { %7989 = vmatprep.subr.bf16.mxu1 %v9243_v52 }
 0x578   :  { %7978 = vmatmul.mubr.msk.bf16.vlgmr.msra.gmra.mrb[20].mxu1 %vm277_vm1, %v10367_v28  ;;  %v10574_v28 = vld [vmem:[#allocation2 + $0x80] sm:$0xff] }
 0x579   :  { %7990 = vmatpush3.bf16.msra.mxu1 %v10209_v34  ;;  %7981 = vmatprep.mubr.msk.bf16.mxu1 %vm9244_vm4, %v9243_v52 }
 0x57a   :  { %7991 = vmatprep.subr.bf16.mxu1 %v9243_v52 }
 0x57d   :  { %7992 = vmatpush3.bf16.msra.mxu1 %v10218_v51 }
 0x57e   :  { %8005 = vmatprep.subr.bf16.mxu1 %v9243_v52 }
 0x580   :  { %7982 = vmatmul.mubr.msk.bf16.gmra.mrb[24].mxu1 %vm277_vm1, %v10384_v41  ;;  %v6845_v41 = vcombine.low %v10365_v38, %v10574_v28  ;;  %v6853_v38 = vcombine.low %v10574_v28, %v10574_v28 }
 0x581   :  { %7985 = vmatprep.mubr.msk.bf16.mxu1 %vm9244_vm4, %v9243_v52 }
 0x582   :  { %v6858_v42 = vrot.slane %v6853_v38, 9  ;;  %v6866_v26 = vrot.slane %v6853_v38, 10  ;;  %v6884_v38 = vcombine.high %v10697_v23, %v10697_v23 }
 0x588   :  { %7986 = vmatmul.mubr.msk.bf16.gmra.mrb[28].mxu1 %vm277_vm1, %v10402_v21  ;;  %v7224_v21 = vld [vmem:[#allocation2 + $0x84] sm:$0xff] }
 0x589   :  { %7993 = vmatprep.mubr.msk.bf16.mxu1 %vm9244_vm4, %v9243_v52 }
 0x590   :  { %7994 = vmatmul.mubr.msk.bf16.vlgmr.msra.gmra.mrb[20].mxu1 %vm277_vm1, %v10277_v9  ;;  %v10543_v9 = vld [vmem:[%s11382_s3 + $0x30] sm:$0xff]  }
 0x591   :  { %8006 = vmatpush3.bf16.msra.mxu1 %v10235_v60  ;;  %7997 = vmatprep.mubr.msk.bf16.mxu1 %vm9244_vm4, %v9243_v52 }
 0x592   :  { %8007 = vmatprep.subr.bf16.mxu1 %v9243_v52 }
 0x595   :  { %8008 = vmatpush3.bf16.msra.mxu1 %v10244_v59 }
 0x596   :  { %8021 = vmatprep.subr.bf16.mxu1 %v9243_v52 }
 0x598   :  { %7998 = vmatmul.mubr.msk.bf16.gmra.mrb[24].mxu1 %vm277_vm1, %v10347_v13  ;;  %v10552_v13 = vld [vmem:[%s11382_s3 + $0x38] sm:$0xff]  }
 0x599   :  { %8001 = vmatprep.mubr.msk.bf16.mxu1 %vm9244_vm4, %v9243_v52 }
 0x5a0   :  { %8002 = vmatmul.mubr.msk.bf16.gmra.mrb[28].mxu1 %vm277_vm1, %v10355_v33  ;;  %v10569_v33 = vld [vmem:[%s11382_s3 + $0x40] sm:$0xff]  }
 0x5a1   :  { %8009 = vmatprep.mubr.msk.bf16.mxu1 %vm9244_vm4, %v9243_v52 }
 0x5a8   :  { %8010 = vmatmul.mubr.msk.bf16.vlgmr.msra.gmra.mrb[20].mxu1 %vm277_vm1, %v10408_v22  ;;  %v6854_v22 = vcombine.high %v10574_v28, %v10574_v28 }
 0x5a9   :  { %8022 = vmatpush3.bf16.msra.mxu1 %v10543_v9  ;;  %8013 = vmatprep.mubr.msk.bf16.mxu1 %vm9244_vm4, %v9243_v52 }
 0x5aa   :  { %8023 = vmatprep.subr.bf16.mxu1 %v9243_v52  ;;  %v3746_v62 = vrot.slane %v6854_v22, 5  ;;  %v3847_v17 = vrot.slane %v6854_v22, 6  ;;  %v4051_v22 = vrot.slane %v6883_v48, 5 }
 0x5ac   :  { %v3747_v36 = vsel %vm9379_vm5, %v6858_v42, %v3746_v62  ;;  %v3748_v46 = vrot.slane %v3746_v62, 4  ;;  %v3848_v2 = vsel %vm9543_vm8, %v6866_v26, %v3847_v17  ;;  %v3849_v63 = vrot.slane %v3847_v17, 4 }
 0x5ad   :  { %8024 = vmatpush3.bf16.msra.mxu1 %v10552_v13  ;;  %v6868_v49 = vcombine.low %v10431_v5, %v3848_v2  ;;  %v4050_v42 = vrot.slane %v4048_v31, 4  ;;  %v4053_v62 = vrot.slane %v4051_v22, 4  ;;  %v4155_v26 = vrot.slane %v6884_v38, 6 }
 0x5ae   :  { %8037 = vmatprep.subr.bf16.mxu1 %v9243_v52 }
 0x5b0   :  { %8014 = vmatmul.mubr.msk.bf16.gmra.mrb[24].mxu1 %vm277_vm1, %v10419_v54  ;;  %v3638_v54 = vld [vmem:[#allocation2 + $0x88] sm:$0xff] }
 0x5b1   :  { %8017 = vmatprep.mubr.msk.bf16.mxu1 %vm9244_vm4, %v9243_v52  ;;  %v6855_v45 = vcombine.low %v3638_v54, %v3638_v54  ;;  %v6856_v56 = vcombine.high %v3638_v54, %v3638_v54  ;;  %v10674_v32 = vcombine.low %v3638_v54, %v10670_v18 }
 0x5b3   :  { %v3752_v40 = vrot.slane %v6856_v56, 5  ;;  %v3850_v55 = vrot.slane %v6855_v45, 6  ;;  %v3853_v3 = vrot.slane %v6856_v56, 6 }
 0x5b5   :  { %v3852_v11 = vrot.slane %v3850_v55, 4  ;;  %v3851_v5 = vsel %vm9543_vm8, %v3849_v63, %v3850_v55 }
 0x5b7   :  { %v3854_v12 = vsel %vm9543_vm8, %v3852_v11, %v3853_v3 }
 0x5b8   :  { %8018 = vmatmul.mubr.msk.bf16.gmra.mrb[28].mxu1 %vm277_vm1, %v10435_v44  ;;  %v6859_v44 = vcombine.low %v10378_v25, %v10394_v57  ;;  %v3749_v25 = vrot.slane %v6855_v45, 5  ;;  %v6860_v57 = vcombine.low %v10398_v58, %v3747_v36  ;;  %v6869_v8 = vcombine.low %v3851_v5, %v3854_v12 }
 0x5b9   :  { %8025 = vmatprep.mubr.msk.bf16.mxu1 %vm9244_vm4, %v9243_v52  ;;  %v4054_v45 = vrot.slane %v6884_v38, 5  ;;  %v9161_v38 = vld [vmem:[%s11384_s5 + $0x160] sm:$0xff]  }
 0x5ba   :  { %v3751_v0 = vrot.slane %v3749_v25, 4  ;;  %v3750_v58 = vsel %vm9379_vm5, %v3748_v46, %v3749_v25  ;;  %v6894_v46 = vrot.slane %v6881_v15, 10  ;;  %v9156_v15 = vld [vmem:[%s11384_s5 + $0x138] sm:$0xff]  }
 0x5bb   :  { %v10699_v24 = vcombine.low %v3747_v36, %v3750_v58  ;;  %v10736_v36 = vsel %vm9379_vm5, %v4050_v42, %v4051_v22  ;;  %v10740_v56 = vsel %vm9379_vm5, %v4053_v62, %v4054_v45 }
 0x5bc   :  { %v3753_v16 = vsel %vm9379_vm5, %v3751_v0, %v3752_v40  ;;  %v10744_v25 = vcombine.low %v10736_v36, %v10740_v56  ;;  %v4149_v0 = vrot.slane %v6882_v29, 6  ;;  %v9157_v29 = vld [vmem:[%s11384_s5 + $0x140] sm:$0xff]  }
 0x5bd   :  { %v6861_v53 = vcombine.low %v3750_v58, %v3753_v16  ;;  %v4152_v58 = vrot.slane %v6883_v48, 6  ;;  %v9160_v48 = vld [vmem:[%s11384_s5 + $0x158] sm:$0xff]  }
 0x5be   :  { %v10758_v40 = vsel %vm9543_vm8, %v6894_v46, %v4149_v0 }
 0x5c0   :  { %8026 = vmatmul.mubr.msk.bf16.vlgmr.msra.gmra.mrb[20].mxu1 %vm277_vm1, %v10343_v20  ;;  %v10582_v20 = vld [vmem:[%s11382_s3 + $0x48] sm:$0xff]  }
 0x5c1   :  { %8038 = vmatpush3.bf16.msra.mxu1 %v10569_v33  ;;  %8029 = vmatprep.mubr.msk.bf16.mxu1 %vm9244_vm4, %v9243_v52 }
 0x5c2   :  { %8039 = vmatprep.subr.bf16.mxu1 %v9243_v52 }
 0x5c5   :  { %8040 = vmatpush3.bf16.msra.mxu1 %v10582_v20 }
 0x5c6   :  { %8053 = vmatprep.subr.bf16.mxu1 %v9243_v52 }
 0x5c8   :  { %8030 = vmatmul.mubr.msk.bf16.gmra.mrb[24].mxu1 %vm277_vm1, %v6845_v41  ;;  %v10708_v41 = vld [vmem:[%s11382_s3 + $0x80] sm:$0xff]  }
 0x5c9   :  { %8033 = vmatprep.mubr.msk.bf16.mxu1 %vm9244_vm4, %v9243_v52 }
 0x5d0   :  { %8034 = vmatmul.mubr.msk.bf16.gmra.mrb[28].mxu1 %vm277_vm1, %v7224_v21  ;;  %v10715_v21 = vsel %vm9379_vm5, %v6886_v37, %v4048_v31  ;;  %v9158_v37 = vld [vmem:[%s11384_s5 + $0x148] sm:$0xff]   ;;  %v9159_v31 = vld [vmem:[%s11384_s5 + $0x150] sm:$0xff]  }
 0x5d1   :  { %8041 = vmatprep.mubr.msk.bf16.mxu1 %vm9244_vm4, %v9243_v52  ;;  %v10721_v54 = vcombine.low %v3753_v16, %v10715_v21  ;;  %v10761_v16 = vcombine.low %v3854_v12, %v10758_v40  ;;  %v9153_v12 = vld [vmem:[%s11384_s5 + $0x120] sm:$0xff]  }
 0x5d2   :  { %4384 = vmatpush1.bf16.msra.mxu0 %v9153_v12 }
 0x5d3   :  { %4385 = vmatprep.subr.bf16.mxu0 %v9245_v30 }
 0x5d8   :  { %8042 = vmatmul.mubr.msk.bf16.vlgmr.msra.gmra.mrb[20].mxu1 %vm277_vm1, %v6859_v44  ;;  %v10726_v44 = vld [vmem:[%s11382_s3 + $0x88] sm:$0xff]  }
 0x5d9   :  { %8054 = vmatpush3.bf16.msra.mxu1 %v10602_v10  ;;  %8045 = vmatprep.mubr.msk.bf16.mxu1 %vm9244_vm4, %v9243_v52 }
 0x5da   :  { %8055 = vmatprep.subr.bf16.mxu1 %v9243_v52 }
 0x5dd   :  { %8056 = vmatpush3.bf16.msra.mxu1 %v10614_v39 }
 0x5de   :  { %8069 = vmatprep.subr.bf16.mxu1 %v9243_v52 }
 0x5e0   :  { %8046 = vmatmul.mubr.msk.bf16.gmra.mrb[24].mxu1 %vm277_vm1, %v6860_v57  ;;  %v10750_v57 = vcombine.low %v3848_v2, %v3851_v5 }
 0x5e1   :  { %8049 = vmatprep.mubr.msk.bf16.mxu1 %vm9244_vm4, %v9243_v52 }
 0x5e8   :  { %8050 = vmatmul.mubr.msk.bf16.gmra.mrb[28].mxu1 %vm277_vm1, %v6861_v53  ;;  %v4151_v53 = vrot.slane %v4149_v0, 4 }
 0x5e9   :  { %8057 = vmatprep.mubr.msk.bf16.mxu1 %vm9244_vm4, %v9243_v52 }
 0x5ea   :  { %v10769_v17 = vsel %vm9543_vm8, %v4151_v53, %v4152_v58 }
 0x5f0   :  { %8058 = vmatmul.mubr.msk.bf16.vlgmr.msra.gmra.mrb[20].mxu1 %vm277_vm1, %v6867_v50  ;;  %v4154_v50 = vrot.slane %v4152_v58, 4 }
 0x5f1   :  { %8070 = vmatpush3.bf16.msra.mxu1 %v10634_v35  ;;  %8061 = vmatprep.mubr.msk.bf16.mxu1 %vm9244_vm4, %v9243_v52 }
 0x5f2   :  { %8071 = vmatprep.subr.bf16.mxu1 %v9243_v52  ;;  %v10773_v2 = vsel %vm9543_vm8, %v4154_v50, %v4155_v26 }
 0x5f3   :  { %v10780_v11 = vcombine.low %v10769_v17, %v10773_v2 }
 0x5f5   :  { %8072 = vmatpush3.bf16.msra.mxu1 %v10646_v47 }
 0x5f6   :  { %8085 = vmatprep.subr.bf16.mxu1 %v9243_v52 }
 0x5f8   :  { %8062 = vmatmul.mubr.msk.bf16.gmra.mrb[24].mxu1 %vm277_vm1, %v6868_v49 }
 0x5f9   :  { %8065 = vmatprep.mubr.msk.bf16.mxu1 %vm9244_vm4, %v9243_v52 }
 0x600   :  { %8066 = vmatmul.mubr.msk.bf16.gmra.mrb[28].mxu1 %vm277_vm1, %v6869_v8  ;;  %v9155_v8 = vld [vmem:[%s11384_s5 + $0x130] sm:$0xff]  }
 0x601   :  { %8073 = vmatprep.mubr.msk.bf16.mxu1 %vm9244_vm4, %v9243_v52 }
 0x608   :  { %8074 = vmatmul.mubr.msk.bf16.vlgmr.msra.gmra.mrb[20].mxu1 %vm277_vm1, %v10574_v28 }
 0x609   :  { %8086 = vmatpush3.bf16.msra.mxu1 %v10665_v4  ;;  %8077 = vmatprep.mubr.msk.bf16.mxu1 %vm9244_vm4, %v9243_v52 }
 0x60a   :  { %8087 = vmatprep.subr.bf16.mxu1 %v9243_v52 }
 0x60d   :  { %8088 = vmatpush3.bf16.msra.mxu1 %v10679_v43 }
 0x60e   :  { %8101 = vmatprep.subr.bf16.mxu1 %v9243_v52 }
 0x610   :  { %8078 = vmatmul.mubr.msk.bf16.gmra.mrb[24].mxu1 %vm277_vm1, %v10674_v32 }
 0x611   :  { %8081 = vmatprep.mubr.msk.bf16.mxu1 %vm9244_vm4, %v9243_v52 }
 0x618   :  { %8082 = vmatmul.mubr.msk.bf16.gmra.mrb[28].mxu1 %vm277_vm1, %v10687_v6 }
 0x619   :  { %8089 = vmatprep.mubr.msk.bf16.mxu1 %vm9244_vm4, %v9243_v52 }
 0x620   :  { %8090 = vmatmul.mubr.msk.bf16.vlgmr.msra.gmra.mrb[20].mxu1 %vm277_vm1, %v10699_v24 }
 0x621   :  { %8102 = vmatpush3.bf16.msra.mxu1 %v10708_v41  ;;  %8093 = vmatprep.mubr.msk.bf16.mxu1 %vm9244_vm4, %v9243_v52 }
 0x622   :  { %8103 = vmatprep.subr.bf16.mxu1 %v9243_v52 }
 0x625   :  { %8104 = vmatpush3.bf16.msra.mxu1 %v10726_v44 }
 0x626   :  { %5350 = vmatprep.subr.bf16.mxu1 %v9245_v30 }
 0x628   :  { %8094 = vmatmul.mubr.msk.bf16.gmra.mrb[24].mxu1 %vm277_vm1, %v10721_v54 }
 0x629   :  { %8097 = vmatprep.mubr.msk.bf16.mxu1 %vm9244_vm4, %v9243_v52 }
 0x630   :  { %8098 = vmatmul.mubr.msk.bf16.gmra.mrb[28].mxu1 %vm277_vm1, %v10744_v25 }
 0x631   :  { %8105 = vmatprep.mubr.msk.bf16.mxu1 %vm9244_vm4, %v9243_v52 }
 0x638   :  { %8106 = vmatmul.mubr.msk.bf16.vlgmr.msra.gmra.mrb[20].mxu1 %vm277_vm1, %v10750_v57 }
 0x639   :  { %8109 = vmatprep.mubr.msk.bf16.mxu1 %vm9244_vm4, %v9243_v52 }
 0x640   :  { %8110 = vmatmul.mubr.msk.bf16.gmra.mrb[24].mxu1 %vm277_vm1, %v10761_v16 }
 0x641   :  { %8113 = vmatprep.mubr.msk.bf16.mxu1 %vm9244_vm4, %v9243_v52 }
 0x643   :  { %v3450_v55 = vpop.f32.mrb[16].mxu1 }
 0x644   :  { %v10776_v49 = vadd.f32 %v3450_v55, %v10437_v14  ;;  %v3452_v63 = vpop.f32.mrb[17].mxu1  ;;  %v9154_v14 = vld [vmem:[%s11384_s5 + $0x128] sm:$0xff]  }
 0x645   :  { %v3453_v3 = vpop.f32.mrb[18].mxu1  ;;  %4386 = vmatpush1.bf16.msra.mxu0 %v9154_v14  ;;  %v9162_v55 = vld [vmem:[%s11384_s5 + $0x168] sm:$0xff]  }
 0x646   :  { %v3454_v5 = vpop.f32.mrb[19].mxu1  ;;  %4387 = vmatprep.subr.bf16.mxu0 %v9245_v30 }
 0x648   :  { %8114 = vmatmul.mubr.msk.bf16.gmra.mrb[28].mxu1 %vm277_vm1, %v10780_v11 }
 0x649   :  { %4388 = vmatpush1.bf16.msra.mxu0 %v9155_v8  ;;  %v9163_v8 = vld [vmem:[%s11384_s5 + $0x170] sm:$0xff]  }
 0x64a   :  { %4389 = vmatprep.subr.bf16.mxu0 %v9245_v30 }
 0x64d   :  { %4390 = vmatpush1.bf16.msra.mxu0 %v9156_v15 }
 0x64e   :  { %4391 = vmatprep.subr.bf16.mxu0 %v9245_v30 }
 0x651   :  { %4392 = vmatpush1.bf16.msra.mxu0 %v9157_v29 }
 0x652   :  { %4393 = vmatprep.subr.bf16.mxu0 %v9245_v30 }
 0x655   :  { %4394 = vmatpush1.bf16.msra.mxu0 %v9158_v37 }
 0x656   :  { %4395 = vmatprep.subr.bf16.mxu0 %v9245_v30 }
 0x659   :  { %4396 = vmatpush1.bf16.msra.mxu0 %v9159_v31 }
 0x65a   :  { %4397 = vmatprep.subr.bf16.mxu0 %v9245_v30 }
 0x65d   :  { %4398 = vmatpush1.bf16.msra.mxu0 %v9160_v48 }
 0x65e   :  { %4399 = vmatprep.subr.bf16.mxu0 %v9245_v30 }
 0x661   :  { %4400 = vmatpush1.bf16.msra.mxu0 %v9161_v38 }
 0x662   :  { %4401 = vmatprep.subr.bf16.mxu0 %v9245_v30 }
 0x665   :  { %4402 = vmatpush1.bf16.msra.mxu0 %v9162_v55 }
 0x666   :  { %4403 = vmatprep.subr.bf16.mxu0 %v9245_v30 }
 0x669   :  { %4404 = vmatpush1.bf16.msra.mxu0 %v9163_v8 }
 0x66a   :  { %4405 = vmatprep.subr.bf16.mxu0 %v9245_v30 }
 0x70b   :  { %v4209_v22 = vpop.f32.mrb[20].mxu1 }
 0x70c   :  { %v8107_v42 = vpop.f32.mrb[21].mxu1 }
 0x70d   :  { %v4212_v62 = vpop.f32.mrb[22].mxu1 }
 0x70e   :  { %v8108_v45 = vpop.f32.mrb[23].mxu1 }
 0x713   :  { %v4217_v46 = vpop.f32.mrb[24].mxu1 }
 0x714   :  { %v8111_v0 = vpop.f32.mrb[25].mxu1 }
 0x715   :  { %v4220_v58 = vpop.f32.mrb[26].mxu1 }
 0x716   :  { %v4238_v53 = vmax.f32 %v4209_v22, %v4220_v58  ;;  %v8112_v50 = vpop.f32.mrb[27].mxu1  ;;  %v9164_v22 = vld [vmem:[%s11384_s5 + $0x178] sm:$0xff]  }
 0x717   :  { %4406 = vmatpush1.bf16.msra.mxu0 %v9164_v22 }
 0x718   :  { %v4242_v26 = vrot.slane %v4238_v53, 2  ;;  %8117 = vmatprep.subr.bf16.mxu0 %v9243_v52 }
 0x71a   :  { %v4244_v3 = vmax.f32 %v4238_v53, %v4242_v26 }
 0x71b   :  { %v4225_v63 = vpop.f32.mrb[28].mxu1 }
 0x71c   :  { %v4239_v5 = vmax.f32 %v4212_v62, %v4225_v63  ;;  %v8115_v12 = vpop.f32.mrb[29].mxu1  ;;  %v4245_v31 = vadd.f32 %v9307_v1, %v4244_v3 }
 0x71d   :  { %v4228_v14 = vpop.f32.mrb[30].mxu1 }
 0x71e   :  { %v4248_v15 = vrot.slane %v4239_v5, 2  ;;  %v4240_v29 = vmax.f32 %v4217_v46, %v4228_v14  ;;  %v8116_v37 = vpop.f32.mrb[31].mxu1  ;;  %v4246_v45 = vmax.f32 %v4245_v31, 0.0 }
 0x720   :  { %v4250_v48 = vmax.f32 %v4239_v5, %v4248_v15  ;;  %v4254_v38 = vrot.slane %v4240_v29, 2  ;;  %v4260_v53 = vrot.slane %v4246_v45, 4 }
 0x722   :  { %v4251_v42 = vadd.f32 %v9307_v1, %v4250_v48  ;;  %v4256_v62 = vmax.f32 %v4240_v29, %v4254_v38 }
 0x724   :  { %v4252_v0 = vmax.f32 %v4251_v42, 0.0  ;;  %v4257_v46 = vadd.f32 %v9307_v1, %v4256_v62 }
 0x726   :  { %v4258_v58 = vmax.f32 %v4257_v46, 0.0  ;;  %4265 = vrot.lane.b32.xlu0 %v4252_v0, %s9248_s12  ;;  %v4268_v55 = vrot.slane %v4252_v0, 4 }
 0x728   :  { %v4273_v50 = vrot.slane %v4258_v58, 4 }
 0x72a   :  { %v9035_v26 = vpack.i.bf16 %v4273_v50, %v4260_v53 }
 0x72c   :  { %9036 = vrot.lane.b32.xlu1 %v9035_v26, %s9247_s11 }
 0x730   :  { %4269 = vrot.lane.b32.xlu1 %v4268_v55, %s9246_s10  ;;  %v10980_v55 = vld [vmem:[#allocation2 + $0xb4] sm:$0xff] }
 0x798   :  { %v4266_v12 = vpop.permute.xlu0 %4265 }
 0x79e   :  { %v9037_v63 = vpop.permute.xlu1 %9036 }
 0x79f   :  { %v9039_v3 = vunpack.i.h.bf16 %v9037_v63  ;;  %v9038_v5 = vunpack.i.l.bf16 %v9037_v63 }
 0x7a1   :  { %v4280_v14 = vsel %vm277_vm1, %v4258_v58, %v9039_v3  ;;  %v4277_v8 = vsel %vm277_vm1, %v4246_v45, %v9038_v5  ;;  %v10990_v5 = vld [vmem:[#allocation2 + $0xb8] sm:$0xff] }
 0x7a2   :  { %v4282_v15 = vpack.c.bf16 %v4280_v14, %v4280_v14  ;;  %v4270_v29 = vpop.permute.xlu1 %4269  ;;  %v4278_v37 = vsel %vm1378_vm9, %v4277_v8, %v4266_v12 }
 0x7a3   :  { %v4279_v31 = vsel %vm1380_vm10, %v4278_v37, %v4270_v29  ;;  %v6986_v37 = vcombine.high %v10990_v5, %v10990_v5 }
 0x7a4   :  { %v4281_v48 = vpack.c.bf16 %v4279_v31, %v4279_v31  ;;  %6937 = vmatprep.mubr.msk.bf16.mxu0 %vm1378_vm9, %v4282_v15  ;;  %v6985_v15 = vcombine.low %v10990_v5, %v10990_v5 }
 0x7a6   :  { %4416 = vmatmul.mubr.bf16.vlgmr.msra.gmra.mrb[28].mxu0 %v4281_v48  ;;  %v5018_v31 = vrot.slane %v6985_v15, 5 }
 0x7a7   :  { %8118 = vmatpush3.bf16.msra.mxu0 %v10191_v7  ;;  %8121 = vmatprep.mubr.msk.bf16.mxu0 %vm9244_vm4, %v9243_v52  ;;  %v10902_v7 = vld [vmem:[#allocation2 + $0xa0] sm:$0xff] }
 0x7a8   :  { %8119 = vmatprep.subr.bf16.mxu0 %v9243_v52 }
 0x7ab   :  { %8120 = vmatpush3.bf16.msra.mxu0 %v10200_v27  ;;  %v6947_v27 = vcombine.low %v10697_v23, %v10902_v7 }
 0x7ac   :  { %8133 = vmatprep.subr.bf16.mxu0 %v9243_v52 }
 0x7ae   :  { %8122 = vmatmul.mubr.msk.bf16.vlgmr.msra.gmra.mrb[32].mxu0 %vm277_vm1, %v10699_v24 }
 0x7af   :  { %8134 = vmatpush3.bf16.msra.mxu0 %v10209_v34  ;;  %8125 = vmatprep.mubr.msk.bf16.mxu0 %vm9244_vm4, %v9243_v52  ;;  %v7228_v34 = vld [vmem:[#allocation2 + $0xa4] sm:$0xff] }
 0x7b0   :  { %8135 = vmatprep.subr.bf16.mxu0 %v9243_v52 }
 0x7b3   :  { %8136 = vmatpush3.bf16.msra.mxu0 %v10218_v51  ;;  %v6955_v51 = vcombine.low %v10902_v7, %v10902_v7 }
 0x7b4   :  { %8149 = vmatprep.subr.bf16.mxu0 %v9243_v52 }
 0x7b5   :  { %v6968_v22 = vrot.slane %v6955_v51, 10 }
 0x7b6   :  { %8126 = vmatmul.mubr.msk.bf16.gmra.mrb[36].mxu0 %vm277_vm1, %v10721_v54 }
 0x7b7   :  { %8129 = vmatprep.mubr.msk.bf16.mxu0 %vm9244_vm4, %v9243_v52 }
 0x7be   :  { %8130 = vmatmul.mubr.msk.bf16.gmra.mrb[40].mxu0 %vm277_vm1, %v10744_v25 }
 0x7bf   :  { %8137 = vmatprep.mubr.msk.bf16.mxu0 %vm9244_vm4, %v9243_v52 }
 0x7c6   :  { %8138 = vmatmul.mubr.msk.bf16.vlgmr.msra.gmra.mrb[32].mxu0 %vm277_vm1, %v10574_v28  ;;  %v6961_v28 = vcombine.low %v10715_v21, %v10736_v36 }
 0x7c7   :  { %8150 = vmatpush3.bf16.msra.mxu0 %v10235_v60  ;;  %8141 = vmatprep.mubr.msk.bf16.mxu0 %vm9244_vm4, %v9243_v52  ;;  %v6956_v60 = vcombine.high %v10902_v7, %v10902_v7 }
 0x7c8   :  { %8151 = vmatprep.subr.bf16.mxu0 %v9243_v52 }
 0x7c9   :  { %v4814_v42 = vrot.slane %v6956_v60, 6 }
 0x7cb   :  { %8152 = vmatpush3.bf16.msra.mxu0 %v10244_v59  ;;  %v4605_v59 = vld [vmem:[#allocation2 + $0xa8] sm:$0xff]  ;;  %v4815_v62 = vsel %vm9543_vm8, %v6968_v22, %v4814_v42 }
 0x7cc   :  { %8165 = vmatprep.subr.bf16.mxu0 %v9243_v52  ;;  %v6958_v24 = vcombine.high %v4605_v59, %v4605_v59  ;;  %v6970_v0 = vcombine.low %v10773_v2, %v4815_v62  ;;  %v10968_v2 = vld [vmem:[#allocation2 + $0xb0] sm:$0xff] }
 0x7cd   :  { %v10972_v26 = vcombine.low %v4605_v59, %v10968_v2  ;;  %v6983_v63 = vcombine.low %v10968_v2, %v10968_v2  ;;  %v6984_v3 = vcombine.high %v10968_v2, %v10968_v2 }
 0x7ce   :  { %8142 = vmatmul.mubr.msk.bf16.gmra.mrb[36].mxu0 %vm277_vm1, %v10674_v32  ;;  %v4713_v32 = vrot.slane %v6956_v60, 5  ;;  %v4820_v46 = vrot.slane %v6958_v24, 6 }
 0x7cf   :  { %8145 = vmatprep.mubr.msk.bf16.mxu0 %vm9244_vm4, %v9243_v52  ;;  %v6988_v14 = vrot.slane %v6983_v63, 9  ;;  %v5015_v8 = vrot.slane %v6984_v3, 5 }
 0x7d0   :  { %v4715_v21 = vrot.slane %v4713_v32, 4 }
 0x7d1   :  { %v11003_v29 = vsel %vm9379_vm5, %v6988_v14, %v5015_v8 }
 0x7d6   :  { %8146 = vmatmul.mubr.msk.bf16.gmra.mrb[40].mxu0 %vm277_vm1, %v10687_v6  ;;  %v6957_v6 = vcombine.low %v4605_v59, %v4605_v59 }
 0x7d7   :  { %8153 = vmatprep.mubr.msk.bf16.mxu0 %vm9244_vm4, %v9243_v52 }
 0x7d8   :  { %v4716_v54 = vrot.slane %v6957_v6, 5  ;;  %v4817_v45 = vrot.slane %v6957_v6, 6  ;;  %v5116_v6 = vrot.slane %v6984_v3, 6 }
 0x7da   :  { %v4718_v36 = vrot.slane %v4716_v54, 4 }
 0x7de   :  { %8154 = vmatmul.mubr.msk.bf16.vlgmr.msra.gmra.mrb[32].mxu0 %vm277_vm1, %v10750_v57  ;;  %v4719_v57 = vrot.slane %v6958_v24, 5  ;;  %v5119_v24 = vrot.slane %v6985_v15, 6 }
 0x7df   :  { %8166 = vmatpush3.bf16.msra.mxu0 %v10543_v9  ;;  %8157 = vmatprep.mubr.msk.bf16.mxu0 %vm9244_vm4, %v9243_v52 }
 0x7e0   :  { %8167 = vmatprep.subr.bf16.mxu0 %v9243_v52 }
 0x7e3   :  { %8168 = vmatpush3.bf16.msra.mxu0 %v10552_v13 }
 0x7e4   :  { %8181 = vmatprep.subr.bf16.mxu0 %v9243_v52 }
 0x7e6   :  { %8158 = vmatmul.mubr.msk.bf16.gmra.mrb[36].mxu0 %vm277_vm1, %v10761_v16  ;;  %v4717_v16 = vsel %vm9379_vm5, %v4715_v21, %v4716_v54  ;;  %v5121_v21 = vrot.slane %v5119_v24, 4 }
 0x7e7   :  { %8161 = vmatprep.mubr.msk.bf16.mxu0 %vm9244_vm4, %v9243_v52 }
 0x7ee   :  { %8162 = vmatmul.mubr.msk.bf16.gmra.mrb[40].mxu0 %vm277_vm1, %v10780_v11  ;;  %v4720_v11 = vsel %vm9379_vm5, %v4718_v36, %v4719_v57  ;;  %v5122_v36 = vrot.slane %v6986_v37, 6 }
 0x7ef   :  { %8169 = vmatprep.mubr.msk.bf16.mxu0 %vm9244_vm4, %v9243_v52  ;;  %v6963_v38 = vcombine.low %v4717_v16, %v4720_v11  ;;  %v11009_v48 = vcombine.low %v4720_v11, %v11003_v29 }
 0x7f6   :  { %8170 = vmatmul.mubr.msk.bf16.vlgmr.msra.gmra.mrb[32].mxu0 %vm277_vm1, %v10670_v18  ;;  %v6960_v18 = vrot.slane %v6955_v51, 9  ;;  %v5021_v51 = vrot.slane %v6986_v37, 5 }
 0x7f7   :  { %8182 = vmatpush3.bf16.msra.mxu0 %v10569_v33  ;;  %8173 = vmatprep.mubr.msk.bf16.mxu0 %vm9244_vm4, %v9243_v52 }
 0x7f8   :  { %8183 = vmatprep.subr.bf16.mxu0 %v9243_v52  ;;  %v4714_v23 = vsel %vm9379_vm5, %v6960_v18, %v4713_v32  ;;  %v6996_v32 = vrot.slane %v6983_v63, 10 }
 0x7f9   :  { %v6962_v25 = vcombine.low %v10740_v56, %v4714_v23  ;;  %v6969_v56 = vcombine.low %v10758_v40, %v10769_v17  ;;  %v4816_v40 = vrot.slane %v4814_v42, 4  ;;  %v4819_v17 = vrot.slane %v4817_v45, 4 }
 0x7fa   :  { %v10992_v12 = vcombine.low %v4714_v23, %v4717_v16  ;;  %v11041_v23 = vsel %vm9543_vm8, %v6996_v32, %v5116_v6  ;;  %v11056_v16 = vsel %vm9543_vm8, %v5121_v21, %v5122_v36  ;;  %v9184_v32 = vld [vmem:[%s11384_s5 + $0x1c8] sm:$0xff]  }
 0x7fb   :  { %8184 = vmatpush3.bf16.msra.mxu0 %v10582_v20  ;;  %v4818_v58 = vsel %vm9543_vm8, %v4816_v40, %v4817_v45  ;;  %v4821_v53 = vsel %vm9543_vm8, %v4819_v17, %v4820_v46  ;;  %v9175_v45 = vld [vmem:[%s11384_s5 + $0x180] sm:$0xff]   ;;  %v9178_v40 = vld [vmem:[%s11384_s5 + $0x198] sm:$0xff]   ;;  %v9180_v46 = vld [vmem:[%s11384_s5 + $0x1a8] sm:$0xff]  }
 0x7fc   :  { %8197 = vmatprep.subr.bf16.mxu0 %v9243_v52  ;;  %v6971_v50 = vcombine.low %v4818_v58, %v4821_v53  ;;  %v11033_v18 = vcombine.low %v4815_v62, %v4818_v58  ;;  %v11044_v54 = vcombine.low %v4821_v53, %v11041_v23  ;;  %5351 = vmatpush1.bf16.msra.mxu1 %v9175_v45  ;;  %v9179_v17 = vld [vmem:[%s11384_s5 + $0x1a0] sm:$0xff]   ;;  %v9181_v58 = vld [vmem:[%s11384_s5 + $0x1b0] sm:$0xff]   ;;  %v9182_v53 = vld [vmem:[%s11384_s5 + $0x1b8] sm:$0xff]  }
 0x7fd   :  { %5352 = vmatprep.subr.bf16.mxu1 %v9245_v30 }
 0x7fe   :  { %8174 = vmatmul.mubr.msk.bf16.gmra.mrb[36].mxu0 %vm277_vm1, %v6947_v27  ;;  %v5017_v27 = vrot.slane %v5015_v8, 4 }
 0x7ff   :  { %8177 = vmatprep.mubr.msk.bf16.mxu0 %vm9244_vm4, %v9243_v52 }
 0x800   :  { %v11019_v60 = vsel %vm9379_vm5, %v5017_v27, %v5018_v31 }
 0x806   :  { %8178 = vmatmul.mubr.msk.bf16.gmra.mrb[40].mxu0 %vm277_vm1, %v7228_v34  ;;  %v5020_v34 = vrot.slane %v5018_v31, 4 }
 0x807   :  { %8185 = vmatprep.mubr.msk.bf16.mxu0 %vm9244_vm4, %v9243_v52 }
 0x808   :  { %v11023_v59 = vsel %vm9379_vm5, %v5020_v34, %v5021_v51 }
 0x80e   :  { %8186 = vmatmul.mubr.msk.bf16.vlgmr.msra.gmra.mrb[32].mxu0 %vm277_vm1, %v6961_v28  ;;  %v11027_v28 = vcombine.low %v11019_v60, %v11023_v59 }
 0x80f   :  { %8198 = vmatpush3.bf16.msra.mxu0 %v10602_v10  ;;  %8189 = vmatprep.mubr.msk.bf16.mxu0 %vm9244_vm4, %v9243_v52 }
 0x810   :  { %8199 = vmatprep.subr.bf16.mxu0 %v9243_v52 }
 0x813   :  { %8200 = vmatpush3.bf16.msra.mxu0 %v10614_v39 }
 0x814   :  { %8213 = vmatprep.subr.bf16.mxu0 %v9243_v52 }
 0x816   :  { %8190 = vmatmul.mubr.msk.bf16.gmra.mrb[36].mxu0 %vm277_vm1, %v6962_v25  ;;  %v5118_v25 = vrot.slane %v5116_v6, 4 }
 0x817   :  { %8193 = vmatprep.mubr.msk.bf16.mxu0 %vm9244_vm4, %v9243_v52 }
 0x818   :  { %v11052_v57 = vsel %vm9543_vm8, %v5118_v25, %v5119_v24 }
 0x819   :  { %v11063_v22 = vcombine.low %v11052_v57, %v11056_v16 }
 0x81e   :  { %8194 = vmatmul.mubr.msk.bf16.gmra.mrb[40].mxu0 %vm277_vm1, %v6963_v38 }
 0x81f   :  { %8201 = vmatprep.mubr.msk.bf16.mxu0 %vm9244_vm4, %v9243_v52 }
 0x826   :  { %8202 = vmatmul.mubr.msk.bf16.vlgmr.msra.gmra.mrb[32].mxu0 %vm277_vm1, %v6969_v56 }
 0x827   :  { %8214 = vmatpush3.bf16.msra.mxu0 %v10634_v35  ;;  %8205 = vmatprep.mubr.msk.bf16.mxu0 %vm9244_vm4, %v9243_v52 }
 0x828   :  { %8215 = vmatprep.subr.bf16.mxu0 %v9243_v52 }
 0x82b   :  { %8216 = vmatpush3.bf16.msra.mxu0 %v10646_v47 }
 0x82c   :  { %8229 = vmatprep.subr.bf16.mxu0 %v9243_v52 }
 0x82e   :  { %8206 = vmatmul.mubr.msk.bf16.gmra.mrb[36].mxu0 %vm277_vm1, %v6970_v0  ;;  %v9177_v0 = vld [vmem:[%s11384_s5 + $0x190] sm:$0xff]  }
 0x82f   :  { %8209 = vmatprep.mubr.msk.bf16.mxu0 %vm9244_vm4, %v9243_v52 }
 0x836   :  { %8210 = vmatmul.mubr.msk.bf16.gmra.mrb[40].mxu0 %vm277_vm1, %v6971_v50  ;;  %v9183_v50 = vld [vmem:[%s11384_s5 + $0x1c0] sm:$0xff]  }
 0x837   :  { %8217 = vmatprep.mubr.msk.bf16.mxu0 %vm9244_vm4, %v9243_v52 }
 0x83e   :  { %8218 = vmatmul.mubr.msk.bf16.vlgmr.msra.gmra.mrb[32].mxu0 %vm277_vm1, %v10902_v7 }
 0x83f   :  { %8230 = vmatpush3.bf16.msra.mxu0 %v10665_v4  ;;  %8221 = vmatprep.mubr.msk.bf16.mxu0 %vm9244_vm4, %v9243_v52 }
 0x840   :  { %8231 = vmatprep.subr.bf16.mxu0 %v9243_v52 }
 0x843   :  { %8232 = vmatpush3.bf16.msra.mxu0 %v10679_v43 }
 0x844   :  { %8245 = vmatprep.subr.bf16.mxu0 %v9243_v52 }
 0x846   :  { %8222 = vmatmul.mubr.msk.bf16.gmra.mrb[36].mxu0 %vm277_vm1, %v10972_v26 }
 0x847   :  { %8225 = vmatprep.mubr.msk.bf16.mxu0 %vm9244_vm4, %v9243_v52 }
 0x84e   :  { %8226 = vmatmul.mubr.msk.bf16.gmra.mrb[40].mxu0 %vm277_vm1, %v10980_v55 }
 0x84f   :  { %8233 = vmatprep.mubr.msk.bf16.mxu0 %vm9244_vm4, %v9243_v52 }
 0x856   :  { %8234 = vmatmul.mubr.msk.bf16.vlgmr.msra.gmra.mrb[32].mxu0 %vm277_vm1, %v10992_v12 }
 0x857   :  { %8246 = vmatpush3.bf16.msra.mxu0 %v10708_v41  ;;  %8237 = vmatprep.mubr.msk.bf16.mxu0 %vm9244_vm4, %v9243_v52 }
 0x858   :  { %8247 = vmatprep.subr.bf16.mxu0 %v9243_v52 }
 0x85b   :  { %8248 = vmatpush3.bf16.msra.mxu0 %v10726_v44 }
 0x85c   :  { %6317 = vmatprep.subr.bf16.mxu0 %v9245_v30 }
 0x85e   :  { %8238 = vmatmul.mubr.msk.bf16.gmra.mrb[36].mxu0 %vm277_vm1, %v11009_v48 }
 0x85f   :  { %8241 = vmatprep.mubr.msk.bf16.mxu0 %vm9244_vm4, %v9243_v52 }
 0x866   :  { %8242 = vmatmul.mubr.msk.bf16.gmra.mrb[40].mxu0 %vm277_vm1, %v11027_v28 }
 0x867   :  { %8249 = vmatprep.mubr.msk.bf16.mxu0 %vm9244_vm4, %v9243_v52 }
 0x86e   :  { %8250 = vmatmul.mubr.msk.bf16.vlgmr.msra.gmra.mrb[32].mxu0 %vm277_vm1, %v11033_v18 }
 0x86f   :  { %8253 = vmatprep.mubr.msk.bf16.mxu0 %vm9244_vm4, %v9243_v52 }
 0x876   :  { %8254 = vmatmul.mubr.msk.bf16.gmra.mrb[36].mxu0 %vm277_vm1, %v11044_v54 }
 0x877   :  { %8257 = vmatprep.mubr.msk.bf16.mxu0 %vm9244_vm4, %v9243_v52 }
 0x879   :  { %v4417_v11 = vpop.f32.mrb[28].mxu0 }
 0x87a   :  { %v11059_v38 = vadd.f32 %v4417_v11, %v10776_v49  ;;  %v4419_v56 = vpop.f32.mrb[29].mxu0  ;;  %v9176_v49 = vld [vmem:[%s11384_s5 + $0x188] sm:$0xff]   ;;  %v9185_v11 = vld [vmem:[%s11384_s5 + $0x1d0] sm:$0xff]  }
 0x87b   :  { %v4420_v42 = vpop.f32.mrb[30].mxu0  ;;  %5353 = vmatpush1.bf16.msra.mxu1 %v9176_v49 }
 0x87c   :  { %v4421_v62 = vpop.f32.mrb[31].mxu0  ;;  %5354 = vmatprep.subr.bf16.mxu1 %v9245_v30 }
 0x87e   :  { %8258 = vmatmul.mubr.msk.bf16.gmra.mrb[40].mxu0 %vm277_vm1, %v11063_v22 }
 0x87f   :  { %5355 = vmatpush1.bf16.msra.mxu1 %v9177_v0 }
 0x880   :  { %5356 = vmatprep.subr.bf16.mxu1 %v9245_v30 }
 0x883   :  { %5357 = vmatpush1.bf16.msra.mxu1 %v9178_v40  ;;  %v9186_v40 = vld [vmem:[%s11384_s5 + $0x1d8] sm:$0xff]  }
 0x884   :  { %5358 = vmatprep.subr.bf16.mxu1 %v9245_v30 }
 0x887   :  { %5359 = vmatpush1.bf16.msra.mxu1 %v9179_v17 }
 0x888   :  { %5360 = vmatprep.subr.bf16.mxu1 %v9245_v30 }
 0x88b   :  { %5361 = vmatpush1.bf16.msra.mxu1 %v9180_v46 }
 0x88c   :  { %5362 = vmatprep.subr.bf16.mxu1 %v9245_v30 }
 0x88f   :  { %5363 = vmatpush1.bf16.msra.mxu1 %v9181_v58 }
 0x890   :  { %5364 = vmatprep.subr.bf16.mxu1 %v9245_v30 }
 0x893   :  { %5365 = vmatpush1.bf16.msra.mxu1 %v9182_v53 }
 0x894   :  { %5366 = vmatprep.subr.bf16.mxu1 %v9245_v30 }
 0x897   :  { %5367 = vmatpush1.bf16.msra.mxu1 %v9183_v50 }
 0x898   :  { %5368 = vmatprep.subr.bf16.mxu1 %v9245_v30 }
 0x89b   :  { %5369 = vmatpush1.bf16.msra.mxu1 %v9184_v32 }
 0x89c   :  { %5370 = vmatprep.subr.bf16.mxu1 %v9245_v30 }
 0x89f   :  { %5371 = vmatpush1.bf16.msra.mxu1 %v9185_v11  ;;  %v9229_v11 = vld [vmem:[%s11382_s3 + $0x10] sm:$0xff]  }
 0x8a0   :  { %5372 = vmatprep.subr.bf16.mxu1 %v9245_v30 }
 0x8a3   :  { %5373 = vmatpush1.bf16.msra.mxu1 %v9186_v40 }
 0x8a4   :  { %8261 = vmatprep.subr.bf16.mxu1 %v9243_v52 }
 0x941   :  { %v5176_v63 = vpop.f32.mrb[32].mxu0 }
 0x942   :  { %v8251_v3 = vpop.f32.mrb[33].mxu0 }
 0x943   :  { %v5179_v14 = vpop.f32.mrb[34].mxu0 }
 0x944   :  { %v8252_v8 = vpop.f32.mrb[35].mxu0 }
 0x949   :  { %v5184_v15 = vpop.f32.mrb[36].mxu0 }
 0x94a   :  { %v8255_v37 = vpop.f32.mrb[37].mxu0 }
 0x94b   :  { %v5187_v31 = vpop.f32.mrb[38].mxu0 }
 0x94c   :  { %v5205_v27 = vmax.f32 %v5176_v63, %v5187_v31  ;;  %v8256_v34 = vpop.f32.mrb[39].mxu0 }
 0x94e   :  { %v5209_v51 = vrot.slane %v5205_v27, 2 }
 0x950   :  { %v5211_v24 = vmax.f32 %v5205_v27, %v5209_v51 }
 0x951   :  { %v5192_v6 = vpop.f32.mrb[40].mxu0 }
 0x952   :  { %v5206_v25 = vmax.f32 %v5179_v14, %v5192_v6  ;;  %v8259_v21 = vpop.f32.mrb[41].mxu0  ;;  %v5212_v45 = vadd.f32 %v9307_v1, %v5211_v24 }
 0x953   :  { %v5195_v36 = vpop.f32.mrb[42].mxu0 }
 0x954   :  { %v5215_v56 = vrot.slane %v5206_v25, 2  ;;  %v5207_v42 = vmax.f32 %v5184_v15, %v5195_v36  ;;  %v8260_v62 = vpop.f32.mrb[43].mxu0  ;;  %v5213_v58 = vmax.f32 %v5212_v45, 0.0 }
 0x955   :  { %v9232_v62 = vld [vmem:[%s11382_s3 + $0x8] sm:$0xff]  }
 0x956   :  { %v5217_v49 = vmax.f32 %v5206_v25, %v5215_v56  ;;  %v5221_v0 = vrot.slane %v5207_v42, 2  ;;  %v5227_v3 = vrot.slane %v5213_v58, 4  ;;  %v9230_v56 = vld [vmem:[%s11382_s3 + $0x18] sm:$0xff]  }
 0x958   :  { %v5218_v17 = vadd.f32 %v9307_v1, %v5217_v49  ;;  %v5223_v46 = vmax.f32 %v5207_v42, %v5221_v0  ;;  %v9231_v42 = vld [vmem:[%s11382_s3] sm:$0xff]  }
 0x95a   :  { %v5219_v53 = vmax.f32 %v5218_v17, 0.0  ;;  %v5224_v50 = vadd.f32 %v9307_v1, %v5223_v46 }
 0x95c   :  { %v5225_v63 = vmax.f32 %v5224_v50, 0.0  ;;  %5232 = vrot.lane.b32.xlu1 %v5219_v53, %s9248_s12  ;;  %v5235_v15 = vrot.slane %v5219_v53, 4 }
 0x95e   :  { %v5240_v14 = vrot.slane %v5225_v63, 4 }
 0x960   :  { %v9040_v8 = vpack.i.bf16 %v5240_v14, %v5227_v3  ;;  %v7234_v14 = vld [vmem:[#allocation2 + $0xd4] sm:$0xff] }
 0x962   :  { %9041 = vrot.lane.b32.xlu0 %v9040_v8, %s9247_s11 }
 0x966   :  { %5236 = vrot.lane.b32.xlu0 %v5235_v15, %s9246_s10  ;;  %v5874_v15 = vld [vmem:[#allocation2 + $0xd8] sm:$0xff] }
 0x9ce   :  { %v5233_v34 = vpop.permute.xlu1 %5232 }
 0x9d4   :  { %v9042_v37 = vpop.permute.xlu0 %9041 }
 0x9d5   :  { %v9044_v31 = vunpack.i.h.bf16 %v9042_v37  ;;  %v9043_v27 = vunpack.i.l.bf16 %v9042_v37 }
 0x9d7   :  { %v5247_v51 = vsel %vm277_vm1, %v5225_v63, %v9044_v31  ;;  %v5244_v32 = vsel %vm277_vm1, %v5213_v58, %v9043_v27 }
 0x9d8   :  { %v5249_v6 = vpack.c.bf16 %v5247_v51, %v5247_v51  ;;  %v5237_v24 = vpop.permute.xlu0 %5236  ;;  %v5245_v25 = vsel %vm1378_vm9, %v5244_v32, %v5233_v34  ;;  %v7088_v51 = vcombine.high %v5874_v15, %v5874_v15 }
 0x9d9   :  { %v5246_v21 = vsel %vm1380_vm10, %v5245_v25, %v5237_v24 }
 0x9da   :  { %v5248_v36 = vpack.c.bf16 %v5246_v21, %v5246_v21  ;;  %7039 = vmatprep.mubr.msk.bf16.mxu1 %vm1378_vm9, %v5249_v6  ;;  %v5988_v21 = vrot.slane %v7088_v51, 5 }
 0x9dc   :  { %5383 = vmatmul.mubr.bf16.vlgmr.msra.gmra.mrb[32].mxu1 %v5248_v36 }
 0x9dd   :  { %8262 = vmatpush3.bf16.msra.mxu1 %v9229_v11  ;;  %8265 = vmatprep.mubr.msk.bf16.mxu1 %vm9244_vm4, %v9243_v52 }
 0x9de   :  { %8263 = vmatprep.subr.bf16.mxu1 %v9243_v52 }
 0x9e1   :  { %8264 = vmatpush3.bf16.msra.mxu1 %v9230_v56 }
 0x9e2   :  { %8277 = vmatprep.subr.bf16.mxu1 %v9243_v52 }
 0x9e4   :  { %8266 = vmatmul.mubr.msk.bf16.vlgmr.msra.gmra.mrb[36].mxu1 %vm277_vm1, %v10992_v12  ;;  %v9233_v12 = vld [vmem:[%s11382_s3 + $0x20] sm:$0xff]  }
 0x9e5   :  { %8278 = vmatpush3.bf16.msra.mxu1 %v9231_v42  ;;  %8269 = vmatprep.mubr.msk.bf16.mxu1 %vm9244_vm4, %v9243_v52 }
 0x9e6   :  { %8279 = vmatprep.subr.bf16.mxu1 %v9243_v52 }
 0x9e9   :  { %8280 = vmatpush3.bf16.msra.mxu1 %v9232_v62 }
 0x9ea   :  { %8293 = vmatprep.subr.bf16.mxu1 %v9243_v52 }
 0x9ec   :  { %8270 = vmatmul.mubr.msk.bf16.gmra.mrb[40].mxu1 %vm277_vm1, %v11009_v48  ;;  %v9234_v48 = vld [vmem:[%s11382_s3 + $0x28] sm:$0xff]  }
 0x9ed   :  { %8273 = vmatprep.mubr.msk.bf16.mxu1 %vm9244_vm4, %v9243_v52 }
 0x9f4   :  { %8274 = vmatmul.mubr.msk.bf16.gmra.mrb[44].mxu1 %vm277_vm1, %v11027_v28 }
 0x9f5   :  { %8281 = vmatprep.mubr.msk.bf16.mxu1 %vm9244_vm4, %v9243_v52 }
 0x9fc   :  { %8282 = vmatmul.mubr.msk.bf16.vlgmr.msra.gmra.mrb[36].mxu1 %vm277_vm1, %v10902_v7  ;;  %v7232_v7 = vld [vmem:[#allocation2 + $0xc4] sm:$0xff] }
 0x9fd   :  { %8294 = vmatpush3.bf16.msra.mxu1 %v9233_v12  ;;  %8285 = vmatprep.mubr.msk.bf16.mxu1 %vm9244_vm4, %v9243_v52 }
 0x9fe   :  { %8295 = vmatprep.subr.bf16.mxu1 %v9243_v52 }
 0xa01   :  { %8296 = vmatpush3.bf16.msra.mxu1 %v9234_v48 }
 0xa02   :  { %8309 = vmatprep.subr.bf16.mxu1 %v9243_v52 }
 0xa04   :  { %8286 = vmatmul.mubr.msk.bf16.gmra.mrb[40].mxu1 %vm277_vm1, %v10972_v26  ;;  %v5572_v26 = vld [vmem:[#allocation2 + $0xc8] sm:$0xff] }
 0xa05   :  { %8289 = vmatprep.mubr.msk.bf16.mxu1 %vm9244_vm4, %v9243_v52  ;;  %v7059_v28 = vcombine.low %v5572_v26, %v5572_v26 }
 0xa07   :  { %v5784_v58 = vrot.slane %v7059_v28, 6 }
 0xa0c   :  { %8290 = vmatmul.mubr.msk.bf16.gmra.mrb[44].mxu1 %vm277_vm1, %v10980_v55  ;;  %v7063_v55 = vcombine.low %v11003_v29, %v11019_v60 }
 0xa0d   :  { %8297 = vmatprep.mubr.msk.bf16.mxu1 %vm9244_vm4, %v9243_v52 }
 0xa14   :  { %8298 = vmatmul.mubr.msk.bf16.vlgmr.msra.gmra.mrb[36].mxu1 %vm277_vm1, %v11033_v18 }
 0xa15   :  { %8310 = vmatpush3.bf16.msra.mxu1 %v10543_v9  ;;  %8301 = vmatprep.mubr.msk.bf16.mxu1 %vm9244_vm4, %v9243_v52  ;;  %v5571_v9 = vld [vmem:[#allocation2 + $0xc0] sm:$0xff] }
 0xa16   :  { %8311 = vmatprep.subr.bf16.mxu1 %v9243_v52 }
 0xa19   :  { %8312 = vmatpush3.bf16.msra.mxu1 %v10552_v13  ;;  %v7049_v13 = vcombine.low %v10990_v5, %v5571_v9 }
 0xa1a   :  { %8325 = vmatprep.subr.bf16.mxu1 %v9243_v52 }
 0xa1c   :  { %8302 = vmatmul.mubr.msk.bf16.gmra.mrb[40].mxu1 %vm277_vm1, %v11044_v54  ;;  %v7060_v54 = vcombine.high %v5572_v26, %v5572_v26 }
 0xa1d   :  { %8305 = vmatprep.mubr.msk.bf16.mxu1 %vm9244_vm4, %v9243_v52 }
 0xa1e   :  { %v5686_v49 = vrot.slane %v7060_v54, 5  ;;  %v5787_v50 = vrot.slane %v7060_v54, 6  ;;  %v9200_v54 = vld [vmem:[%s11384_s5 + $0x1f8] sm:$0xff]  }
 0xa24   :  { %8306 = vmatmul.mubr.msk.bf16.gmra.mrb[44].mxu1 %vm277_vm1, %v11063_v22  ;;  %v5683_v22 = vrot.slane %v7059_v28, 5 }
 0xa25   :  { %8313 = vmatprep.mubr.msk.bf16.mxu1 %vm9244_vm4, %v9243_v52 }
 0xa26   :  { %v5685_v60 = vrot.slane %v5683_v22, 4 }
 0xa28   :  { %v5687_v0 = vsel %vm9379_vm5, %v5685_v60, %v5686_v49  ;;  %v9204_v60 = vld [vmem:[%s11384_s5 + $0x218] sm:$0xff]   ;;  %v9205_v49 = vld [vmem:[%s11384_s5 + $0x220] sm:$0xff]  }
 0xa2c   :  { %8314 = vmatmul.mubr.msk.bf16.vlgmr.msra.gmra.mrb[36].mxu1 %vm277_vm1, %v10968_v2  ;;  %v7058_v2 = vcombine.high %v5571_v9, %v5571_v9 }
 0xa2d   :  { %8326 = vmatpush3.bf16.msra.mxu1 %v10569_v33  ;;  %8317 = vmatprep.mubr.msk.bf16.mxu1 %vm9244_vm4, %v9243_v52  ;;  %v7057_v33 = vcombine.low %v5571_v9, %v5571_v9 }
 0xa2e   :  { %8327 = vmatprep.subr.bf16.mxu1 %v9243_v52  ;;  %v5680_v5 = vrot.slane %v7058_v2, 5  ;;  %v5781_v17 = vrot.slane %v7058_v2, 6 }
 0xa30   :  { %v5682_v29 = vrot.slane %v5680_v5, 4 }
 0xa31   :  { %8328 = vmatpush3.bf16.msra.mxu1 %v10582_v20  ;;  %v7062_v20 = vrot.slane %v7057_v33, 9 }
 0xa32   :  { %8341 = vmatprep.subr.bf16.mxu1 %v9243_v52 }
 0xa33   :  { %v5681_v18 = vsel %vm9379_vm5, %v7062_v20, %v5680_v5 }
 0xa34   :  { %8318 = vmatmul.mubr.msk.bf16.gmra.mrb[40].mxu1 %vm277_vm1, %v7049_v13  ;;  %v7064_v45 = vcombine.low %v11023_v59, %v5681_v18  ;;  %v7070_v59 = vrot.slane %v7057_v33, 10  ;;  %v6089_v13 = vrot.slane %v7088_v51, 6 }
 0xa35   :  { %8321 = vmatprep.mubr.msk.bf16.mxu1 %vm9244_vm4, %v9243_v52 }
 0xa36   :  { %v5782_v46 = vsel %vm9543_vm8, %v7070_v59, %v5781_v17 }
 0xa37   :  { %v7072_v53 = vcombine.low %v11056_v16, %v5782_v46 }
 0xa3c   :  { %8322 = vmatmul.mubr.msk.bf16.gmra.mrb[44].mxu1 %vm277_vm1, %v7232_v7 }
 0xa3d   :  { %8329 = vmatprep.mubr.msk.bf16.mxu1 %vm9244_vm4, %v9243_v52 }
 0xa44   :  { %8330 = vmatmul.mubr.msk.bf16.vlgmr.msra.gmra.mrb[36].mxu1 %vm277_vm1, %v7063_v55 }
 0xa45   :  { %8342 = vmatpush3.bf16.msra.mxu1 %v10602_v10  ;;  %8333 = vmatprep.mubr.msk.bf16.mxu1 %vm9244_vm4, %v9243_v52  ;;  %v5684_v10 = vsel %vm9379_vm5, %v5682_v29, %v5683_v22  ;;  %v9201_v22 = vld [vmem:[%s11384_s5 + $0x200] sm:$0xff]   ;;  %v9203_v29 = vld [vmem:[%s11384_s5 + $0x210] sm:$0xff]  }
 0xa46   :  { %8343 = vmatprep.subr.bf16.mxu1 %v9243_v52  ;;  %v7065_v40 = vcombine.low %v5684_v10, %v5687_v0  ;;  %v7091_v37 = vcombine.low %v5681_v18, %v5684_v10  ;;  %v9197_v18 = vld [vmem:[%s11384_s5 + $0x1e0] sm:$0xff]  }
 0xa47   :  { %6318 = vmatpush1.bf16.msra.mxu0 %v9197_v18 }
 0xa48   :  { %6319 = vmatprep.subr.bf16.mxu0 %v9245_v30 }
 0xa49   :  { %8344 = vmatpush3.bf16.msra.mxu1 %v10614_v39  ;;  %v7071_v39 = vcombine.low %v11041_v23, %v11052_v57  ;;  %v5783_v23 = vrot.slane %v5781_v17, 4  ;;  %v5786_v57 = vrot.slane %v5784_v58, 4 }
 0xa4a   :  { %8357 = vmatprep.subr.bf16.mxu1 %v9243_v52 }
 0xa4b   :  { %v5788_v63 = vsel %vm9543_vm8, %v5786_v57, %v5787_v50  ;;  %6320 = vmatpush1.bf16.msra.mxu0 %v9198_v19  ;;  %v9206_v57 = vld [vmem:[%s11384_s5 + $0x228] sm:$0xff]  }
 0xa4c   :  { %8334 = vmatmul.mubr.msk.bf16.gmra.mrb[40].mxu1 %vm277_vm1, %v7064_v45  ;;  %6321 = vmatprep.subr.bf16.mxu0 %v9245_v30  ;;  %v9202_v45 = vld [vmem:[%s11384_s5 + $0x208] sm:$0xff]  }
 0xa4d   :  { %8337 = vmatprep.mubr.msk.bf16.mxu1 %vm9244_vm4, %v9243_v52 }
 0xa54   :  { %8338 = vmatmul.mubr.msk.bf16.gmra.mrb[44].mxu1 %vm277_vm1, %v7065_v40 }
 0xa55   :  { %8345 = vmatprep.mubr.msk.bf16.mxu1 %vm9244_vm4, %v9243_v52 }
 0xa5c   :  { %8346 = vmatmul.mubr.msk.bf16.vlgmr.msra.gmra.mrb[36].mxu1 %vm277_vm1, %v7071_v39 }
 0xa5d   :  { %8358 = vmatpush3.bf16.msra.mxu1 %v10634_v35  ;;  %8349 = vmatprep.mubr.msk.bf16.mxu1 %vm9244_vm4, %v9243_v52  ;;  %v5785_v35 = vsel %vm9543_vm8, %v5783_v23, %v5784_v58 }
 0xa5e   :  { %8359 = vmatprep.subr.bf16.mxu1 %v9243_v52  ;;  %v7073_v3 = vcombine.low %v5785_v35, %v5788_v63 }
 0xa61   :  { %8360 = vmatpush3.bf16.msra.mxu1 %v10646_v47  ;;  %v5873_v47 = vld [vmem:[#allocation2 + $0xd0] sm:$0xff] }
 0xa62   :  { %8373 = vmatprep.subr.bf16.mxu1 %v9243_v52  ;;  %v7077_v16 = vcombine.low %v5572_v26, %v5873_v47  ;;  %v7086_v8 = vcombine.high %v5873_v47, %v5873_v47 }
 0xa64   :  { %8350 = vmatmul.mubr.msk.bf16.gmra.mrb[40].mxu1 %vm277_vm1, %v7072_v53  ;;  %v5982_v27 = vrot.slane %v7086_v8, 5  ;;  %v6083_v42 = vrot.slane %v7086_v8, 6 }
 0xa65   :  { %8353 = vmatprep.mubr.msk.bf16.mxu1 %vm9244_vm4, %v9243_v52 }
 0xa66   :  { %v5984_v24 = vrot.slane %v5982_v27, 4  ;;  %v6085_v48 = vrot.slane %v6083_v42, 4 }
 0xa6c   :  { %8354 = vmatmul.mubr.msk.bf16.gmra.mrb[44].mxu1 %vm277_vm1, %v7073_v3 }
 0xa6d   :  { %8361 = vmatprep.mubr.msk.bf16.mxu1 %vm9244_vm4, %v9243_v52 }
 0xa74   :  { %8362 = vmatmul.mubr.msk.bf16.vlgmr.msra.gmra.mrb[36].mxu1 %vm277_vm1, %v5571_v9 }
 0xa75   :  { %8374 = vmatpush3.bf16.msra.mxu1 %v10665_v4  ;;  %8365 = vmatprep.mubr.msk.bf16.mxu1 %vm9244_vm4, %v9243_v52  ;;  %v7085_v4 = vcombine.low %v5873_v47, %v5873_v47 }
 0xa76   :  { %8375 = vmatprep.subr.bf16.mxu1 %v9243_v52 }
 0xa77   :  { %v7090_v31 = vrot.slane %v7085_v4, 9  ;;  %v7098_v56 = vrot.slane %v7085_v4, 10 }
 0xa79   :  { %8376 = vmatpush3.bf16.msra.mxu1 %v10679_v43  ;;  %v7087_v43 = vcombine.low %v5874_v15, %v5874_v15  ;;  %v5983_v34 = vsel %vm9379_vm5, %v7090_v31, %v5982_v27  ;;  %v6084_v62 = vsel %vm9543_vm8, %v7098_v56, %v6083_v42  ;;  %v9208_v27 = vld [vmem:[%s11384_s5 + $0x238] sm:$0xff]  }
 0xa7a   :  { %8389 = vmatprep.subr.bf16.mxu1 %v9243_v52  ;;  %v7092_v6 = vcombine.low %v5687_v0, %v5983_v34  ;;  %v7100_v61 = vcombine.low %v5788_v63, %v6084_v62 }
 0xa7b   :  { %v5985_v32 = vrot.slane %v7087_v43, 5  ;;  %v6086_v12 = vrot.slane %v7087_v43, 6 }
 0xa7c   :  { %8366 = vmatmul.mubr.msk.bf16.gmra.mrb[40].mxu1 %vm277_vm1, %v7077_v16  ;;  %v9207_v16 = vld [vmem:[%s11384_s5 + $0x230] sm:$0xff]  }
 0xa7d   :  { %8369 = vmatprep.mubr.msk.bf16.mxu1 %vm9244_vm4, %v9243_v52  ;;  %v5987_v25 = vrot.slane %v5985_v32, 4  ;;  %v6088_v9 = vrot.slane %v6086_v12, 4  ;;  %v6087_v7 = vsel %vm9543_vm8, %v6085_v48, %v6086_v12 }
 0xa7f   :  { %v5989_v36 = vsel %vm9379_vm5, %v5987_v25, %v5988_v21  ;;  %v6090_v33 = vsel %vm9543_vm8, %v6088_v9, %v6089_v13  ;;  %v9209_v13 = vld [vmem:[%s11386_s7] sm:$0xff]  }
 0xa80   :  { %v7101_v20 = vcombine.low %v6087_v7, %v6090_v33  ;;  %v9210_v7 = vld [vmem:[%s11386_s7 + $0x8] sm:$0xff]  }
 0xa84   :  { %8370 = vmatmul.mubr.msk.bf16.gmra.mrb[44].mxu1 %vm277_vm1, %v7234_v14 }
 0xa85   :  { %8377 = vmatprep.mubr.msk.bf16.mxu1 %vm9244_vm4, %v9243_v52 }
 0xa8c   :  { %8378 = vmatmul.mubr.msk.bf16.vlgmr.msra.gmra.mrb[36].mxu1 %vm277_vm1, %v7091_v37 }
 0xa8d   :  { %8390 = vmatpush3.bf16.msra.mxu1 %v10708_v41  ;;  %8381 = vmatprep.mubr.msk.bf16.mxu1 %vm9244_vm4, %v9243_v52  ;;  %v5986_v41 = vsel %vm9379_vm5, %v5984_v24, %v5985_v32 }
 0xa8e   :  { %8391 = vmatprep.subr.bf16.mxu1 %v9243_v52  ;;  %v7093_v11 = vcombine.low %v5986_v41, %v5989_v36 }
 0xa91   :  { %8392 = vmatpush3.bf16.msra.mxu1 %v10726_v44  ;;  %v7099_v44 = vcombine.low %v5782_v46, %v5785_v35 }
 0xa94   :  { %8382 = vmatmul.mubr.msk.bf16.gmra.mrb[40].mxu1 %vm277_vm1, %v7092_v6 }
 0xa95   :  { %8385 = vmatprep.mubr.msk.bf16.mxu1 %vm9244_vm4, %v9243_v52 }
 0xa9c   :  { %8386 = vmatmul.mubr.msk.bf16.gmra.mrb[44].mxu1 %vm277_vm1, %v7093_v11 }
 0xa9d   :  { %8393 = vmatprep.mubr.msk.bf16.mxu1 %vm9244_vm4, %v9243_v52 }
 0xaa4   :  { %8394 = vmatmul.mubr.msk.bf16.vlgmr.msra.gmra.mrb[36].mxu1 %vm277_vm1, %v7099_v44 }
 0xaa5   :  { %8397 = vmatprep.mubr.msk.bf16.mxu1 %vm9244_vm4, %v9243_v52 }
 0xaac   :  { %8398 = vmatmul.mubr.msk.bf16.gmra.mrb[40].mxu1 %vm277_vm1, %v7100_v61 }
 0xaad   :  { %8401 = vmatprep.mubr.msk.bf16.mxu1 %vm9244_vm4, %v9243_v52 }
 0xaaf   :  { %v5384_v2 = vpop.f32.mrb[32].mxu1 }
 0xab0   :  { %v11295_v26 = vadd.f32 %v5384_v2, %v11059_v38  ;;  %v5386_v55 = vpop.f32.mrb[33].mxu1  ;;  %v9199_v38 = vld [vmem:[%s11384_s5 + $0x1f0] sm:$0xff]   ;;  %v7142_v2 = vld [vmem:[%s11385_s6] ss:$0 sm:$0xff] }
 0xab1   :  { %v5387_v5 = vpop.f32.mrb[34].mxu1  ;;  %6322 = vmatpush1.bf16.msra.mxu0 %v9199_v38 }
 0xab2   :  { %v5388_v28 = vpop.f32.mrb[35].mxu1  ;;  %6323 = vmatprep.subr.bf16.mxu0 %v9245_v30 }
 0xab4   :  { %8402 = vmatmul.mubr.msk.bf16.gmra.mrb[44].mxu1 %vm277_vm1, %v7101_v20 }
 0xab5   :  { %6324 = vmatpush1.bf16.msra.mxu0 %v9200_v54 }
 0xab6   :  { %6325 = vmatprep.subr.bf16.mxu0 %v9245_v30 }
 0xab9   :  { %6326 = vmatpush1.bf16.msra.mxu0 %v9201_v22 }
 0xaba   :  { %6327 = vmatprep.subr.bf16.mxu0 %v9245_v30 }
 0xabd   :  { %6328 = vmatpush1.bf16.msra.mxu0 %v9202_v45 }
 0xabe   :  { %6329 = vmatprep.subr.bf16.mxu0 %v9245_v30 }
 0xac1   :  { %6330 = vmatpush1.bf16.msra.mxu0 %v9203_v29 }
 0xac2   :  { %6331 = vmatprep.subr.bf16.mxu0 %v9245_v30 }
 0xac5   :  { %6332 = vmatpush1.bf16.msra.mxu0 %v9204_v60 }
 0xac6   :  { %6333 = vmatprep.subr.bf16.mxu0 %v9245_v30 }
 0xac9   :  { %6334 = vmatpush1.bf16.msra.mxu0 %v9205_v49 }
 0xaca   :  { %6335 = vmatprep.subr.bf16.mxu0 %v9245_v30 }
 0xacd   :  { %6336 = vmatpush1.bf16.msra.mxu0 %v9206_v57 }
 0xace   :  { %6337 = vmatprep.subr.bf16.mxu0 %v9245_v30 }
 0xad1   :  { %6338 = vmatpush1.bf16.msra.mxu0 %v9207_v16 }
 0xad2   :  { %6339 = vmatprep.subr.bf16.mxu0 %v9245_v30 }
 0xad5   :  { %6340 = vmatpush1.bf16.msra.mxu0 %v9208_v27 }
 0xad6   :  { %8405 = vmatprep.subr.bf16.mxu0 %v9243_v52 }
 0xb77   :  { %v6143_v10 = vpop.f32.mrb[36].mxu1 }
 0xb78   :  { %v8395_v0 = vpop.f32.mrb[37].mxu1 }
 0xb79   :  { %v6146_v40 = vpop.f32.mrb[38].mxu1 }
 0xb7a   :  { %v8396_v39 = vpop.f32.mrb[39].mxu1 }
 0xb7f   :  { %v6151_v59 = vpop.f32.mrb[40].mxu1 }
 0xb80   :  { %v8399_v17 = vpop.f32.mrb[41].mxu1 }
 0xb81   :  { %v6154_v46 = vpop.f32.mrb[42].mxu1 }
 0xb82   :  { %v6172_v58 = vmax.f32 %v6143_v10, %v6154_v46  ;;  %v8400_v53 = vpop.f32.mrb[43].mxu1 }
 0xb84   :  { %v6176_v23 = vrot.slane %v6172_v58, 2 }
 0xb86   :  { %v6178_v35 = vmax.f32 %v6172_v58, %v6176_v23 }
 0xb87   :  { %v6159_v50 = vpop.f32.mrb[44].mxu1 }
 0xb88   :  { %v6173_v63 = vmax.f32 %v6146_v40, %v6159_v50  ;;  %v8403_v3 = vpop.f32.mrb[45].mxu1  ;;  %v6179_v15 = vadd.f32 %v9307_v1, %v6178_v35 }
 0xb89   :  { %v6162_v47 = vpop.f32.mrb[46].mxu1 }
 0xb8a   :  { %v6182_v14 = vrot.slane %v6173_v63, 2  ;;  %v6174_v4 = vmax.f32 %v6151_v59, %v6162_v47  ;;  %v8404_v8 = vpop.f32.mrb[47].mxu1  ;;  %v6180_v51 = vmax.f32 %v6179_v15, 0.0 }
 0xb8c   :  { %v6184_v37 = vmax.f32 %v6173_v63, %v6182_v14  ;;  %v6188_v31 = vrot.slane %v6174_v4, 2  ;;  %v6194_v25 = vrot.slane %v6180_v51, 4 }
 0xb8e   :  { %v6185_v43 = vadd.f32 %v9307_v1, %v6184_v37  ;;  %v6190_v34 = vmax.f32 %v6174_v4, %v6188_v31 }
 0xb90   :  { %v6186_v32 = vmax.f32 %v6185_v43, 0.0  ;;  %v6191_v6 = vadd.f32 %v9307_v1, %v6190_v34 }
 0xb92   :  { %v6192_v24 = vmax.f32 %v6191_v6, 0.0  ;;  %6199 = vrot.lane.b32.xlu0 %v6186_v32, %s9248_s12  ;;  %v6202_v41 = vrot.slane %v6186_v32, 4 }
 0xb94   :  { %v6207_v21 = vrot.slane %v6192_v24, 4 }
 0xb96   :  { %v9045_v30 = vpack.i.bf16 %v6207_v21, %v6194_v25 }
 0xb98   :  { %9046 = vrot.lane.b32.xlu1 %v9045_v30, %s9247_s11 }
 0xb9c   :  { %6203 = vrot.lane.b32.xlu1 %v6202_v41, %s9246_s10 }
 0xc04   :  { %v6200_v56 = vpop.permute.xlu0 %6199 }
 0xc0a   :  { %v9047_v36 = vpop.permute.xlu1 %9046 }
 0xc0b   :  { %v9049_v11 = vunpack.i.h.bf16 %v9047_v36  ;;  %v9048_v44 = vunpack.i.l.bf16 %v9047_v36 }
 0xc0d   :  { %v6214_v42 = vsel %vm277_vm1, %v6192_v24, %v9049_v11  ;;  %v6211_v1 = vsel %vm277_vm1, %v6180_v51, %v9048_v44 }
 0xc0e   :  { %v6216_v62 = vpack.c.bf16 %v6214_v42, %v6214_v42  ;;  %v6204_v12 = vpop.permute.xlu1 %6203  ;;  %v6212_v61 = vsel %vm1378_vm9, %v6211_v1, %v6200_v56 }
 0xc0f   :  { %v6213_v48 = vsel %vm1380_vm10, %v6212_v61, %v6204_v12 }
 0xc10   :  { %v6215_v9 = vpack.c.bf16 %v6213_v48, %v6213_v48  ;;  %7141 = vmatprep.mubr.msk.bf16.mxu0 %vm1378_vm9, %v6216_v62 }
 0xc12   :  { %6350 = vmatmul.mubr.bf16.vlgmr.msra.gmra.mrb[44].mxu0 %v6215_v9 }
 0xc13   :  { %8409 = vmatprep.mubr.msk.bf16.mxu0 %vm9244_vm4, %v9243_v52  ;;  %8406 = vmatpush3.bf16.msra.mxu0 %v9209_v13 }
 0xc14   :  { %8407 = vmatprep.subr.bf16.mxu0 %v9243_v52  ;;  %v7143_v52 = vld [vmem:[%s11387_s8] ss:$0 sm:$0xff] }
 0xc17   :  { %8408 = vmatpush3.bf16.msra.mxu0 %v9210_v7 }
 0xce5   :  { %v6351_v33 = vpop.f32.mrb[44].mxu0 }
 0xce6   :  { %v6357_v55 = vadd.f32 %v6351_v33, %v11295_v26  ;;  %v6353_v20 = vpop.f32.mrb[45].mxu0 }
 0xce7   :  { %v6354_v5 = vpop.f32.mrb[46].mxu0 }
 0xce8   :  { %v6365_v28 = vadd.f32 %v7142_v2, %v6357_v55  ;;  %v6355_v18 = vpop.f32.mrb[47].mxu0 }
 0xcea   :  { %v6366_v19 = vmax.f32 %v6365_v28, 0.0 }
 0xcec   :  { %v6367_v38 = vpack.c.bf16 %v6366_v19, %v6366_v19 }
 0xcee   :  { %8410 = vmatmul.mubr.msk.bf16.vlgmr.msra.gmra.mrb[48].mxu0 %vm277_vm1, %v6367_v38 }
 0xdc1   :  { %v6428_v54 = vpop.f32.mrb[48].mxu0 }
 0xdc2   :  { %v6429_v22 = vadd.f32 %v7143_v52, %v6428_v54  ;;  %v8411_v45 = vpop.f32.mrb[49].mxu0 }
 0xdc3   :  { %v6431_v29 = vpop.f32.mrb[50].mxu0 }
 0xdc4   :  { %v6434_v60 = vmax.f32 %v6429_v22, 0.0  ;;  %v8412_v49 = vpop.f32.mrb[51].mxu0 }
 0xdc6   :  { %6436 = vrot.lane.b32.xlu0 %v6434_v60, %s9247_s11 }
 0xe38   :  { %v6437_v26 = vpop.permute.xlu0 %6436 }
 0xe39   :  { %v6439_v10 = vsel %vm277_vm1, %v6366_v19, %v6437_v26 }
 0xe3a   :  { %6441 = vst.msk [vmem:[%s11388_s9] sm:$0x3] %vm6440_vm11, %v6439_v10 }

</bundles_post_ra>
